<compile_context>
chip_gen: v5e
topology: v5e:2x2
jax: 0.10.0
libtpu: 0.0.40
codegen_flags: <defaults>
</compile_context>

<pallas_src>
import jax
import jax.numpy as jnp
import numpy as np
from jax.experimental import pallas as pl
from jax.experimental.pallas import tpu as pltpu


# ------------------------------ Wrapper + kernel ------------------------------
def fire_forward(x_nchw, params):
    """Fire forward pass.  x_nchw: (N, Cin, H, W) float32.  Returns NCHW."""
    N, Cin, H, W = x_nchw.shape
    Cs = params["w_sq"].shape[1]
    Ce = params["w_ex"].shape[1]           # C1 + C3
    Hp, Wp = H + 2, W + 2                  # zero-padded spatial extent
    HWo = H * Wp                           # kernel emits H rows x Wp cols
    OFF = 8                                # halo offset inside squeeze scratch
    L = Hp * Wp + 2 * OFF                  # scratch rows (head/tail halo)

    # NCHW -> NHWC, zero-pad spatially by 1, flatten spatial: (N, Hp*Wp, Cin)
    x_nhwc = jnp.transpose(x_nchw, (0, 2, 3, 1))
    xp = jnp.pad(x_nhwc, ((0, 0), (1, 1), (1, 1), (0, 0)))
    xp = xp.reshape(N, Hp * Wp, Cin)

    # Border mask: conv3x3 pads the *squeeze output* with zeros, but the
    # squeeze of a zero-padded input is relu(shift) != 0 there -> mask it out.
    mask = (jnp.zeros((Hp, Wp), jnp.float32)
            .at[1:H + 1, 1:W + 1].set(1.0)
            .reshape(Hp * Wp, 1))

    def kernel(xp_ref, mask_ref, wsq_ref, bsq_ref, wex_ref, bex_ref,
               out_ref, s_ref):
        # ---- squeeze: 1x1 conv (BN scale folded) + shift + ReLU, in VMEM ----
        s = jnp.dot(xp_ref[...], wsq_ref[...],
                    preferred_element_type=jnp.float32)
        s = jnp.maximum(s + bsq_ref[...], 0.0) * mask_ref[...]
        s_ref[pl.ds(0, OFF), :] = jnp.zeros((OFF, Cs), jnp.float32)
        s_ref[pl.ds(OFF, Hp * Wp), :] = s
        s_ref[pl.ds(L - OFF, OFF), :] = jnp.zeros((OFF, Cs), jnp.float32)

        # ---- fused expand1x1 + expand3x3: 9 shifted accumulating dots -------
        first = True
        for ky in range(3):
            for kx in range(3):
                t = ky * 3 + kx
                start = OFF + ky * Wp + kx - 1
                contrib = jnp.dot(s_ref[pl.ds(start, HWo), :],
                                  wex_ref[pl.ds(t * Cs, Cs), :],
                                  preferred_element_type=jnp.float32)
                if first:
                    out_ref[...] = contrib
                    first = False
                else:
                    out_ref[...] += contrib
        out_ref[...] = jnp.maximum(out_ref[...] + bex_ref[...], 0.0)

    full = lambda n: (0, 0)
    out = pl.pallas_call(
        kernel,
        out_shape=jax.ShapeDtypeStruct((N, HWo, Ce), jnp.float32),
        grid_spec=pltpu.PrefetchScalarGridSpec(
            num_scalar_prefetch=0,
            grid=(N,),
            in_specs=[
                pl.BlockSpec((None, Hp * Wp, Cin), lambda n: (n, 0, 0)),
                pl.BlockSpec((Hp * Wp, 1), full),
                pl.BlockSpec((Cin, Cs), full),
                pl.BlockSpec((1, Cs), full),
                pl.BlockSpec((9 * Cs, Ce), full),
                pl.BlockSpec((1, Ce), full),
            ],
            out_specs=pl.BlockSpec((None, HWo, Ce), lambda n: (n, 0, 0)),
            scratch_shapes=[pltpu.VMEM((L, Cs), jnp.float32)],
        ),
        compiler_params=pltpu.CompilerParams(
            dimension_semantics=("parallel",)),
    )(xp, mask, params["w_sq"], params["b_sq"], params["w_ex"], params["b_ex"])

    # (N, H*Wp, Ce) -> drop the 2 pad columns -> NCHW (slice+transpose fuse)
    out = out.reshape(N, H, Wp, Ce)[:, :, 1:W + 1, :]
    return jnp.transpose(out, (0, 3, 1, 2))


# ---------------------- deterministic parameter setup -------------------------
def make_params(key, inplanes, squeeze_planes, expand1x1_planes,
                expand3x3_planes, eps=1e-5):
    ks = jax.random.split(key, 18)

    def u(k, shape, lo=-0.3, hi=0.3):
        return jax.random.uniform(k, shape, jnp.float32, lo, hi)

    Cin, Cs = inplanes, squeeze_planes
    C1, C3 = expand1x1_planes, expand3x3_planes

    # raw (PyTorch-convention) parameters
    w_sq = u(ks[0], (Cs, Cin, 1, 1))
    b_sq = u(ks[1], (Cs,))
    w_e1 = u(ks[2], (C1, Cs, 1, 1))
    b_e1 = u(ks[3], (C1,))
    w_e3 = u(ks[4], (C3, Cs, 3, 3))
    b_e3 = u(ks[5], (C3,))

    def bn_params(k0, k1, k2, k3, c):
        return (u(k0, (c,), 0.5, 1.5), u(k1, (c,), -0.2, 0.2),
                u(k2, (c,), -0.1, 0.1), u(k3, (c,), 0.5, 1.5))

    bn_sq = bn_params(*ks[6:10], Cs)
    bn_e1 = bn_params(*ks[10:14], C1)
    bn_e3 = bn_params(*ks[14:18], C3)

    def fold(bias, bn):
        gamma, beta, mean, var = bn
        scale = gamma / jnp.sqrt(var + eps)
        shift = (bias - mean) * scale + beta
        return scale, shift

    sc_sq, sh_sq = fold(b_sq, bn_sq)
    sc_e1, sh_e1 = fold(b_e1, bn_e1)
    sc_e3, sh_e3 = fold(b_e3, bn_e3)

    # squeeze weight in matmul form with BN scale folded in: (Cin, Cs)
    w_sq_m = w_sq.reshape(Cs, Cin).T * sc_sq[None, :]

    # combined expand weight (9*Cs, C1+C3): 3x3 weight (scale-folded) in the
    # C1: columns of every tap, 1x1 weight (scale-folded) in the :C1 columns of
    # the centre tap (tap index 4).
    w_e3_m = (jnp.transpose(w_e3, (2, 3, 1, 0)).reshape(9 * Cs, C3)
              * sc_e3[None, :])
    w_e1_m = w_e1.reshape(C1, Cs).T * sc_e1[None, :]
    w_ex = jnp.zeros((9 * Cs, C1 + C3), jnp.float32)
    w_ex = w_ex.at[:, C1:].set(w_e3_m)
    w_ex = w_ex.at[4 * Cs:5 * Cs, :C1].set(w_e1_m)

    params = {
        "w_sq": w_sq_m,
        "b_sq": sh_sq[None, :],
        "w_ex": w_ex,
        "b_ex": jnp.concatenate([sh_e1, sh_e3])[None, :],
    }
    raw = dict(w_sq=w_sq, b_sq=b_sq, w_e1=w_e1, b_e1=b_e1, w_e3=w_e3,
               b_e3=b_e3, bn_sq=bn_sq, bn_e1=bn_e1, bn_e3=bn_e3, eps=eps)
    return params, raw


# ------------------------------ JAX reference ---------------------------------
def fire_reference(x, raw):
    eps = raw["eps"]

    def conv(x, w, pad):
        return jax.lax.conv_general_dilated(
            x, w, (1, 1), [(pad, pad), (pad, pad)],
            dimension_numbers=("NCHW", "OIHW", "NCHW"))

    def bn(y, bnp):
        gamma, beta, mean, var = bnp
        inv = gamma / jnp.sqrt(var + eps)
        return (y - mean[None, :, None, None]) * inv[None, :, None, None] \
            + beta[None, :, None, None]

    s = conv(x, raw["w_sq"], 0) + raw["b_sq"][None, :, None, None]
    s = jax.nn.relu(bn(s, raw["bn_sq"]))
    e1 = conv(s, raw["w_e1"], 0) + raw["b_e1"][None, :, None, None]
    e1 = jax.nn.relu(bn(e1, raw["bn_e1"]))
    e3 = conv(s, raw["w_e3"], 1) + raw["b_e3"][None, :, None, None]
    e3 = jax.nn.relu(bn(e3, raw["bn_e3"]))
    return jnp.concatenate([e1, e3], axis=1)


if __name__ == "__main__":
    # small Fire config: inplanes=16, squeeze=8, expand1x1=16, expand3x3=16
    N, Cin, H, W = 2, 16, 16, 16
    Cs, C1, C3 = 8, 16, 16

    key = jax.random.PRNGKey(0)
    kx, kp = jax.random.split(key)
    x = jax.random.normal(kx, (N, Cin, H, W), jnp.float32)   # NCHW like PyTorch

    params, raw = make_params(kp, Cin, Cs, C1, C3)

    out = jax.jit(fire_forward)(x, params)
    out = jax.block_until_ready(out)

    ref = fire_reference(x, raw)
    assert out.shape == (N, C1 + C3, H, W), out.shape
    np.testing.assert_allclose(np.asarray(out), np.asarray(ref),
                               rtol=1e-4, atol=1e-4)
    print("KERNEL_OK")
</pallas_src>

<mosaic_0001>
module attributes {stable_mosaic.version = 11 : i64} {
  func.func @kernel(%arg0: i32, %arg1: memref<1x324x16xf32, #tpu.memory_space<vmem>>, %arg2: memref<324x1xf32, #tpu.memory_space<vmem>>, %arg3: memref<16x8xf32, #tpu.memory_space<vmem>>, %arg4: memref<1x8xf32, #tpu.memory_space<vmem>>, %arg5: memref<72x32xf32, #tpu.memory_space<vmem>>, %arg6: memref<1x32xf32, #tpu.memory_space<vmem>>, %arg7: memref<1x288x32xf32, #tpu.memory_space<vmem>>, %arg8: memref<340x8xf32, #tpu.memory_space<vmem>>) attributes {dimension_semantics = [#tpu.dimension_semantics<parallel>], iteration_bounds = array<i64: 2>, scalar_prefetch = 0 : i64, scratch_operands = 1 : i64, tpu.core_type = #tpu.core_type<tc>, window_params = [{transform_indices = @transform_0, window_bounds = array<i64: 1, 324, 16>}, {pipeline_mode = #tpu.pipeline_mode<synchronous>, transform_indices = @transform_1, window_bounds = array<i64: 324, 1>}, {pipeline_mode = #tpu.pipeline_mode<synchronous>, transform_indices = @transform_2, window_bounds = array<i64: 16, 8>}, {pipeline_mode = #tpu.pipeline_mode<synchronous>, transform_indices = @transform_3, window_bounds = array<i64: 1, 8>}, {pipeline_mode = #tpu.pipeline_mode<synchronous>, transform_indices = @transform_4, window_bounds = array<i64: 72, 32>}, {pipeline_mode = #tpu.pipeline_mode<synchronous>, transform_indices = @transform_5, window_bounds = array<i64: 1, 32>}, {transform_indices = @transform_6, window_bounds = array<i64: 1, 288, 32>}]} {
    %c0 = arith.constant 0 : index
    %c0_0 = arith.constant 0 : index
    %c0_1 = arith.constant 0 : index
    %0 = vector.load %arg1[%c0, %c0_0, %c0_1] : memref<1x324x16xf32, #tpu.memory_space<vmem>>, vector<1x324x16xf32>
    %1 = vector.shape_cast %0 : vector<1x324x16xf32> to vector<324x16xf32>
    %c0_2 = arith.constant 0 : index
    %c0_3 = arith.constant 0 : index
    %2 = vector.load %arg3[%c0_2, %c0_3] : memref<16x8xf32, #tpu.memory_space<vmem>>, vector<16x8xf32>
    %cst = arith.constant dense<0.000000e+00> : vector<324x8xf32>
    %3 = tpu.matmul %1, %2, %cst {dimension_numbers = #tpu.dot_dimension_numbers<[1], [0], [0], [1], [0, 0, 1, 1], [], []>} : vector<324x16xf32>, vector<16x8xf32>, vector<324x8xf32> -> vector<324x8xf32>
    %c0_4 = arith.constant 0 : index
    %c0_5 = arith.constant 0 : index
    %4 = vector.load %arg4[%c0_4, %c0_5] : memref<1x8xf32, #tpu.memory_space<vmem>>, vector<1x8xf32>
    %5 = vector.broadcast %4 : vector<1x8xf32> to vector<324x8xf32>
    %6 = arith.addf %3, %5 : vector<324x8xf32>
    %cst_6 = arith.constant 0.000000e+00 : f32
    %7 = vector.broadcast %cst_6 : f32 to vector<324x8xf32>
    %8 = arith.maximumf %6, %7 : vector<324x8xf32>
    %c0_7 = arith.constant 0 : index
    %c0_8 = arith.constant 0 : index
    %9 = vector.load %arg2[%c0_7, %c0_8] : memref<324x1xf32, #tpu.memory_space<vmem>>, vector<324x1xf32>
    %10 = vector.broadcast %9 : vector<324x1xf32> to vector<324x8xf32>
    %11 = arith.mulf %8, %10 : vector<324x8xf32>
    %cst_9 = arith.constant 0.000000e+00 : f32
    %12 = vector.broadcast %cst_9 : f32 to vector<8x8xf32>
    %c0_10 = arith.constant 0 : index
    %c0_11 = arith.constant 0 : index
    %13 = vector.load %arg8[%c0_10, %c0_11] : memref<340x8xf32, #tpu.memory_space<vmem>>, vector<8x8xf32>
    tpu.vector_store %arg8[%c0_10, %c0_11], %12 {strides = array<i32>} : memref<340x8xf32, #tpu.memory_space<vmem>>, vector<8x8xf32>,
    %c8 = arith.constant 8 : index
    %c0_12 = arith.constant 0 : index
    %14 = vector.load %arg8[%c8, %c0_12] : memref<340x8xf32, #tpu.memory_space<vmem>>, vector<324x8xf32>
    tpu.vector_store %arg8[%c8, %c0_12], %11 {strides = array<i32>} : memref<340x8xf32, #tpu.memory_space<vmem>>, vector<324x8xf32>,
    %cst_13 = arith.constant 0.000000e+00 : f32
    %15 = vector.broadcast %cst_13 : f32 to vector<8x8xf32>
    %c332 = arith.constant 332 : index
    %c0_14 = arith.constant 0 : index
    %16 = vector.load %arg8[%c332, %c0_14] : memref<340x8xf32, #tpu.memory_space<vmem>>, vector<8x8xf32>
    tpu.vector_store %arg8[%c332, %c0_14], %15 {strides = array<i32>} : memref<340x8xf32, #tpu.memory_space<vmem>>, vector<8x8xf32>,
    %c7 = arith.constant 7 : index
    %c0_15 = arith.constant 0 : index
    %17 = vector.load %arg8[%c7, %c0_15] : memref<340x8xf32, #tpu.memory_space<vmem>>, vector<288x8xf32>
    %c0_16 = arith.constant 0 : index
    %c0_17 = arith.constant 0 : index
    %18 = vector.load %arg5[%c0_16, %c0_17] : memref<72x32xf32, #tpu.memory_space<vmem>>, vector<8x32xf32>
    %cst_18 = arith.constant dense<0.000000e+00> : vector<288x32xf32>
    %19 = tpu.matmul %17, %18, %cst_18 {dimension_numbers = #tpu.dot_dimension_numbers<[1], [0], [0], [1], [0, 0, 1, 1], [], []>} : vector<288x8xf32>, vector<8x32xf32>, vector<288x32xf32> -> vector<288x32xf32>
    %c0_19 = arith.constant 0 : index
    %c0_20 = arith.constant 0 : index
    %c0_21 = arith.constant 0 : index
    %20 = vector.load %arg7[%c0_19, %c0_20, %c0_21] : memref<1x288x32xf32, #tpu.memory_space<vmem>>, vector<1x288x32xf32>
    %21 = vector.shape_cast %20 : vector<1x288x32xf32> to vector<288x32xf32>
    %22 = vector.shape_cast %19 : vector<288x32xf32> to vector<1x288x32xf32>
    tpu.vector_store %arg7[%c0_19, %c0_20, %c0_21], %22 {strides = array<i32>} : memref<1x288x32xf32, #tpu.memory_space<vmem>>, vector<1x288x32xf32>,
    %c8_22 = arith.constant 8 : index
    %c0_23 = arith.constant 0 : index
    %23 = vector.load %arg8[%c8_22, %c0_23] : memref<340x8xf32, #tpu.memory_space<vmem>>, vector<288x8xf32>
    %c8_24 = arith.constant 8 : index
    %c0_25 = arith.constant 0 : index
    %24 = vector.load %arg5[%c8_24, %c0_25] : memref<72x32xf32, #tpu.memory_space<vmem>>, vector<8x32xf32>
    %cst_26 = arith.constant dense<0.000000e+00> : vector<288x32xf32>
    %25 = tpu.matmul %23, %24, %cst_26 {dimension_numbers = #tpu.dot_dimension_numbers<[1], [0], [0], [1], [0, 0, 1, 1], [], []>} : vector<288x8xf32>, vector<8x32xf32>, vector<288x32xf32> -> vector<288x32xf32>
    %c0_27 = arith.constant 0 : index
    %c0_28 = arith.constant 0 : index
    %c0_29 = arith.constant 0 : index
    %26 = vector.load %arg7[%c0_27, %c0_28, %c0_29] : memref<1x288x32xf32, #tpu.memory_space<vmem>>, vector<1x288x32xf32>
    %27 = vector.shape_cast %26 : vector<1x288x32xf32> to vector<288x32xf32>
    %28 = arith.addf %27, %25 : vector<288x32xf32>
    %c0_30 = arith.constant 0 : index
    %c0_31 = arith.constant 0 : index
    %c0_32 = arith.constant 0 : index
    %29 = vector.load %arg7[%c0_30, %c0_31, %c0_32] : memref<1x288x32xf32, #tpu.memory_space<vmem>>, vector<1x288x32xf32>
    %30 = vector.shape_cast %29 : vector<1x288x32xf32> to vector<288x32xf32>
    %31 = vector.shape_cast %28 : vector<288x32xf32> to vector<1x288x32xf32>
    tpu.vector_store %arg7[%c0_30, %c0_31, %c0_32], %31 {strides = array<i32>} : memref<1x288x32xf32, #tpu.memory_space<vmem>>, vector<1x288x32xf32>,
    %c9 = arith.constant 9 : index
    %c0_33 = arith.constant 0 : index
    %32 = vector.load %arg8[%c9, %c0_33] : memref<340x8xf32, #tpu.memory_space<vmem>>, vector<288x8xf32>
    %c16 = arith.constant 16 : index
    %c0_34 = arith.constant 0 : index
    %33 = vector.load %arg5[%c16, %c0_34] : memref<72x32xf32, #tpu.memory_space<vmem>>, vector<8x32xf32>
    %cst_35 = arith.constant dense<0.000000e+00> : vector<288x32xf32>
    %34 = tpu.matmul %32, %33, %cst_35 {dimension_numbers = #tpu.dot_dimension_numbers<[1], [0], [0], [1], [0, 0, 1, 1], [], []>} : vector<288x8xf32>, vector<8x32xf32>, vector<288x32xf32> -> vector<288x32xf32>
    %c0_36 = arith.constant 0 : index
    %c0_37 = arith.constant 0 : index
    %c0_38 = arith.constant 0 : index
    %35 = vector.load %arg7[%c0_36, %c0_37, %c0_38] : memref<1x288x32xf32, #tpu.memory_space<vmem>>, vector<1x288x32xf32>
    %36 = vector.shape_cast %35 : vector<1x288x32xf32> to vector<288x32xf32>
    %37 = arith.addf %36, %34 : vector<288x32xf32>
    %c0_39 = arith.constant 0 : index
    %c0_40 = arith.constant 0 : index
    %c0_41 = arith.constant 0 : index
    %38 = vector.load %arg7[%c0_39, %c0_40, %c0_41] : memref<1x288x32xf32, #tpu.memory_space<vmem>>, vector<1x288x32xf32>
    %39 = vector.shape_cast %38 : vector<1x288x32xf32> to vector<288x32xf32>
    %40 = vector.shape_cast %37 : vector<288x32xf32> to vector<1x288x32xf32>
    tpu.vector_store %arg7[%c0_39, %c0_40, %c0_41], %40 {strides = array<i32>} : memref<1x288x32xf32, #tpu.memory_space<vmem>>, vector<1x288x32xf32>,
    %c25 = arith.constant 25 : index
    %c0_42 = arith.constant 0 : index
    %41 = vector.load %arg8[%c25, %c0_42] : memref<340x8xf32, #tpu.memory_space<vmem>>, vector<288x8xf32>
    %c24 = arith.constant 24 : index
    %c0_43 = arith.constant 0 : index
    %42 = vector.load %arg5[%c24, %c0_43] : memref<72x32xf32, #tpu.memory_space<vmem>>, vector<8x32xf32>
    %cst_44 = arith.constant dense<0.000000e+00> : vector<288x32xf32>
    %43 = tpu.matmul %41, %42, %cst_44 {dimension_numbers = #tpu.dot_dimension_numbers<[1], [0], [0], [1], [0, 0, 1, 1], [], []>} : vector<288x8xf32>, vector<8x32xf32>, vector<288x32xf32> -> vector<288x32xf32>
    %c0_45 = arith.constant 0 : index
    %c0_46 = arith.constant 0 : index
    %c0_47 = arith.constant 0 : index
    %44 = vector.load %arg7[%c0_45, %c0_46, %c0_47] : memref<1x288x32xf32, #tpu.memory_space<vmem>>, vector<1x288x32xf32>
    %45 = vector.shape_cast %44 : vector<1x288x32xf32> to vector<288x32xf32>
    %46 = arith.addf %45, %43 : vector<288x32xf32>
    %c0_48 = arith.constant 0 : index
    %c0_49 = arith.constant 0 : index
    %c0_50 = arith.constant 0 : index
    %47 = vector.load %arg7[%c0_48, %c0_49, %c0_50] : memref<1x288x32xf32, #tpu.memory_space<vmem>>, vector<1x288x32xf32>
    %48 = vector.shape_cast %47 : vector<1x288x32xf32> to vector<288x32xf32>
    %49 = vector.shape_cast %46 : vector<288x32xf32> to vector<1x288x32xf32>
    tpu.vector_store %arg7[%c0_48, %c0_49, %c0_50], %49 {strides = array<i32>} : memref<1x288x32xf32, #tpu.memory_space<vmem>>, vector<1x288x32xf32>,
    %c26 = arith.constant 26 : index
    %c0_51 = arith.constant 0 : index
    %50 = vector.load %arg8[%c26, %c0_51] : memref<340x8xf32, #tpu.memory_space<vmem>>, vector<288x8xf32>
    %c32 = arith.constant 32 : index
    %c0_52 = arith.constant 0 : index
    %51 = vector.load %arg5[%c32, %c0_52] : memref<72x32xf32, #tpu.memory_space<vmem>>, vector<8x32xf32>
    %cst_53 = arith.constant dense<0.000000e+00> : vector<288x32xf32>
    %52 = tpu.matmul %50, %51, %cst_53 {dimension_numbers = #tpu.dot_dimension_numbers<[1], [0], [0], [1], [0, 0, 1, 1], [], []>} : vector<288x8xf32>, vector<8x32xf32>, vector<288x32xf32> -> vector<288x32xf32>
    %c0_54 = arith.constant 0 : index
    %c0_55 = arith.constant 0 : index
    %c0_56 = arith.constant 0 : index
    %53 = vector.load %arg7[%c0_54, %c0_55, %c0_56] : memref<1x288x32xf32, #tpu.memory_space<vmem>>, vector<1x288x32xf32>
    %54 = vector.shape_cast %53 : vector<1x288x32xf32> to vector<288x32xf32>
    %55 = arith.addf %54, %52 : vector<288x32xf32>
    %c0_57 = arith.constant 0 : index
    %c0_58 = arith.constant 0 : index
    %c0_59 = arith.constant 0 : index
    %56 = vector.load %arg7[%c0_57, %c0_58, %c0_59] : memref<1x288x32xf32, #tpu.memory_space<vmem>>, vector<1x288x32xf32>
    %57 = vector.shape_cast %56 : vector<1x288x32xf32> to vector<288x32xf32>
    %58 = vector.shape_cast %55 : vector<288x32xf32> to vector<1x288x32xf32>
    tpu.vector_store %arg7[%c0_57, %c0_58, %c0_59], %58 {strides = array<i32>} : memref<1x288x32xf32, #tpu.memory_space<vmem>>, vector<1x288x32xf32>,
    %c27 = arith.constant 27 : index
    %c0_60 = arith.constant 0 : index
    %59 = vector.load %arg8[%c27, %c0_60] : memref<340x8xf32, #tpu.memory_space<vmem>>, vector<288x8xf32>
    %c40 = arith.constant 40 : index
    %c0_61 = arith.constant 0 : index
    %60 = vector.load %arg5[%c40, %c0_61] : memref<72x32xf32, #tpu.memory_space<vmem>>, vector<8x32xf32>
    %cst_62 = arith.constant dense<0.000000e+00> : vector<288x32xf32>
    %61 = tpu.matmul %59, %60, %cst_62 {dimension_numbers = #tpu.dot_dimension_numbers<[1], [0], [0], [1], [0, 0, 1, 1], [], []>} : vector<288x8xf32>, vector<8x32xf32>, vector<288x32xf32> -> vector<288x32xf32>
    %c0_63 = arith.constant 0 : index
    %c0_64 = arith.constant 0 : index
    %c0_65 = arith.constant 0 : index
    %62 = vector.load %arg7[%c0_63, %c0_64, %c0_65] : memref<1x288x32xf32, #tpu.memory_space<vmem>>, vector<1x288x32xf32>
    %63 = vector.shape_cast %62 : vector<1x288x32xf32> to vector<288x32xf32>
    %64 = arith.addf %63, %61 : vector<288x32xf32>
    %c0_66 = arith.constant 0 : index
    %c0_67 = arith.constant 0 : index
    %c0_68 = arith.constant 0 : index
    %65 = vector.load %arg7[%c0_66, %c0_67, %c0_68] : memref<1x288x32xf32, #tpu.memory_space<vmem>>, vector<1x288x32xf32>
    %66 = vector.shape_cast %65 : vector<1x288x32xf32> to vector<288x32xf32>
    %67 = vector.shape_cast %64 : vector<288x32xf32> to vector<1x288x32xf32>
    tpu.vector_store %arg7[%c0_66, %c0_67, %c0_68], %67 {strides = array<i32>} : memref<1x288x32xf32, #tpu.memory_space<vmem>>, vector<1x288x32xf32>,
    %c43 = arith.constant 43 : index
    %c0_69 = arith.constant 0 : index
    %68 = vector.load %arg8[%c43, %c0_69] : memref<340x8xf32, #tpu.memory_space<vmem>>, vector<288x8xf32>
    %c48 = arith.constant 48 : index
    %c0_70 = arith.constant 0 : index
    %69 = vector.load %arg5[%c48, %c0_70] : memref<72x32xf32, #tpu.memory_space<vmem>>, vector<8x32xf32>
    %cst_71 = arith.constant dense<0.000000e+00> : vector<288x32xf32>
    %70 = tpu.matmul %68, %69, %cst_71 {dimension_numbers = #tpu.dot_dimension_numbers<[1], [0], [0], [1], [0, 0, 1, 1], [], []>} : vector<288x8xf32>, vector<8x32xf32>, vector<288x32xf32> -> vector<288x32xf32>
    %c0_72 = arith.constant 0 : index
    %c0_73 = arith.constant 0 : index
    %c0_74 = arith.constant 0 : index
    %71 = vector.load %arg7[%c0_72, %c0_73, %c0_74] : memref<1x288x32xf32, #tpu.memory_space<vmem>>, vector<1x288x32xf32>
    %72 = vector.shape_cast %71 : vector<1x288x32xf32> to vector<288x32xf32>
    %73 = arith.addf %72, %70 : vector<288x32xf32>
    %c0_75 = arith.constant 0 : index
    %c0_76 = arith.constant 0 : index
    %c0_77 = arith.constant 0 : index
    %74 = vector.load %arg7[%c0_75, %c0_76, %c0_77] : memref<1x288x32xf32, #tpu.memory_space<vmem>>, vector<1x288x32xf32>
    %75 = vector.shape_cast %74 : vector<1x288x32xf32> to vector<288x32xf32>
    %76 = vector.shape_cast %73 : vector<288x32xf32> to vector<1x288x32xf32>
    tpu.vector_store %arg7[%c0_75, %c0_76, %c0_77], %76 {strides = array<i32>} : memref<1x288x32xf32, #tpu.memory_space<vmem>>, vector<1x288x32xf32>,
    %c44 = arith.constant 44 : index
    %c0_78 = arith.constant 0 : index
    %77 = vector.load %arg8[%c44, %c0_78] : memref<340x8xf32, #tpu.memory_space<vmem>>, vector<288x8xf32>
    %c56 = arith.constant 56 : index
    %c0_79 = arith.constant 0 : index
    %78 = vector.load %arg5[%c56, %c0_79] : memref<72x32xf32, #tpu.memory_space<vmem>>, vector<8x32xf32>
    %cst_80 = arith.constant dense<0.000000e+00> : vector<288x32xf32>
    %79 = tpu.matmul %77, %78, %cst_80 {dimension_numbers = #tpu.dot_dimension_numbers<[1], [0], [0], [1], [0, 0, 1, 1], [], []>} : vector<288x8xf32>, vector<8x32xf32>, vector<288x32xf32> -> vector<288x32xf32>
    %c0_81 = arith.constant 0 : index
    %c0_82 = arith.constant 0 : index
    %c0_83 = arith.constant 0 : index
    %80 = vector.load %arg7[%c0_81, %c0_82, %c0_83] : memref<1x288x32xf32, #tpu.memory_space<vmem>>, vector<1x288x32xf32>
    %81 = vector.shape_cast %80 : vector<1x288x32xf32> to vector<288x32xf32>
    %82 = arith.addf %81, %79 : vector<288x32xf32>
    %c0_84 = arith.constant 0 : index
    %c0_85 = arith.constant 0 : index
    %c0_86 = arith.constant 0 : index
    %83 = vector.load %arg7[%c0_84, %c0_85, %c0_86] : memref<1x288x32xf32, #tpu.memory_space<vmem>>, vector<1x288x32xf32>
    %84 = vector.shape_cast %83 : vector<1x288x32xf32> to vector<288x32xf32>
    %85 = vector.shape_cast %82 : vector<288x32xf32> to vector<1x288x32xf32>
    tpu.vector_store %arg7[%c0_84, %c0_85, %c0_86], %85 {strides = array<i32>} : memref<1x288x32xf32, #tpu.memory_space<vmem>>, vector<1x288x32xf32>,
    %c45 = arith.constant 45 : index
    %c0_87 = arith.constant 0 : index
    %86 = vector.load %arg8[%c45, %c0_87] : memref<340x8xf32, #tpu.memory_space<vmem>>, vector<288x8xf32>
    %c64 = arith.constant 64 : index
    %c0_88 = arith.constant 0 : index
    %87 = vector.load %arg5[%c64, %c0_88] : memref<72x32xf32, #tpu.memory_space<vmem>>, vector<8x32xf32>
    %cst_89 = arith.constant dense<0.000000e+00> : vector<288x32xf32>
    %88 = tpu.matmul %86, %87, %cst_89 {dimension_numbers = #tpu.dot_dimension_numbers<[1], [0], [0], [1], [0, 0, 1, 1], [], []>} : vector<288x8xf32>, vector<8x32xf32>, vector<288x32xf32> -> vector<288x32xf32>
    %c0_90 = arith.constant 0 : index
    %c0_91 = arith.constant 0 : index
    %c0_92 = arith.constant 0 : index
    %89 = vector.load %arg7[%c0_90, %c0_91, %c0_92] : memref<1x288x32xf32, #tpu.memory_space<vmem>>, vector<1x288x32xf32>
    %90 = vector.shape_cast %89 : vector<1x288x32xf32> to vector<288x32xf32>
    %91 = arith.addf %90, %88 : vector<288x32xf32>
    %c0_93 = arith.constant 0 : index
    %c0_94 = arith.constant 0 : index
    %c0_95 = arith.constant 0 : index
    %92 = vector.load %arg7[%c0_93, %c0_94, %c0_95] : memref<1x288x32xf32, #tpu.memory_space<vmem>>, vector<1x288x32xf32>
    %93 = vector.shape_cast %92 : vector<1x288x32xf32> to vector<288x32xf32>
    %94 = vector.shape_cast %91 : vector<288x32xf32> to vector<1x288x32xf32>
    tpu.vector_store %arg7[%c0_93, %c0_94, %c0_95], %94 {strides = array<i32>} : memref<1x288x32xf32, #tpu.memory_space<vmem>>, vector<1x288x32xf32>,
    %c0_96 = arith.constant 0 : index
    %c0_97 = arith.constant 0 : index
    %c0_98 = arith.constant 0 : index
    %95 = vector.load %arg7[%c0_96, %c0_97, %c0_98] : memref<1x288x32xf32, #tpu.memory_space<vmem>>, vector<1x288x32xf32>
    %96 = vector.shape_cast %95 : vector<1x288x32xf32> to vector<288x32xf32>
    %c0_99 = arith.constant 0 : index
    %c0_100 = arith.constant 0 : index
    %97 = vector.load %arg6[%c0_99, %c0_100] : memref<1x32xf32, #tpu.memory_space<vmem>>, vector<1x32xf32>
    %98 = vector.broadcast %97 : vector<1x32xf32> to vector<288x32xf32>
    %99 = arith.addf %96, %98 : vector<288x32xf32>
    %cst_101 = arith.constant 0.000000e+00 : f32
    %100 = vector.broadcast %cst_101 : f32 to vector<288x32xf32>
    %101 = arith.maximumf %99, %100 : vector<288x32xf32>
    %c0_102 = arith.constant 0 : index
    %c0_103 = arith.constant 0 : index
    %c0_104 = arith.constant 0 : index
    %102 = vector.load %arg7[%c0_102, %c0_103, %c0_104] : memref<1x288x32xf32, #tpu.memory_space<vmem>>, vector<1x288x32xf32>
    %103 = vector.shape_cast %102 : vector<1x288x32xf32> to vector<288x32xf32>
    %104 = vector.shape_cast %101 : vector<288x32xf32> to vector<1x288x32xf32>
    tpu.vector_store %arg7[%c0_102, %c0_103, %c0_104], %104 {strides = array<i32>} : memref<1x288x32xf32, #tpu.memory_space<vmem>>, vector<1x288x32xf32>,
    return
  }
  func.func @transform_0(%arg0: i32) -> (i32, i32, i32) {
    %c0_i32 = arith.constant 0 : i32
    %c0_i32_0 = arith.constant 0 : i32
    %c0_i32_1 = arith.constant 0 : i32
    return %arg0, %c0_i32, %c0_i32_0 : i32, i32, i32
  }
  func.func @transform_1(%arg0: i32) -> (i32, i32) {
    %c0_i32 = arith.constant 0 : i32
    %c0_i32_0 = arith.constant 0 : i32
    %c0_i32_1 = arith.constant 0 : i32
    return %c0_i32, %c0_i32_0 : i32, i32
  }
  func.func @transform_2(%arg0: i32) -> (i32, i32) {
    %c0_i32 = arith.constant 0 : i32
    %c0_i32_0 = arith.constant 0 : i32
    %c0_i32_1 = arith.constant 0 : i32
    return %c0_i32, %c0_i32_0 : i32, i32
  }
  func.func @transform_3(%arg0: i32) -> (i32, i32) {
    %c0_i32 = arith.constant 0 : i32
    %c0_i32_0 = arith.constant 0 : i32
    %c0_i32_1 = arith.constant 0 : i32
    return %c0_i32, %c0_i32_0 : i32, i32
  }
  func.func @transform_4(%arg0: i32) -> (i32, i32) {
    %c0_i32 = arith.constant 0 : i32
    %c0_i32_0 = arith.constant 0 : i32
    %c0_i32_1 = arith.constant 0 : i32
    return %c0_i32, %c0_i32_0 : i32, i32
  }
  func.func @transform_5(%arg0: i32) -> (i32, i32) {
    %c0_i32 = arith.constant 0 : i32
    %c0_i32_0 = arith.constant 0 : i32
    %c0_i32_1 = arith.constant 0 : i32
    return %c0_i32, %c0_i32_0 : i32, i32
  }
  func.func @transform_6(%arg0: i32) -> (i32, i32, i32) {
    %c0_i32 = arith.constant 0 : i32
    %c0_i32_0 = arith.constant 0 : i32
    %c0_i32_1 = arith.constant 0 : i32
    return %arg0, %c0_i32, %c0_i32_0 : i32, i32, i32
  }
}

</mosaic_0001>

<bundles_post_ra>
// kernel: fire_forward.1
= control target key start
LH: loop header
LB: loop body
LE: loop exit
PB: predicated region body
PF: predicated region fallthrough
CT: control target
= control target key end

     0   :  { %s4911_s21 = smov 0   ;;  %s7300_s0 = inlined_call_operand.vmem [shape: f32[2,324,16], index: 0, kind: input, shape index: {}]   ;;  %s7301_s1 = inlined_call_operand.vmem [shape: f32[324,1], index: 1, kind: input, shape index: {}]   ;;  %s7302_s2 = inlined_call_operand.vmem [shape: f32[16,8], index: 2, kind: input, shape index: {}]   ;;  %s7303_s3 = inlined_call_operand.vmem [shape: f32[1,8], index: 3, kind: input, shape index: {}]   ;;  %s7304_s4 = inlined_call_operand.vmem [shape: f32[72,32], index: 4, kind: input, shape index: {}]   ;;  %s7305_s5 = inlined_call_operand.vmem [shape: f32[1,32], index: 5, kind: input, shape index: {}]   ;;  %s7306_s6 = inlined_call_operand.vmem [shape: f32[2,288,32], index: 6, kind: output, shape index: {}]  }
   0x1 LB: > { %s4470_s22 = sadd.s32 4294967295, %s4872_s21   ;;  %p4474_p0 = scmp.ge.s32.totalorder %s4872_s21, 1  ;;  %s4872_s21 = sphi %s4911_s21, %s16_s21  }
   0x2   : > { %p212_p1 = scmp.lt.s32.totalorder %s4872_s21, 3 }
   0x4   : > { %p213_p2 = pnand %p4474_p0, %p212_p1 }
   0x5   : > { %p242_p3 = scmp.lt.s32.totalorder (!%p213_p2), %s4470_s22, 1 }
   0x6   : > { %216 = sbr.rel (%p213_p2) target bundleno = 1205 (0x4b5), region = 44 }
   0xb   : > { %v294_v0 = vld [vmem:[%s7302_s2 + $0x8] sm:$0xff]  ;;  %v293_v1 = vld [vmem:[%s7302_s2] sm:$0xff]  ;;  %v4874_v3 = vmov 0   ;;  %v623_v4 = vld [vmem:[%s7301_s1 + $0x98] sm:$0xff]  ;;  %s7308_s22 = smov (!%p242_p3, %s4470_s22), 1  ;;  %vm299_vm0 = vcmask 130048  }
   0xc   : > { %v625_v2 = vld [vmem:[%s7301_s1 + $0xa8] sm:$0xff]  ;;  %437 = vmatpush.msra.mxu0 %v294_v0  ;;  %4860 = vset.pattern.permute.xlu1 %v4874_v3  ;;  %s4847_s7 = smul.u32 328, %s7308_s22  ;;  %v604_v6 = vld [vmem:[%s7301_s1] sm:$0xff]  ;;  %v618_v8 = vld [vmem:[%s7301_s1 + $0x70] sm:$0xff]  ;;  %vm891_vm1 = vcmask 64512   ;;  %v4875_v49 = vmov 0.0  }
   0xd   : > { %4859 = vset.pattern.permute.xlu0 %v4874_v3  ;;  %752 = vperm.xlu1 %4860, %v625_v2   ;;  %v624_v7 = vld [vmem:[%s7301_s1 + $0xa0] sm:$0xff]  ;;  %v619_v10 = vld [vmem:[%s7301_s1 + $0x78] sm:$0xff]  ;;  %v605_v11 = vld [vmem:[%s7301_s1 + $0x8] sm:$0xff]  ;;  %892 = vst.msk [vmem:[#allocation2] sm:$0xff] %vm891_vm1, %v4875_v49  ;;  %s4848_s11 = smul.u32 288, %s7308_s22  ;;  %vm1206_vm2 = vcmask 261120  }
   0xe   : > { %438 = vmatpush.msra.mxu0 %v293_v1  ;;  %742 = vperm.xlu0 %4859, %v623_v4   ;;  %s4937_s10 = scalar_lea.vmem %s7300_s0, %s4847_s7  ;;  %v626_v12 = vld [vmem:[%s7301_s1 + $0xb0] sm:$0xff]  ;;  %v620_v14 = vld [vmem:[%s7301_s1 + $0x80] sm:$0xff]  ;;  %v627_v16 = vld [vmem:[%s7301_s1 + $0xb8] sm:$0xff]  ;;  %935 = vst.msk [vmem:[#allocation2 + $0x14c] sm:$0xff] %vm891_vm1, %v4875_v49  ;;  %vm933_vm3 = vcmask 60416  }
   0xf   : > { %4861 = vset.pattern.permute.xlu2 %v4874_v3  ;;  %v252_v5 = vld [vmem:[%s4937_s10] sm:$0xff]  ;;  %v253_v9 = vld [vmem:[%s4937_s10 + $0x8] sm:$0xff]  ;;  %v254_v13 = vld [vmem:[%s4937_s10 + $0x10] sm:$0xff]  ;;  %s5236_s14 = scalar_lea.vmem %s7306_s6, %s4848_s11 }
  0x10   : > { %4477 = vmatmul.msk.f32.vlgmr.msra.gmra.mxu0 %vm299_vm0, %v252_v5  ;;  %717 = vperm.xlu2 %4861, %v618_v8   ;;  %v606_v15 = vld [vmem:[%s7301_s1 + $0x10] sm:$0xff]  ;;  %v255_v17 = vld [vmem:[%s4937_s10 + $0x18] sm:$0xff]  ;;  %v621_v18 = vld [vmem:[%s7301_s1 + $0x88] sm:$0xff] }
  0x11   : > { %v607_v19 = vld [vmem:[%s7301_s1 + $0x18] sm:$0xff]  ;;  %v628_v20 = vld [vmem:[%s7301_s1 + $0xc0] sm:$0xff]  ;;  %v622_v22 = vld [vmem:[%s7301_s1 + $0x90] sm:$0xff] }
  0x12   : > { %v256_v21 = vld [vmem:[%s4937_s10 + $0x20] sm:$0xff]  ;;  %v629_v24 = vld [vmem:[%s7301_s1 + $0xc8] sm:$0xff]  ;;  %v631_v26 = vld [vmem:[%s7301_s1 + $0xd8] sm:$0xff] }
  0x13   : > { %v608_v23 = vld [vmem:[%s7301_s1 + $0x20] sm:$0xff]  ;;  %v257_v25 = vld [vmem:[%s4937_s10 + $0x28] sm:$0xff]  ;;  %v630_v28 = vld [vmem:[%s7301_s1 + $0xd0] sm:$0xff] }
  0x14   : > { %v609_v27 = vld [vmem:[%s7301_s1 + $0x28] sm:$0xff]  ;;  %v258_v29 = vld [vmem:[%s4937_s10 + $0x30] sm:$0xff]  ;;  %v611_v30 = vld [vmem:[%s7301_s1 + $0x38] sm:$0xff] }
  0x15   : > { %647 = vperm.xlu1 %4860, %v604_v6   ;;  %v632_v31 = vld [vmem:[%s7301_s1 + $0xe0] sm:$0xff]  ;;  %v610_v32 = vld [vmem:[%s7301_s1 + $0x30] sm:$0xff]  ;;  %v259_v33 = vld [vmem:[%s4937_s10 + $0x38] sm:$0xff] }
  0x16   : > { %747 = vperm.xlu0 %4859, %v624_v7   ;;  %v634_v34 = vld [vmem:[%s7301_s1 + $0xf0] sm:$0xff]  ;;  %v612_v35 = vld [vmem:[%s7301_s1 + $0x40] sm:$0xff]  ;;  %v635_v38 = vld [vmem:[%s7301_s1 + $0xf8] sm:$0xff] }
  0x17   : > { %v260_v36 = vld [vmem:[%s4937_s10 + $0x40] sm:$0xff]  ;;  %v614_v37 = vld [vmem:[%s7301_s1 + $0x50] sm:$0xff]  ;;  %v633_v39 = vld [vmem:[%s7301_s1 + $0xe8] sm:$0xff] }
  0x18   : > { %4478 = vmatmul.msk.f32.gmra.mxu0 %vm299_vm0, %v253_v9  ;;  %757 = vperm.xlu2 %4861, %v626_v12   ;;  %v261_v40 = vld [vmem:[%s4937_s10 + $0x48] sm:$0xff]  ;;  %v615_v41 = vld [vmem:[%s7301_s1 + $0x58] sm:$0xff]  ;;  %v262_v44 = vld [vmem:[%s4937_s10 + $0x50] sm:$0xff] }
  0x19   : > { %v613_v42 = vld [vmem:[%s7301_s1 + $0x48] sm:$0xff]  ;;  %v263_v46 = vld [vmem:[%s4937_s10 + $0x58] sm:$0xff]  ;;  %v264_v47 = vld [vmem:[%s4937_s10 + $0x60] sm:$0xff] }
  0x1a   : > { %v637_v43 = vld [vmem:[%s7301_s1 + $0x108] sm:$0xff]  ;;  %v636_v48 = vld [vmem:[%s7301_s1 + $0x100] sm:$0xff]  ;;  %v266_v53 = vld [vmem:[%s4937_s10 + $0x70] sm:$0xff] }
  0x1b   : > { %v617_v45 = vld [vmem:[%s7301_s1 + $0x68] sm:$0xff]  ;;  %v616_v51 = vld [vmem:[%s7301_s1 + $0x60] sm:$0xff]  ;;  %v267_v57 = vld [vmem:[%s4937_s10 + $0x78] sm:$0xff] }
  0x1c   : > { %v265_v50 = vld [vmem:[%s4937_s10 + $0x68] sm:$0xff]  ;;  %v972_v52 = vld [vmem:[%s7304_s4] sm:$0xff]  ;;  %v638_v59 = vld [vmem:[%s7301_s1 + $0x110] sm:$0xff] }
  0x1d   : > { %722 = vperm.xlu1 %4860, %v619_v10   ;;  %1096 = vmatpush.msra.mxu1 %v972_v52  ;;  %v5086_v60 = vld [vmem:[%s7303_s3] ss:$0 sm:$0xff]  ;;  %v269_v7 = vld [vmem:[%s4937_s10 + $0x88] sm:$0xff]  ;;  %v643_v10 = vld [vmem:[%s7301_s1 + $0x138] sm:$0xff] }
  0x1e   : > { %652 = vperm.xlu0 %4859, %v605_v11   ;;  %4844 = vmatpush.msra.mxu3 %v972_v52  ;;  %v268_v63 = vld [vmem:[%s4937_s10 + $0x80] sm:$0xff] }
  0x1f   : > { %v640_v2 = vld [vmem:[%s7301_s1 + $0x120] sm:$0xff] }
  0x20   : > { %4479 = vmatmul.msk.f32.gmra.mxu0 %vm299_vm0, %v254_v13  ;;  %762 = vperm.xlu2 %4861, %v627_v16   ;;  %v641_v13 = vld [vmem:[%s7301_s1 + $0x128] sm:$0xff] }
  0x25   : > { %727 = vperm.xlu1 %4860, %v620_v14  }
  0x26   : > { %657 = vperm.xlu0 %4859, %v606_v15  }
  0x28   : > { %4480 = vmatmul.msk.f32.gmra.mxu0 %vm299_vm0, %v255_v17  ;;  %767 = vperm.xlu2 %4861, %v628_v20  }
  0x2d   : > { %732 = vperm.xlu1 %4860, %v621_v18   ;;  %v270_v18 = vld [vmem:[%s4937_s10 + $0x90] sm:$0xff] }
  0x2e   : > { %662 = vperm.xlu0 %4859, %v607_v19  }
  0x30   : > { %4481 = vmatmul.msk.f32.gmra.mxu0 %vm299_vm0, %v256_v21  ;;  %772 = vperm.xlu2 %4861, %v629_v24  }
  0x35   : > { %737 = vperm.xlu1 %4860, %v622_v22   ;;  %v644_v22 = vld [vmem:[%s7301_s1 + $0x140] sm:$0xf] }
  0x36   : > { %667 = vperm.xlu0 %4859, %v608_v23  }
  0x38   : > { %4482 = vmatmul.msk.f32.gmra.mxu0 %vm299_vm0, %v257_v25  ;;  %777 = vperm.xlu2 %4861, %v630_v28   ;;  %v271_v28 = vld [vmem:[%s4937_s10 + $0x98] sm:$0xff] }
  0x3d   : > { %782 = vperm.xlu1 %4860, %v631_v26  }
  0x3e   : > { %672 = vperm.xlu0 %4859, %v609_v27  }
  0x40   : > { %4483 = vmatmul.msk.f32.gmra.mxu0 %vm299_vm0, %v258_v29  ;;  %677 = vperm.xlu2 %4861, %v610_v32  }
  0x45   : > { %682 = vperm.xlu1 %4860, %v611_v30  }
  0x46   : > { %787 = vperm.xlu0 %4859, %v632_v31  }
  0x48   : > { %4484 = vmatmul.msk.f32.gmra.mxu0 %vm299_vm0, %v259_v33  ;;  %792 = vperm.xlu2 %4861, %v633_v39  }
  0x4d   : > { %797 = vperm.xlu1 %4860, %v634_v34  }
  0x4e   : > { %687 = vperm.xlu0 %4859, %v612_v35  }
  0x50   : > { %4485 = vmatmul.msk.f32.gmra.mxu0 %vm299_vm0, %v260_v36  ;;  %692 = vperm.xlu2 %4861, %v613_v42   ;;  %v272_v36 = vld [vmem:[%s4937_s10 + $0xa0] sm:$0xff] }
  0x55   : > { %697 = vperm.xlu1 %4860, %v614_v37  }
  0x56   : > { %802 = vperm.xlu0 %4859, %v635_v38  }
  0x58   : > { %4486 = vmatmul.msk.f32.gmra.mxu0 %vm299_vm0, %v261_v40  ;;  %807 = vperm.xlu2 %4861, %v636_v48  }
  0x5d   : > { %812 = vperm.xlu1 %4860, %v637_v43  }
  0x5e   : > { %702 = vperm.xlu0 %4859, %v615_v41  }
  0x60   : > { %4487 = vmatmul.msk.f32.gmra.mxu0 %vm299_vm0, %v262_v44  ;;  %707 = vperm.xlu2 %4861, %v616_v51   ;;  %v273_v44 = vld [vmem:[%s4937_s10 + $0xa8] sm:$0xff] }
  0x65   : > { %712 = vperm.xlu1 %4860, %v617_v45  }
  0x66   : > { %817 = vperm.xlu0 %4859, %v638_v59  }
  0x68   : > { %4488 = vmatmul.msk.f32.gmra.mxu0 %vm299_vm0, %v263_v46 }
  0x6a   : > { %v5072_v55 = vpop.permute.xlu2 %717 }
  0x6d   : > { %832 = vperm.xlu1 %4860, %v641_v13  }
  0x6e   : > { %827 = vperm.xlu0 %4859, %v640_v2  }
  0x70   : > { %4489 = vmatmul.msk.f32.gmra.mxu0 %vm299_vm0, %v264_v47  ;;  %v639_v47 = vld [vmem:[%s7301_s1 + $0x118] sm:$0xff] }
  0x71   : > { %822 = vperm.xlu2 %4861, %v639_v47  }
  0x72   : > { %v5088_v61 = vpop.permute.xlu2 %757 }
  0x75   : > { %847 = vperm.xlu1 %4860, %v644_v22  }
  0x76   : > { %842 = vperm.xlu0 %4859, %v643_v10  }
  0x78   : > { %4490 = vmatmul.msk.f32.gmra.mxu0 %vm299_vm0, %v265_v50 }
  0x7a   : > { %v5104_v11 = vpop.permute.xlu2 %762 }
  0x7f   : > { %v5074_v56 = vpop.permute.xlu1 %752 }
  0x80   : > { %v5069_v54 = vpop.permute.xlu0 %742  ;;  %4491 = vmatmul.msk.f32.gmra.mxu0 %vm299_vm0, %v266_v53  ;;  %v274_v53 = vld [vmem:[%s4937_s10 + $0xb0] sm:$0xff] }
  0x82   : > { %v5120_v23 = vpop.permute.xlu2 %767 }
  0x87   : > { %v648_v0 = vpop.permute.xlu1 %647 }
  0x88   : > { %v5077_v58 = vpop.permute.xlu0 %747  ;;  %4492 = vmatmul.msk.f32.gmra.mxu0 %vm299_vm0, %v267_v57 }
  0x8a   : > { %v5129_v34 = vpop.permute.xlu2 %772 }
  0x8d   : > { %v440_v62 = vpop.f32.mrf.mxu0 }
  0x8e   : > { %v441_v1 = vadd.f32 %v5086_v60, %v440_v62  ;;  %v642_v62 = vld [vmem:[%s7301_s1 + $0x130] sm:$0xff] }
  0x8f   : > { %v5098_v8 = vpop.permute.xlu1 %722  ;;  %837 = vperm.xlu2 %4861, %v642_v62  }
  0x90   : > { %v653_v3 = vpop.permute.xlu0 %652  ;;  %v563_v4 = vmax.f32 %v441_v1, 0.0  ;;  %4493 = vmatmul.msk.f32.gmra.mxu0 %vm299_vm0, %v268_v63 }
  0x92   : > { %v850_v5 = vmul.f32 %v648_v0, %v563_v4  ;;  %v5141_v45 = vpop.permute.xlu2 %777  ;;  %v275_v4 = vld [vmem:[%s4937_s10 + $0xb8] sm:$0xff] }
  0x94   : > { %893 = vst.msk [vmem:[#allocation2 + $0x8] sm:$0xff] %vm891_vm1, %v850_v5 }
  0x95   : > { %v443_v6 = vpop.f32.mrf.mxu0 }
  0x96   : > { %v444_v9 = vadd.f32 %v5086_v60, %v443_v6 }
  0x97   : > { %v5114_v20 = vpop.permute.xlu1 %727 }
  0x98   : > { %v564_v12 = vmax.f32 %v444_v9, 0.0  ;;  %4494 = vmatmul.msk.f32.gmra.mxu0 %vm299_vm0, %v269_v7  ;;  %v658_v14 = vpop.permute.xlu0 %657 }
  0x9a   : > { %v851_v15 = vmul.f32 %v653_v3, %v564_v12  ;;  %v678_v63 = vpop.permute.xlu2 %677 }
  0x9b   : > { %v936_v16 = vld [vmem:[#allocation2 + $0x7] sm:$0xff] }
  0x9c   : > { %894 = vst.msk [vmem:[#allocation2 + $0x10] sm:$0xff] %vm891_vm1, %v851_v15  ;;  %4518 = vmatmul.msk.f32.vlgmr.msra.gmra.mxu1 %vm891_vm1, %v936_v16 }
  0x9d   : > { %v446_v17 = vpop.f32.mrf.mxu0 }
  0x9e   : > { %v447_v19 = vadd.f32 %v5086_v60, %v446_v17 }
  0x9f   : > { %v5127_v31 = vpop.permute.xlu1 %732 }
  0xa0   : > { %v565_v21 = vmax.f32 %v447_v19, 0.0  ;;  %4495 = vmatmul.msk.f32.gmra.mxu0 %vm299_vm0, %v270_v18  ;;  %v663_v26 = vpop.permute.xlu0 %662 }
  0xa2   : > { %v852_v24 = vmul.f32 %v658_v14, %v565_v21  ;;  %v276_v14 = vld [vmem:[%s4937_s10 + $0xc0] sm:$0xff]  ;;  %v5168_v15 = vpop.permute.xlu2 %792 }
  0xa3   : > { %v937_v25 = vld [vmem:[#allocation2 + $0xf] sm:$0xff] }
  0xa4   : > { %895 = vst.msk [vmem:[#allocation2 + $0x18] sm:$0xff] %vm891_vm1, %v852_v24  ;;  %4519 = vmatmul.msk.f32.gmra.mxu1 %vm891_vm1, %v937_v25  ;;  %v277_v24 = vld [vmem:[%s4937_s10 + $0xc8] sm:$0xff] }
  0xa5   : > { %v449_v27 = vpop.f32.mrf.mxu0 }
  0xa6   : > { %v450_v29 = vadd.f32 %v5086_v60, %v449_v27 }
  0xa7   : > { %v5136_v42 = vpop.permute.xlu1 %737 }
  0xa8   : > { %v566_v30 = vmax.f32 %v450_v29, 0.0  ;;  %4496 = vmatmul.msk.f32.gmra.mxu0 %vm299_vm0, %v271_v28  ;;  %v668_v37 = vpop.permute.xlu0 %667 }
  0xaa   : > { %v853_v32 = vmul.f32 %v663_v26, %v566_v30  ;;  %v693_v27 = vpop.permute.xlu2 %692 }
  0xab   : > { %v938_v33 = vld [vmem:[#allocation2 + $0x17] sm:$0xff] }
  0xac   : > { %896 = vst.msk [vmem:[#allocation2 + $0x20] sm:$0xff] %vm891_vm1, %v853_v32  ;;  %4520 = vmatmul.msk.f32.gmra.mxu1 %vm891_vm1, %v938_v33  ;;  %v278_v33 = vld [vmem:[%s4937_s10 + $0xd0] sm:$0xff] }
  0xad   : > { %v452_v35 = vpop.f32.mrf.mxu0 }
  0xae   : > { %v453_v38 = vadd.f32 %v5086_v60, %v452_v35 }
  0xaf   : > { %v5151_v57 = vpop.permute.xlu1 %782 }
  0xb0   : > { %v567_v39 = vmax.f32 %v453_v38, 0.0  ;;  %4497 = vmatmul.msk.f32.gmra.mxu0 %vm299_vm0, %v272_v36  ;;  %v673_v48 = vpop.permute.xlu0 %672 }
  0xb2   : > { %v854_v40 = vmul.f32 %v668_v37, %v567_v39 }
  0xb3   : > { %v939_v41 = vld [vmem:[#allocation2 + $0x1f] sm:$0xff] }
  0xb4   : > { %897 = vst.msk [vmem:[#allocation2 + $0x28] sm:$0xff] %vm891_vm1, %v854_v40  ;;  %4521 = vmatmul.msk.f32.gmra.mxu1 %vm891_vm1, %v939_v41 }
  0xb5   : > { %v455_v43 = vpop.f32.mrf.mxu0 }
  0xb6   : > { %v456_v46 = vadd.f32 %v5086_v60, %v455_v43  ;;  %v279_v43 = vld [vmem:[%s4937_s10 + $0xd8] sm:$0xff] }
  0xb7   : > { %v683_v7 = vpop.permute.xlu1 %682 }
  0xb8   : > { %v568_v49 = vmax.f32 %v456_v46, 0.0  ;;  %4498 = vmatmul.msk.f32.gmra.mxu0 %vm299_vm0, %v273_v44  ;;  %v5161_v5 = vpop.permute.xlu0 %787  ;;  %v5189_v44 = vpop.permute.xlu2 %807 }
  0xba   : > { %v855_v50 = vmul.f32 %v673_v48, %v568_v49 }
  0xbb   : > { %v940_v51 = vld [vmem:[#allocation2 + $0x27] sm:$0xff] }
  0xbc   : > { %898 = vst.msk [vmem:[#allocation2 + $0x30] sm:$0xff] %vm891_vm1, %v855_v50  ;;  %4522 = vmatmul.msk.f32.gmra.mxu1 %vm891_vm1, %v940_v51  ;;  %v1279_v50 = vld [vmem:[%s7304_s4 + $0x8] sm:$0xff] }
  0xbd   : > { %v458_v52 = vpop.f32.mrf.mxu0  ;;  %4845 = vmatpush.msra.mxu2 %v1279_v50  ;;  %4846 = vmatpush.msrb.mxu3 %v1279_v50 }
  0xbe   : > { %v459_v59 = vadd.f32 %v5086_v60, %v458_v52  ;;  %1403 = vmatpush.msrb.mxu0 %v1279_v50  ;;  %v286_v50 = vld [vmem:[%s4937_s10 + $0x110] sm:$0xff] }
  0xbf   : > { %v5175_v25 = vpop.permute.xlu1 %797 }
  0xc0   : > { %v569_v0 = vmax.f32 %v459_v59, 0.0  ;;  %4499 = vmatmul.msk.f32.gmra.mxu0 %vm299_vm0, %v274_v53  ;;  %v688_v17 = vpop.permute.xlu0 %687  ;;  %v280_v53 = vld [vmem:[%s4937_s10 + $0xe0] sm:$0xff] }
  0xc2   : > { %v856_v1 = vmul.f32 %v678_v63, %v569_v0  ;;  %v708_v63 = vpop.permute.xlu2 %707 }
  0xc3   : > { %v941_v2 = vld [vmem:[#allocation2 + $0x2f] sm:$0xff] }
  0xc4   : > { %899 = vst.msk [vmem:[#allocation2 + $0x38] sm:$0xff] %vm891_vm1, %v856_v1  ;;  %4523 = vmatmul.msk.f32.gmra.mxu1 %vm891_vm1, %v941_v2 }
  0xc5   : > { %v461_v3 = vpop.f32.mrf.mxu0 }
  0xc6   : > { %v462_v6 = vadd.f32 %v5086_v60, %v461_v3 }
  0xc7   : > { %v698_v37 = vpop.permute.xlu1 %697 }
  0xc8   : > { %v570_v9 = vmax.f32 %v462_v6, 0.0  ;;  %4500 = vmatmul.msk.f32.gmra.mxu0 %vm299_vm0, %v275_v4  ;;  %v5182_v35 = vpop.permute.xlu0 %802  ;;  %v281_v4 = vld [vmem:[%s4937_s10 + $0xe8] sm:$0xff] }
  0xca   : > { %v857_v10 = vmul.f32 %v683_v7, %v570_v9 }
  0xcb   : > { %v942_v12 = vld [vmem:[#allocation2 + $0x37] sm:$0xff] }
  0xcc   : > { %900 = vst.msk [vmem:[#allocation2 + $0x40] sm:$0xff] %vm891_vm1, %v857_v10  ;;  %4524 = vmatmul.msk.f32.gmra.mxu1 %vm891_vm1, %v942_v12 }
  0xcd   : > { %v464_v13 = vpop.f32.mrf.mxu0 }
  0xce   : > { %v465_v16 = vadd.f32 %v5086_v60, %v464_v13 }
  0xcf   : > { %v5199_v59 = vpop.permute.xlu1 %812 }
  0xd0   : > { %v571_v18 = vmax.f32 %v465_v16, 0.0  ;;  %4501 = vmatmul.msk.f32.gmra.mxu0 %vm299_vm0, %v276_v14  ;;  %v703_v47 = vpop.permute.xlu0 %702  ;;  %v282_v14 = vld [vmem:[%s4937_s10 + $0xf0] sm:$0xff] }
  0xd2   : > { %v858_v19 = vmul.f32 %v688_v17, %v571_v18 }
  0xd3   : > { %v943_v21 = vld [vmem:[#allocation2 + $0x3f] sm:$0xff] }
  0xd4   : > { %901 = vst.msk [vmem:[#allocation2 + $0x48] sm:$0xff] %vm891_vm1, %v858_v19  ;;  %4525 = vmatmul.msk.f32.gmra.mxu1 %vm891_vm1, %v943_v21 }
  0xd5   : > { %v467_v22 = vpop.f32.mrf.mxu0 }
  0xd6   : > { %v468_v26 = vadd.f32 %v5086_v60, %v467_v22  ;;  %v283_v22 = vld [vmem:[%s4937_s10 + $0xf8] sm:$0xff] }
  0xd7   : > { %v713_v7 = vpop.permute.xlu1 %712 }
  0xd8   : > { %v572_v28 = vmax.f32 %v468_v26, 0.0  ;;  %4502 = vmatmul.msk.f32.gmra.mxu0 %vm299_vm0, %v277_v24 }
  0xda   : > { %v859_v29 = vmul.f32 %v693_v27, %v572_v28 }
  0xdb   : > { %v944_v30 = vld [vmem:[#allocation2 + $0x47] sm:$0xff] }
  0xdc   : > { %902 = vst.msk [vmem:[#allocation2 + $0x50] sm:$0xff] %vm891_vm1, %v859_v29  ;;  %4526 = vmatmul.msk.f32.gmra.mxu1 %vm891_vm1, %v944_v30  ;;  %v284_v30 = vld [vmem:[%s4937_s10 + $0x100] sm:$0xff] }
  0xdd   : > { %v470_v32 = vpop.f32.mrf.mxu0 }
  0xde   : > { %v471_v36 = vadd.f32 %v5086_v60, %v470_v32 }
  0xe0   : > { %v573_v38 = vmax.f32 %v471_v36, 0.0  ;;  %4503 = vmatmul.msk.f32.gmra.mxu0 %vm299_vm0, %v278_v33 }
  0xe2   : > { %v860_v39 = vmul.f32 %v698_v37, %v573_v38 }
  0xe3   : > { %v945_v40 = vld [vmem:[#allocation2 + $0x4f] sm:$0xff] }
  0xe4   : > { %903 = vst.msk [vmem:[#allocation2 + $0x58] sm:$0xff] %vm891_vm1, %v860_v39  ;;  %4527 = vmatmul.msk.f32.gmra.mxu1 %vm891_vm1, %v945_v40  ;;  %v285_v39 = vld [vmem:[%s4937_s10 + $0x108] sm:$0xff] }
  0xe5   : > { %v473_v41 = vpop.f32.mrf.mxu0 }
  0xe6   : > { %v474_v46 = vadd.f32 %v5086_v60, %v473_v41 }
  0xe8   : > { %v574_v48 = vmax.f32 %v474_v46, 0.0  ;;  %4504 = vmatmul.msk.f32.gmra.mxu0 %vm299_vm0, %v279_v43  ;;  %v2035_v46 = vld [vmem:[%s7304_s4 + $0x18] sm:$0xff] }
  0xe9   : > { %2159 = vmatpush.msrb.mxu1 %v2035_v46 }
  0xea   : > { %v861_v49 = vmul.f32 %v703_v47, %v574_v48 }
  0xeb   : > { %v946_v51 = vld [vmem:[#allocation2 + $0x57] sm:$0xff] }
  0xec   : > { %904 = vst.msk [vmem:[#allocation2 + $0x60] sm:$0xff] %vm891_vm1, %v861_v49  ;;  %4528 = vmatmul.msk.f32.gmra.mxu1 %vm891_vm1, %v946_v51 }
  0xed   : > { %v476_v52 = vpop.f32.mrf.mxu0 }
  0xee   : > { %v477_v62 = vadd.f32 %v5086_v60, %v476_v52 }
  0xf0   : > { %v575_v0 = vmax.f32 %v477_v62, 0.0  ;;  %4505 = vmatmul.msk.f32.gmra.mxu0 %vm299_vm0, %v280_v53 }
  0xf2   : > { %v862_v1 = vmul.f32 %v708_v63, %v575_v0 }
  0xf3   : > { %v947_v2 = vld [vmem:[#allocation2 + $0x5f] sm:$0xff] }
  0xf4   : > { %905 = vst.msk [vmem:[#allocation2 + $0x68] sm:$0xff] %vm891_vm1, %v862_v1  ;;  %4529 = vmatmul.msk.f32.gmra.mxu1 %vm891_vm1, %v947_v2  ;;  %v287_v1 = vld [vmem:[%s4937_s10 + $0x118] sm:$0xff] }
  0xf5   : > { %v479_v3 = vpop.f32.mrf.mxu0 }
  0xf6   : > { %v480_v6 = vadd.f32 %v5086_v60, %v479_v3 }
  0xf8   : > { %v576_v9 = vmax.f32 %v480_v6, 0.0  ;;  %4506 = vmatmul.msk.f32.gmra.mxu0 %vm299_vm0, %v281_v4 }
  0xfa   : > { %v863_v10 = vmul.f32 %v713_v7, %v576_v9  ;;  %v2413_v9 = vld [vmem:[%s7304_s4 + $0x20] sm:$0xff] }
  0xfb   : > { %v948_v12 = vld [vmem:[#allocation2 + $0x67] sm:$0xff]  ;;  %2537 = vmatpush.msrb.mxu2 %v2413_v9 }
  0xfc   : > { %906 = vst.msk [vmem:[#allocation2 + $0x70] sm:$0xff] %vm891_vm1, %v863_v10  ;;  %4530 = vmatmul.msk.f32.gmra.mxu1 %vm891_vm1, %v948_v12  ;;  %v288_v12 = vld [vmem:[%s4937_s10 + $0x120] sm:$0xff] }
  0xfd   : > { %v482_v13 = vpop.f32.mrf.mxu0 }
  0xfe   : > { %v483_v16 = vadd.f32 %v5086_v60, %v482_v13 }
 0x100   : > { %v577_v17 = vmax.f32 %v483_v16, 0.0  ;;  %4507 = vmatmul.msk.f32.gmra.mxu0 %vm299_vm0, %v282_v14 }
 0x102   : > { %v864_v18 = vmul.f32 %v5072_v55, %v577_v17 }
 0x103   : > { %v949_v19 = vld [vmem:[#allocation2 + $0x6f] sm:$0xff] }
 0x104   : > { %907 = vst.msk [vmem:[#allocation2 + $0x78] sm:$0xff] %vm891_vm1, %v864_v18  ;;  %4531 = vmatmul.msk.f32.gmra.mxu1 %vm891_vm1, %v949_v19 }
 0x105   : > { %v485_v21 = vpop.f32.mrf.mxu0 }
 0x106   : > { %v486_v24 = vadd.f32 %v5086_v60, %v485_v21  ;;  %v289_v21 = vld [vmem:[%s4937_s10 + $0x128] sm:$0xff] }
 0x108   : > { %v578_v26 = vmax.f32 %v486_v24, 0.0  ;;  %4508 = vmatmul.msk.f32.gmra.mxu0 %vm299_vm0, %v283_v22 }
 0x10a   : > { %v865_v27 = vmul.f32 %v5098_v8, %v578_v26 }
 0x10b   : > { %v950_v28 = vld [vmem:[#allocation2 + $0x77] sm:$0xff] }
 0x10c   : > { %v1257_v29 = vld [vmem:[#allocation2 + $0x78] sm:$0xff]  ;;  %908 = vst.msk [vmem:[#allocation2 + $0x80] sm:$0xff] %vm891_vm1, %v865_v27  ;;  %4532 = vmatmul.msk.f32.gmra.mxu1 %vm891_vm1, %v950_v28 }
 0x10d   : > { %4568 = vmatmul.msk.f32.vlgmr.msra.gmra.mxu2 %vm891_vm1, %v1257_v29  ;;  %v488_v55 = vpop.f32.mrf.mxu0  ;;  %v5287_v29 = vld [vmem:[#allocation2 + $0x19] sm:$0xff] }
 0x10e   : > { %v489_v32 = vadd.f32 %v5086_v60, %v488_v55 }
 0x110   : > { %v579_v33 = vmax.f32 %v489_v32, 0.0  ;;  %4509 = vmatmul.msk.f32.gmra.mxu0 %vm299_vm0, %v284_v30  ;;  %v290_v30 = vld [vmem:[%s4937_s10 + $0x130] sm:$0xff] }
 0x112   : > { %v866_v36 = vmul.f32 %v5114_v20, %v579_v33 }
 0x113   : > { %v951_v8 = vld [vmem:[#allocation2 + $0x7f] sm:$0xff] }
 0x114   : > { %v1258_v37 = vld [vmem:[#allocation2 + $0x80] sm:$0xff]  ;;  %909 = vst.msk [vmem:[#allocation2 + $0x88] sm:$0xff] %vm891_vm1, %v866_v36  ;;  %4533 = vmatmul.msk.f32.gmra.mxu1 %vm891_vm1, %v951_v8 }
 0x115   : > { %4569 = vmatmul.msk.f32.gmra.mxu2 %vm891_vm1, %v1258_v37  ;;  %v491_v38 = vpop.f32.mrf.mxu0 }
 0x116   : > { %v492_v40 = vadd.f32 %v5086_v60, %v491_v38  ;;  %v5300_v38 = vld [vmem:[#allocation2 + $0x21] sm:$0xff] }
 0x118   : > { %v580_v20 = vmax.f32 %v492_v40, 0.0  ;;  %4510 = vmatmul.msk.f32.gmra.mxu0 %vm299_vm0, %v285_v39  ;;  %v291_v40 = vld [vmem:[%s4937_s10 + $0x138] sm:$0xff] }
 0x119   : > { %v1098_v41 = vpop.f32.mrf.mxu1 }
 0x11a   : > { %v867_v43 = vmul.f32 %v5127_v31, %v580_v20  ;;  %1207 = vst.msk [vmem:[%s5236_s14] sm:$0xff] %vm1206_vm2, %v1098_v41 }
 0x11b   : > { %v952_v47 = vld [vmem:[#allocation2 + $0x87] sm:$0xff] }
 0x11c   : > { %v1259_v48 = vld [vmem:[#allocation2 + $0x88] sm:$0xff]  ;;  %910 = vst.msk [vmem:[#allocation2 + $0x90] sm:$0xff] %vm891_vm1, %v867_v43  ;;  %4534 = vmatmul.msk.f32.gmra.mxu1 %vm891_vm1, %v952_v47 }
 0x11d   : > { %4570 = vmatmul.msk.f32.gmra.mxu2 %vm891_vm1, %v1259_v48  ;;  %v494_v49 = vpop.f32.mrf.mxu0  ;;  %v5313_v48 = vld [vmem:[#allocation2 + $0x29] sm:$0xff] }
 0x11e   : > { %v495_v31 = vadd.f32 %v5086_v60, %v494_v49 }
 0x120   : > { %v581_v51 = vmax.f32 %v495_v31, 0.0  ;;  %4511 = vmatmul.msk.f32.gmra.mxu0 %vm299_vm0, %v286_v50  ;;  %v292_v50 = vld [vmem:[%s4937_s10 + $0x140] sm:$0xf] }
 0x121   : > { %v1101_v52 = vpop.f32.mrf.mxu1 }
 0x122   : > { %v868_v53 = vmul.f32 %v5136_v42, %v581_v51  ;;  %1208 = vst.msk [vmem:[%s5236_s14 + $0x8] sm:$0xff] %vm1206_vm2, %v1101_v52 }
 0x123   : > { %v953_v62 = vld [vmem:[#allocation2 + $0x8f] sm:$0xff] }
 0x124   : > { %v1260_v63 = vld [vmem:[#allocation2 + $0x90] sm:$0xff]  ;;  %911 = vst.msk [vmem:[#allocation2 + $0x98] sm:$0xff] %vm891_vm1, %v868_v53  ;;  %4535 = vmatmul.msk.f32.gmra.mxu1 %vm891_vm1, %v953_v62 }
 0x125   : > { %4571 = vmatmul.msk.f32.gmra.mxu2 %vm891_vm1, %v1260_v63  ;;  %v497_v0 = vpop.f32.mrf.mxu0  ;;  %v5326_v63 = vld [vmem:[#allocation2 + $0x31] sm:$0xff] }
 0x126   : > { %v498_v2 = vadd.f32 %v5086_v60, %v497_v0 }
 0x128   : > { %v582_v3 = vmax.f32 %v498_v2, 0.0  ;;  %4512 = vmatmul.msk.f32.gmra.mxu0 %vm299_vm0, %v287_v1 }
 0x129   : > { %v1104_v4 = vpop.f32.mrf.mxu1 }
 0x12a   : > { %v869_v42 = vmul.f32 %v5069_v54, %v582_v3  ;;  %1209 = vst.msk [vmem:[%s5236_s14 + $0x10] sm:$0xff] %vm1206_vm2, %v1104_v4 }
 0x12b   : > { %v954_v6 = vld [vmem:[#allocation2 + $0x97] sm:$0xff] }
 0x12c   : > { %v1261_v7 = vld [vmem:[#allocation2 + $0x98] sm:$0xff]  ;;  %912 = vst.msk [vmem:[#allocation2 + $0xa0] sm:$0xff] %vm891_vm1, %v869_v42  ;;  %4536 = vmatmul.msk.f32.gmra.mxu1 %vm891_vm1, %v954_v6 }
 0x12d   : > { %4572 = vmatmul.msk.f32.gmra.mxu2 %vm891_vm1, %v1261_v7  ;;  %v500_v10 = vpop.f32.mrf.mxu0  ;;  %v5338_v7 = vld [vmem:[#allocation2 + $0x39] sm:$0xff] }
 0x12e   : > { %v501_v54 = vadd.f32 %v5086_v60, %v500_v10 }
 0x130   : > { %v583_v13 = vmax.f32 %v501_v54, 0.0  ;;  %4513 = vmatmul.msk.f32.gmra.mxu0 %vm299_vm0, %v288_v12 }
 0x131   : > { %v1107_v14 = vpop.f32.mrf.mxu1 }
 0x132   : > { %v870_v16 = vmul.f32 %v5077_v58, %v583_v13  ;;  %1210 = vst.msk [vmem:[%s5236_s14 + $0x18] sm:$0xff] %vm1206_vm2, %v1107_v14 }
 0x133   : > { %v955_v17 = vld [vmem:[#allocation2 + $0x9f] sm:$0xff] }
 0x134   : > { %v1262_v18 = vld [vmem:[#allocation2 + $0xa0] sm:$0xff]  ;;  %913 = vst.msk [vmem:[#allocation2 + $0xa8] sm:$0xff] %vm891_vm1, %v870_v16  ;;  %4537 = vmatmul.msk.f32.gmra.mxu1 %vm891_vm1, %v955_v17 }
 0x135   : > { %4573 = vmatmul.msk.f32.gmra.mxu2 %vm891_vm1, %v1262_v18  ;;  %v503_v19 = vpop.f32.mrf.mxu0  ;;  %v5350_v17 = vld [vmem:[#allocation2 + $0x41] sm:$0xff] }
 0x136   : > { %v504_v22 = vadd.f32 %v5086_v60, %v503_v19 }
 0x138   : > { %v584_v24 = vmax.f32 %v504_v22, 0.0  ;;  %4514 = vmatmul.msk.f32.gmra.mxu0 %vm299_vm0, %v289_v21 }
 0x139   : > { %v1110_v26 = vpop.f32.mrf.mxu1 }
 0x13a   : > { %v871_v58 = vmul.f32 %v5074_v56, %v584_v24  ;;  %1211 = vst.msk [vmem:[%s5236_s14 + $0x20] sm:$0xff] %vm1206_vm2, %v1110_v26 }
 0x13b   : > { %v956_v27 = vld [vmem:[#allocation2 + $0xa7] sm:$0xff] }
 0x13c   : > { %v1263_v28 = vld [vmem:[#allocation2 + $0xa8] sm:$0xff]  ;;  %914 = vst.msk [vmem:[#allocation2 + $0xb0] sm:$0xff] %vm891_vm1, %v871_v58  ;;  %4538 = vmatmul.msk.f32.vlgmr.msra.gmra.mxu3 %vm891_vm1, %v956_v27  ;;  %4626 = vmatmul.msk.f32.vlgmr.msrb.gmra.mxu1 %vm891_vm1, %v5287_v29 }
 0x13d   : > { %4574 = vmatmul.msk.f32.gmra.mxu2 %vm891_vm1, %v1263_v28  ;;  %v506_v55 = vpop.f32.mrf.mxu0  ;;  %v5362_v27 = vld [vmem:[#allocation2 + $0x49] sm:$0xff] }
 0x13e   : > { %v507_v56 = vadd.f32 %v5086_v60, %v506_v55 }
 0x140   : > { %v585_v32 = vmax.f32 %v507_v56, 0.0  ;;  %4515 = vmatmul.msk.f32.gmra.mxu0 %vm299_vm0, %v290_v30 }
 0x141   : > { %v1113_v33 = vpop.f32.mrf.mxu1 }
 0x142   : > { %v872_v36 = vmul.f32 %v5088_v61, %v585_v32  ;;  %1212 = vst.msk [vmem:[%s5236_s14 + $0x28] sm:$0xff] %vm1206_vm2, %v1113_v33 }
 0x143   : > { %v957_v8 = vld [vmem:[#allocation2 + $0xaf] sm:$0xff] }
 0x144   : > { %v1264_v37 = vld [vmem:[#allocation2 + $0xb0] sm:$0xff]  ;;  %915 = vst.msk [vmem:[#allocation2 + $0xb8] sm:$0xff] %vm891_vm1, %v872_v36  ;;  %4539 = vmatmul.msk.f32.gmra.mxu3 %vm891_vm1, %v957_v8  ;;  %4627 = vmatmul.msk.f32.gmra.mxu1 %vm891_vm1, %v5300_v38 }
 0x145   : > { %4575 = vmatmul.msk.f32.gmra.mxu2 %vm891_vm1, %v1264_v37  ;;  %v509_v39 = vpop.f32.mrf.mxu0  ;;  %v5374_v8 = vld [vmem:[#allocation2 + $0x51] sm:$0xff] }
 0x146   : > { %v510_v61 = vadd.f32 %v5086_v60, %v509_v39 }
 0x148   : > { %v586_v20 = vmax.f32 %v510_v61, 0.0  ;;  %4516 = vmatmul.msk.f32.gmra.mxu0 %vm299_vm0, %v291_v40 }
 0x149   : > { %v1116_v41 = vpop.f32.mrf.mxu1 }
 0x14a   : > { %v873_v43 = vmul.f32 %v5104_v11, %v586_v20  ;;  %1213 = vst.msk [vmem:[%s5236_s14 + $0x30] sm:$0xff] %vm1206_vm2, %v1116_v41 }
 0x14b   : > { %v958_v46 = vld [vmem:[#allocation2 + $0xb7] sm:$0xff] }
 0x14c   : > { %v1265_v47 = vld [vmem:[#allocation2 + $0xb8] sm:$0xff]  ;;  %916 = vst.msk [vmem:[#allocation2 + $0xc0] sm:$0xff] %vm891_vm1, %v873_v43  ;;  %4540 = vmatmul.msk.f32.gmra.mxu3 %vm891_vm1, %v958_v46  ;;  %4628 = vmatmul.msk.f32.gmra.mxu1 %vm891_vm1, %v5313_v48 }
 0x14d   : > { %4576 = vmatmul.msk.f32.gmra.mxu2 %vm891_vm1, %v1265_v47  ;;  %v512_v49 = vpop.f32.mrf.mxu0  ;;  %v5386_v46 = vld [vmem:[#allocation2 + $0x59] sm:$0xff] }
 0x14e   : > { %v513_v11 = vadd.f32 %v5086_v60, %v512_v49 }
 0x150   : > { %v587_v31 = vmax.f32 %v513_v11, 0.0  ;;  %4517 = vmatmul.msk.f32.gmra.mxu0 %vm299_vm0, %v292_v50 }
 0x151   : > { %v1119_v51 = vpop.f32.mrf.mxu1 }
 0x152   : > { %v874_v52 = vmul.f32 %v5120_v23, %v587_v31  ;;  %1214 = vst.msk [vmem:[%s5236_s14 + $0x38] sm:$0xff] %vm1206_vm2, %v1119_v51  ;;  %v1243_v23 = vld [vmem:[#allocation2 + $0x8] sm:$0xff] }
 0x153   : > { %v959_v53 = vld [vmem:[#allocation2 + $0xbf] sm:$0xff] }
 0x154   : > { %v1266_v62 = vld [vmem:[#allocation2 + $0xc0] sm:$0xff]  ;;  %917 = vst.msk [vmem:[#allocation2 + $0xc8] sm:$0xff] %vm891_vm1, %v874_v52  ;;  %4541 = vmatmul.msk.f32.gmra.mxu3 %vm891_vm1, %v959_v53  ;;  %4629 = vmatmul.msk.f32.gmra.mxu1 %vm891_vm1, %v5326_v63 }
 0x155   : > { %4577 = vmatmul.msk.f32.gmra.mxu2 %vm891_vm1, %v1266_v62  ;;  %v515_v0 = vpop.f32.mrf.mxu0  ;;  %v5398_v53 = vld [vmem:[#allocation2 + $0x61] sm:$0xff] }
 0x156   : > { %v516_v1 = vadd.f32 %v5086_v60, %v515_v0 }
 0x158   : > { %v588_v2 = vmax.f32 %v516_v1, 0.0  ;;  %4554 = vmatmul.msk.f32.vlgmr.msrb.gmra.mxu0 %vm891_vm1, %v1243_v23 }
 0x159   : > { %v1122_v3 = vpop.f32.mrf.mxu1 }
 0x15a   : > { %v875_v4 = vmul.f32 %v5129_v34, %v588_v2  ;;  %1215 = vst.msk [vmem:[%s5236_s14 + $0x40] sm:$0xff] %vm1206_vm2, %v1122_v3  ;;  %v1244_v34 = vld [vmem:[#allocation2 + $0x10] sm:$0xff] }
 0x15b   : > { %v960_v42 = vld [vmem:[#allocation2 + $0xc7] sm:$0xff] }
 0x15c   : > { %v1267_v6 = vld [vmem:[#allocation2 + $0xc8] sm:$0xff]  ;;  %918 = vst.msk [vmem:[#allocation2 + $0xd0] sm:$0xff] %vm891_vm1, %v875_v4  ;;  %4542 = vmatmul.msk.f32.gmra.mxu3 %vm891_vm1, %v960_v42  ;;  %4630 = vmatmul.msk.f32.gmra.mxu1 %vm891_vm1, %v5338_v7 }
 0x15d   : > { %4578 = vmatmul.msk.f32.gmra.mxu2 %vm891_vm1, %v1267_v6  ;;  %v518_v9 = vpop.f32.mrf.mxu0  ;;  %v5410_v42 = vld [vmem:[#allocation2 + $0x69] sm:$0xff] }
 0x15e   : > { %v519_v10 = vadd.f32 %v5086_v60, %v518_v9 }
 0x160   : > { %v589_v12 = vmax.f32 %v519_v10, 0.0  ;;  %4555 = vmatmul.msk.f32.gmra.mxu0 %vm891_vm1, %v1244_v34  ;;  %v1250_v10 = vld [vmem:[#allocation2 + $0x40] sm:$0xff] }
 0x161   : > { %v1125_v54 = vpop.f32.mrf.mxu1 }
 0x162   : > { %v876_v13 = vmul.f32 %v5141_v45, %v589_v12  ;;  %1216 = vst.msk [vmem:[%s5236_s14 + $0x48] sm:$0xff] %vm1206_vm2, %v1125_v54  ;;  %v1245_v45 = vld [vmem:[#allocation2 + $0x18] sm:$0xff] }
 0x163   : > { %v961_v14 = vld [vmem:[#allocation2 + $0xcf] sm:$0xff] }
 0x164   : > { %v1268_v16 = vld [vmem:[#allocation2 + $0xd0] sm:$0xff]  ;;  %919 = vst.msk [vmem:[#allocation2 + $0xd8] sm:$0xff] %vm891_vm1, %v876_v13  ;;  %4543 = vmatmul.msk.f32.gmra.mxu3 %vm891_vm1, %v961_v14  ;;  %4631 = vmatmul.msk.f32.gmra.mxu1 %vm891_vm1, %v5350_v17 }
 0x165   : > { %4579 = vmatmul.msk.f32.gmra.mxu2 %vm891_vm1, %v1268_v16  ;;  %v521_v18 = vpop.f32.mrf.mxu0 }
 0x166   : > { %v522_v19 = vadd.f32 %v5086_v60, %v521_v18 }
 0x168   : > { %v590_v21 = vmax.f32 %v522_v19, 0.0  ;;  %4556 = vmatmul.msk.f32.gmra.mxu0 %vm891_vm1, %v1245_v45  ;;  %v5423_v19 = vld [vmem:[#allocation2 + $0x71] sm:$0xff] }
 0x169   : > { %v1128_v22 = vpop.f32.mrf.mxu1 }
 0x16a   : > { %v877_v24 = vmul.f32 %v5151_v57, %v590_v21  ;;  %1217 = vst.msk [vmem:[%s5236_s14 + $0x50] sm:$0xff] %vm1206_vm2, %v1128_v22  ;;  %v1246_v57 = vld [vmem:[#allocation2 + $0x20] sm:$0xff]  ;;  %v1251_v22 = vld [vmem:[#allocation2 + $0x48] sm:$0xff] }
 0x16b   : > { %v962_v26 = vld [vmem:[#allocation2 + $0xd7] sm:$0xff] }
 0x16c   : > { %v1269_v58 = vld [vmem:[#allocation2 + $0xd8] sm:$0xff]  ;;  %920 = vst.msk [vmem:[#allocation2 + $0xe0] sm:$0xff] %vm891_vm1, %v877_v24  ;;  %4544 = vmatmul.msk.f32.gmra.mxu3 %vm891_vm1, %v962_v26  ;;  %4632 = vmatmul.msk.f32.gmra.mxu1 %vm891_vm1, %v5362_v27 }
 0x16d   : > { %4580 = vmatmul.msk.f32.gmra.mxu2 %vm891_vm1, %v1269_v58  ;;  %v524_v28 = vpop.f32.mrf.mxu0 }
 0x16e   : > { %v525_v55 = vadd.f32 %v5086_v60, %v524_v28 }
 0x170   : > { %v591_v30 = vmax.f32 %v525_v55, 0.0  ;;  %4557 = vmatmul.msk.f32.gmra.mxu0 %vm891_vm1, %v1246_v57 }
 0x171   : > { %v1131_v56 = vpop.f32.mrf.mxu1 }
 0x172   : > { %v878_v32 = vmul.f32 %v5161_v5, %v591_v30  ;;  %1218 = vst.msk [vmem:[%s5236_s14 + $0x58] sm:$0xff] %vm1206_vm2, %v1131_v56  ;;  %v1247_v5 = vld [vmem:[#allocation2 + $0x28] sm:$0xff]  ;;  %v5438_v56 = vld [vmem:[#allocation2 + $0x79] sm:$0xff] }
 0x173   : > { %v963_v33 = vld [vmem:[#allocation2 + $0xdf] sm:$0xff] }
 0x174   : > { %v1270_v36 = vld [vmem:[#allocation2 + $0xe0] sm:$0xff]  ;;  %921 = vst.msk [vmem:[#allocation2 + $0xe8] sm:$0xff] %vm891_vm1, %v878_v32  ;;  %4545 = vmatmul.msk.f32.gmra.mxu3 %vm891_vm1, %v963_v33  ;;  %4633 = vmatmul.msk.f32.gmra.mxu1 %vm891_vm1, %v5374_v8  ;;  %v1657_v32 = vld [vmem:[%s7304_s4 + $0x10] sm:$0xff] }
 0x175   : > { %4581 = vmatmul.msk.f32.gmra.mxu2 %vm891_vm1, %v1270_v36  ;;  %v527_v37 = vpop.f32.mrf.mxu0  ;;  %1781 = vmatpush.msra.mxu3 %v1657_v32  ;;  %v2791_v32 = vld [vmem:[%s7304_s4 + $0x28] sm:$0xff] }
 0x176   : > { %v528_v39 = vadd.f32 %v5086_v60, %v527_v37  ;;  %v1252_v37 = vld [vmem:[#allocation2 + $0x50] sm:$0xff] }
 0x178   : > { %v592_v40 = vmax.f32 %v528_v39, 0.0  ;;  %4558 = vmatmul.msk.f32.gmra.mxu0 %vm891_vm1, %v1247_v5  ;;  %v818_v5 = vpop.permute.xlu0 %817 }
 0x179   : > { %v1134_v61 = vpop.f32.mrf.mxu1 }
 0x17a   : > { %v879_v20 = vmul.f32 %v5168_v15, %v592_v40  ;;  %1219 = vst.msk [vmem:[%s5236_s14 + $0x60] sm:$0xff] %vm1206_vm2, %v1134_v61  ;;  %v1248_v15 = vld [vmem:[#allocation2 + $0x30] sm:$0xff] }
 0x17b   : > { %v964_v41 = vld [vmem:[#allocation2 + $0xe7] sm:$0xff] }
 0x17c   : > { %v1271_v43 = vld [vmem:[#allocation2 + $0xe8] sm:$0xff]  ;;  %922 = vst.msk [vmem:[#allocation2 + $0xf0] sm:$0xff] %vm891_vm1, %v879_v20  ;;  %4546 = vmatmul.msk.f32.gmra.mxu3 %vm891_vm1, %v964_v41  ;;  %4634 = vmatmul.msk.f32.gmra.mxu1 %vm891_vm1, %v5386_v46 }
 0x17d   : > { %4582 = vmatmul.msk.f32.gmra.mxu2 %vm891_vm1, %v1271_v43  ;;  %v530_v47 = vpop.f32.mrf.mxu0 }
 0x17e   : > { %v531_v49 = vadd.f32 %v5086_v60, %v530_v47 }
 0x180   : > { %v593_v50 = vmax.f32 %v531_v49, 0.0  ;;  %4559 = vmatmul.msk.f32.gmra.mxu0 %vm891_vm1, %v1248_v15  ;;  %v5455_v49 = vld [vmem:[#allocation2 + $0x81] sm:$0xff] }
 0x181   : > { %v1137_v11 = vpop.f32.mrf.mxu1 }
 0x182   : > { %v880_v31 = vmul.f32 %v5175_v25, %v593_v50  ;;  %1220 = vst.msk [vmem:[%s5236_s14 + $0x68] sm:$0xff] %vm1206_vm2, %v1137_v11  ;;  %v1249_v25 = vld [vmem:[#allocation2 + $0x38] sm:$0xff] }
 0x183   : > { %v965_v51 = vld [vmem:[#allocation2 + $0xef] sm:$0xff] }
 0x184   : > { %v1272_v52 = vld [vmem:[#allocation2 + $0xf0] sm:$0xff]  ;;  %923 = vst.msk [vmem:[#allocation2 + $0xf8] sm:$0xff] %vm891_vm1, %v880_v31  ;;  %4547 = vmatmul.msk.f32.gmra.mxu3 %vm891_vm1, %v965_v51  ;;  %4635 = vmatmul.msk.f32.gmra.mxu1 %vm891_vm1, %v5398_v53  ;;  %v1253_v31 = vld [vmem:[#allocation2 + $0x58] sm:$0xff] }
 0x185   : > { %4583 = vmatmul.msk.f32.gmra.mxu2 %vm891_vm1, %v1272_v52  ;;  %v533_v62 = vpop.f32.mrf.mxu0  ;;  %v3169_v51 = vld [vmem:[%s7304_s4 + $0x30] sm:$0xff] }
 0x186   : > { %v534_v0 = vadd.f32 %v5086_v60, %v533_v62  ;;  %v823_v62 = vpop.permute.xlu2 %822  ;;  %3293 = vmatpush.msra.mxu0 %v3169_v51 }
 0x188   : > { %v594_v1 = vmax.f32 %v534_v0, 0.0  ;;  %4560 = vmatmul.msk.f32.gmra.mxu0 %vm891_vm1, %v1249_v25 }
 0x189   : > { %v1140_v23 = vpop.f32.mrf.mxu1 }
 0x18a   : > { %v881_v2 = vmul.f32 %v5182_v35, %v594_v1  ;;  %1221 = vst.msk [vmem:[%s5236_s14 + $0x70] sm:$0xff] %vm1206_vm2, %v1140_v23 }
 0x18b   : > { %v966_v3 = vld [vmem:[#allocation2 + $0xf7] sm:$0xff] }
 0x18c   : > { %v1273_v4 = vld [vmem:[#allocation2 + $0xf8] sm:$0xff]  ;;  %924 = vst.msk [vmem:[#allocation2 + $0x100] sm:$0xff] %vm891_vm1, %v881_v2  ;;  %4548 = vmatmul.msk.f32.gmra.mxu3 %vm891_vm1, %v966_v3  ;;  %4636 = vmatmul.msk.f32.gmra.mxu1 %vm891_vm1, %v5410_v42 }
 0x18d   : > { %4584 = vmatmul.msk.f32.gmra.mxu2 %vm891_vm1, %v1273_v4  ;;  %v536_v6 = vpop.f32.mrf.mxu0  ;;  %v2377_v3 = vld [vmem:[#allocation2 + $0x1a] sm:$0xff]  ;;  %v5471_v4 = vld [vmem:[#allocation2 + $0x89] sm:$0xff] }
 0x18e   : > { %v537_v9 = vadd.f32 %v5086_v60, %v536_v6 }
 0x190   : > { %v1447_v35 = vpop.f32.mrf.mxu2  ;;  %v595_v34 = vmax.f32 %v537_v9, 0.0  ;;  %4561 = vmatmul.msk.f32.gmra.mxu0 %vm891_vm1, %v1250_v10  ;;  %v1254_v10 = vld [vmem:[#allocation2 + $0x60] sm:$0xff] }
 0x191   : > { %v1527_v12 = vld [vmem:[%s5236_s14 + $0x70] sm:$0xff]  ;;  %v1143_v54 = vpop.f32.mrf.mxu1 }
 0x192   : > { %v882_v13 = vmul.f32 %v5189_v44, %v595_v34  ;;  %v1563_v14 = vadd.f32 %v1527_v12, %v1447_v35  ;;  %1222 = vst.msk [vmem:[%s5236_s14 + $0x78] sm:$0xff] %vm1206_vm2, %v1143_v54  ;;  %v828_v12 = vpop.permute.xlu0 %827 }
 0x193   : > { %v967_v16 = vld [vmem:[#allocation2 + $0xff] sm:$0xff] }
 0x194   : > { %v1274_v18 = vld [vmem:[#allocation2 + $0x100] sm:$0xff]  ;;  %925 = vst.msk [vmem:[#allocation2 + $0x108] sm:$0xff] %vm891_vm1, %v882_v13  ;;  %4549 = vmatmul.msk.f32.gmra.mxu3 %vm891_vm1, %v967_v16  ;;  %4637 = vmatmul.msk.f32.gmra.mxu1 %vm891_vm1, %v5423_v19 }
 0x195   : > { %4585 = vmatmul.msk.f32.gmra.mxu2 %vm891_vm1, %v1274_v18  ;;  %1599 = vst.msk [vmem:[%s5236_s14 + $0x70] sm:$0xff] %vm1206_vm2, %v1563_v14  ;;  %v539_v44 = vpop.f32.mrf.mxu0 }
 0x196   : > { %v540_v45 = vadd.f32 %v5086_v60, %v539_v44  ;;  %v2378_v44 = vld [vmem:[#allocation2 + $0x22] sm:$0xff] }
 0x198   : > { %v1450_v21 = vpop.f32.mrf.mxu2  ;;  %v596_v24 = vmax.f32 %v540_v45, 0.0  ;;  %4562 = vmatmul.msk.f32.gmra.mxu0 %vm891_vm1, %v1251_v22 }
 0x199   : > { %v1528_v26 = vld [vmem:[%s5236_s14 + $0x78] sm:$0xff]  ;;  %v1146_v58 = vpop.f32.mrf.mxu1 }
 0x19a   : > { %v883_v28 = vmul.f32 %v5199_v59, %v596_v24  ;;  %v1564_v55 = vadd.f32 %v1528_v26, %v1450_v21  ;;  %1223 = vst.msk [vmem:[%s5236_s14 + $0x80] sm:$0xff] %vm1206_vm2, %v1146_v58  ;;  %v4864_v21 = vld [vmem:[%s7303_s3] ss:$0 sm:$0xff]  ;;  %v1255_v26 = vld [vmem:[#allocation2 + $0x68] sm:$0xff] }
 0x19b   : > { %v968_v57 = vld [vmem:[#allocation2 + $0x107] sm:$0xff] }
 0x19c   : > { %v1275_v30 = vld [vmem:[#allocation2 + $0x108] sm:$0xff]  ;;  %926 = vst.msk [vmem:[#allocation2 + $0x110] sm:$0xff] %vm891_vm1, %v883_v28  ;;  %4550 = vmatmul.msk.f32.gmra.mxu3 %vm891_vm1, %v968_v57  ;;  %4638 = vmatmul.msk.f32.gmra.mxu1 %vm891_vm1, %v5438_v56  ;;  %v833_v28 = vpop.permute.xlu1 %832 }
 0x19d   : > { %4586 = vmatmul.msk.f32.gmra.mxu2 %vm891_vm1, %v1275_v30  ;;  %1600 = vst.msk [vmem:[%s5236_s14 + $0x78] sm:$0xff] %vm1206_vm2, %v1564_v55  ;;  %v542_v59 = vpop.f32.mrf.mxu0 }
 0x19e   : > { %v543_v33 = vadd.f32 %v5086_v60, %v542_v59 }
 0x1a0   : > { %v1453_v36 = vpop.f32.mrf.mxu2  ;;  %v597_v39 = vmax.f32 %v543_v33, 0.0  ;;  %4563 = vmatmul.msk.f32.gmra.mxu0 %vm891_vm1, %v1252_v37  ;;  %v5504_v37 = vld [vmem:[#allocation2 + $0x99] sm:$0xff] }
 0x1a1   : > { %v1529_v40 = vld [vmem:[%s5236_s14 + $0x80] sm:$0xff]  ;;  %v1149_v61 = vpop.f32.mrf.mxu1 }
 0x1a2   : > { %v884_v20 = vmul.f32 %v818_v5, %v597_v39  ;;  %v1565_v41 = vadd.f32 %v1529_v40, %v1453_v36  ;;  %1224 = vst.msk [vmem:[%s5236_s14 + $0x88] sm:$0xff] %vm1206_vm2, %v1149_v61  ;;  %v2379_v36 = vld [vmem:[#allocation2 + $0x2a] sm:$0xff] }
 0x1a3   : > { %v969_v43 = vld [vmem:[#allocation2 + $0x10f] sm:$0xff] }
 0x1a4   : > { %v1276_v47 = vld [vmem:[#allocation2 + $0x110] sm:$0xff]  ;;  %927 = vst.msk [vmem:[#allocation2 + $0x118] sm:$0xff] %vm891_vm1, %v884_v20  ;;  %4551 = vmatmul.msk.f32.gmra.mxu3 %vm891_vm1, %v969_v43  ;;  %4639 = vmatmul.msk.f32.gmra.mxu1 %vm891_vm1, %v5455_v49  ;;  %v838_v43 = vpop.permute.xlu2 %837 }
 0x1a5   : > { %4587 = vmatmul.msk.f32.gmra.mxu2 %vm891_vm1, %v1276_v47  ;;  %1601 = vst.msk [vmem:[%s5236_s14 + $0x80] sm:$0xff] %vm1206_vm2, %v1565_v41  ;;  %v545_v15 = vpop.f32.mrf.mxu0  ;;  %v1256_v20 = vld [vmem:[#allocation2 + $0x70] sm:$0xff] }
 0x1a6   : > { %v546_v50 = vadd.f32 %v5086_v60, %v545_v15 }
 0x1a8   : > { %v1456_v11 = vpop.f32.mrf.mxu2  ;;  %v598_v52 = vmax.f32 %v546_v50, 0.0  ;;  %4564 = vmatmul.msk.f32.gmra.mxu0 %vm891_vm1, %v1253_v31  ;;  %v5518_v31 = vld [vmem:[#allocation2 + $0xa1] sm:$0xff] }
 0x1a9   : > { %v1530_v0 = vld [vmem:[%s5236_s14 + $0x88] sm:$0xff]  ;;  %v1152_v25 = vpop.f32.mrf.mxu1 }
 0x1aa   : > { %v885_v1 = vmul.f32 %v823_v62, %v598_v52  ;;  %v1566_v23 = vadd.f32 %v1530_v0, %v1456_v11  ;;  %1225 = vst.msk [vmem:[%s5236_s14 + $0x90] sm:$0xff] %vm1206_vm2, %v1152_v25  ;;  %v2380_v11 = vld [vmem:[#allocation2 + $0x32] sm:$0xff] }
 0x1ab   : > { %v970_v2 = vld [vmem:[#allocation2 + $0x117] sm:$0xff] }
 0x1ac   : > { %928 = vst.msk [vmem:[#allocation2 + $0x120] sm:$0xff] %vm891_vm1, %v885_v1  ;;  %4552 = vmatmul.msk.f32.gmra.mxu3 %vm891_vm1, %v970_v2  ;;  %4640 = vmatmul.msk.f32.gmra.mxu1 %vm891_vm1, %v5471_v4  ;;  %v1277_v33 = vld [vmem:[#allocation2 + $0x118] sm:$0xff]  ;;  %v3133_v1 = vld [vmem:[#allocation2 + $0x2b] sm:$0xff] }
 0x1ad   : > { %4662 = vmatmul.msk.f32.vlgmr.msrb.gmra.mxu2 %vm891_vm1, %v2377_v3  ;;  %1602 = vst.msk [vmem:[%s5236_s14 + $0x88] sm:$0xff] %vm1206_vm2, %v1566_v23  ;;  %v548_v6 = vpop.f32.mrf.mxu0  ;;  %v843_v3 = vpop.permute.xlu0 %842 }
 0x1ae   : > { %v549_v9 = vadd.f32 %v5086_v60, %v548_v6  ;;  %v5485_v60 = vld [vmem:[#allocation2 + $0x91] sm:$0xff] }
 0x1b0   : > { %v1459_v35 = vpop.f32.mrf.mxu2  ;;  %v599_v34 = vmax.f32 %v549_v9, 0.0  ;;  %4565 = vmatmul.msk.f32.gmra.mxu0 %vm891_vm1, %v1254_v10  ;;  %v2381_v10 = vld [vmem:[#allocation2 + $0x3a] sm:$0xff] }
 0x1b1   : > { %v1531_v54 = vld [vmem:[%s5236_s14 + $0x90] sm:$0xff]  ;;  %v1155_v13 = vpop.f32.mrf.mxu1 }
 0x1b2   : > { %v886_v14 = vmul.f32 %v828_v12, %v599_v34  ;;  %v1567_v16 = vadd.f32 %v1531_v54, %v1459_v35  ;;  %1226 = vst.msk [vmem:[%s5236_s14 + $0x98] sm:$0xff] %vm1206_vm2, %v1155_v13  ;;  %v1621_v35 = vld [vmem:[#allocation2 + $0x9] sm:$0xff]  ;;  %v3547_v34 = vld [vmem:[%s7304_s4 + $0x38] sm:$0xff] }
 0x1b3   : > { %v971_v18 = vld [vmem:[#allocation2 + $0x11f] sm:$0xff]  ;;  %v5536_v12 = vld [vmem:[#allocation2 + $0xa9] sm:$0xff]  ;;  %3671 = vmatpush.msra.mxu1 %v3547_v34 }
 0x1b4   : > { %929 = vst.msk [vmem:[#allocation2 + $0x128] sm:$0xff] %vm891_vm1, %v886_v14  ;;  %4553 = vmatmul.msk.f32.gmra.mxu3 %vm891_vm1, %v971_v18  ;;  %4641 = vmatmul.msk.f32.gmra.mxu1 %vm891_vm1, %v5485_v60  ;;  %v1278_v50 = vld [vmem:[#allocation2 + $0x120] sm:$0xff]  ;;  %v3137_v34 = vld [vmem:[#allocation2 + $0x4b] sm:$0xff] }
 0x1b5   : > { %4663 = vmatmul.msk.f32.gmra.mxu2 %vm891_vm1, %v2378_v44  ;;  %1603 = vst.msk [vmem:[%s5236_s14 + $0x90] sm:$0xff] %vm1206_vm2, %v1567_v16  ;;  %v551_v45 = vpop.f32.mrf.mxu0  ;;  %v3134_v44 = vld [vmem:[#allocation2 + $0x33] sm:$0xff] }
 0x1b6   : > { %v552_v22 = vadd.f32 %v4864_v21, %v551_v45 }
 0x1b8   : > { %v1462_v24 = vpop.f32.mrf.mxu2  ;;  %v600_v58 = vmax.f32 %v552_v22, 0.0  ;;  %4566 = vmatmul.msk.f32.gmra.mxu0 %vm891_vm1, %v1255_v26 }
 0x1b9   : > { %v1532_v55 = vld [vmem:[%s5236_s14 + $0x98] sm:$0xff]  ;;  %v5497_v59 = vpop.f32.mrf.mxu1 }
 0x1ba   : > { %v887_v57 = vmul.f32 %v833_v28, %v600_v58  ;;  %v1568_v30 = vadd.f32 %v1532_v55, %v1462_v24  ;;  %v848_v24 = vpop.permute.xlu1 %847  ;;  %v2382_v28 = vld [vmem:[#allocation2 + $0x42] sm:$0xff] }
 0x1bb   : > { %v3925_v55 = vld [vmem:[%s7304_s4 + $0x40] sm:$0xff] }
 0x1bc   : > { %930 = vst.msk [vmem:[#allocation2 + $0x130] sm:$0xff] %vm891_vm1, %v887_v57  ;;  %4588 = vmatmul.msk.f32.vlgmr.msrb.gmra.mxu3 %vm891_vm1, %v1277_v33  ;;  %4642 = vmatmul.msk.f32.gmra.mxu1 %vm891_vm1, %v5504_v37  ;;  %v5553_v57 = vld [vmem:[#allocation2 + $0xb1] sm:$0xff] }
 0x1bd   : > { %4664 = vmatmul.msk.f32.gmra.mxu2 %vm891_vm1, %v2379_v36  ;;  %1604 = vst.msk [vmem:[%s5236_s14 + $0x98] sm:$0xff] %vm1206_vm2, %v1568_v30  ;;  %v554_v39 = vpop.f32.mrf.mxu0  ;;  %2915 = vmatpush.msrb.mxu3 %v2791_v32  ;;  %v1513_v32 = vld [vmem:[%s5236_s14] sm:$0xff] }
 0x1be   : > { %v555_v5 = vadd.f32 %v4864_v21, %v554_v39  ;;  %4049 = vmatpush.msra.mxu2 %v3925_v55  ;;  %v2386_v55 = vld [vmem:[#allocation2 + $0x62] sm:$0xff] }
 0x1bf   : > { %v1158_v40 = vpop.f32.mrf.mxu3 }
 0x1c0   : > { %v1465_v61 = vpop.f32.mrf.mxu2  ;;  %v601_v41 = vmax.f32 %v555_v5, 0.0  ;;  %1227 = vst.msk [vmem:[%s5236_s14 + $0xa0] sm:$0xff] %vm1206_vm2, %v1158_v40  ;;  %4567 = vmatmul.msk.f32.gmra.mxu0 %vm891_vm1, %v1256_v20  ;;  %v3135_v40 = vld [vmem:[#allocation2 + $0x3b] sm:$0xff] }
 0x1c1   : > { %v5514_v15 = vpop.f32.mrf.mxu1 }
 0x1c2   : > { %v888_v47 = vmul.f32 %v838_v43, %v601_v41  ;;  %v2383_v41 = vld [vmem:[#allocation2 + $0x4a] sm:$0xff]  ;;  %v5571_v43 = vld [vmem:[#allocation2 + $0xb9] sm:$0xff] }
 0x1c4   : > { %931 = vst.msk [vmem:[#allocation2 + $0x138] sm:$0xff] %vm891_vm1, %v888_v47  ;;  %4589 = vmatmul.msk.f32.gmra.mxu3 %vm891_vm1, %v1278_v50  ;;  %4643 = vmatmul.msk.f32.gmra.mxu1 %vm891_vm1, %v5518_v31  ;;  %v1514_v50 = vld [vmem:[%s5236_s14 + $0x8] sm:$0xff] }
 0x1c5   : > { %4665 = vmatmul.msk.f32.gmra.mxu2 %vm891_vm1, %v2380_v11  ;;  %v557_v51 = vpop.f32.mrf.mxu0 }
 0x1c6   : > { %v558_v52 = vadd.f32 %v4864_v21, %v557_v51 }
 0x1c7   : > { %v1533_v62 = vld [vmem:[%s5236_s14 + $0xa0] sm:$0xff]  ;;  %v1161_v0 = vpop.f32.mrf.mxu3 }
 0x1c8   : > { %v1468_v25 = vpop.f32.mrf.mxu2  ;;  %v1569_v23 = vadd.f32 %v1533_v62, %v1465_v61  ;;  %v602_v2 = vmax.f32 %v558_v52, 0.0  ;;  %1228 = vst.msk [vmem:[%s5236_s14 + $0xa8] sm:$0xff] %vm1206_vm2, %v1161_v0  ;;  %4734 = vmatmul.msk.f32.vlgmr.msra.gmra.mxu0 %vm891_vm1, %v3133_v1  ;;  %v3136_v62 = vld [vmem:[#allocation2 + $0x43] sm:$0xff]  ;;  %v2384_v1 = vld [vmem:[#allocation2 + $0x52] sm:$0xff] }
 0x1c9   : > { %v5529_v9 = vpop.f32.mrf.mxu1 }
 0x1ca   : > { %1605 = vst.msk [vmem:[%s5236_s14 + $0xa0] sm:$0xff] %vm1206_vm2, %v1569_v23  ;;  %v889_v6 = vmul.f32 %v843_v3, %v602_v2  ;;  %v5589_v23 = vld [vmem:[#allocation2 + $0xc1] sm:$0xff]  ;;  %v1515_v3 = vld [vmem:[%s5236_s14 + $0x10] sm:$0xff] }
 0x1cc   : > { %932 = vst.msk [vmem:[#allocation2 + $0x140] sm:$0xff] %vm891_vm1, %v889_v6  ;;  %4590 = vmatmul.msk.f32.vlgmr.msra.gmra.mxu3 %vm891_vm1, %v1621_v35  ;;  %4644 = vmatmul.msk.f32.gmra.mxu1 %vm891_vm1, %v5536_v12 }
 0x1cd   : > { %4666 = vmatmul.msk.f32.gmra.mxu2 %vm891_vm1, %v2381_v10  ;;  %v560_v54 = vpop.f32.mrf.mxu0 }
 0x1ce   : > { %v561_v13 = vadd.f32 %v4864_v21, %v560_v54  ;;  %v1622_v21 = vld [vmem:[#allocation2 + $0x11] sm:$0xff] }
 0x1cf   : > { %v1534_v14 = vld [vmem:[%s5236_s14 + $0xa8] sm:$0xff]  ;;  %v1164_v16 = vpop.f32.mrf.mxu3 }
 0x1d0   : > { %v1471_v18 = vpop.f32.mrf.mxu2  ;;  %v1570_v45 = vadd.f32 %v1534_v14, %v1468_v25  ;;  %v603_v22 = vmax.f32 %v561_v13, 0.0  ;;  %1229 = vst.msk [vmem:[%s5236_s14 + $0xb0] sm:$0xff] %vm1206_vm2, %v1164_v16  ;;  %4735 = vmatmul.msk.f32.gmra.mxu0 %vm891_vm1, %v3134_v44  ;;  %v2385_v14 = vld [vmem:[#allocation2 + $0x5a] sm:$0xff]  ;;  %v5607_v16 = vld [vmem:[#allocation2 + $0xc9] sm:$0xff] }
 0x1d1   : > { %v5547_v58 = vpop.f32.mrf.mxu1  ;;  %v1516_v44 = vld [vmem:[%s5236_s14 + $0x18] sm:$0xff] }
 0x1d2   : > { %1606 = vst.msk [vmem:[%s5236_s14 + $0xa8] sm:$0xff] %vm1206_vm2, %v1570_v45  ;;  %v890_v26 = vmul.f32 %v848_v24, %v603_v22 }
 0x1d4   : > { %934 = vst.msk [vmem:[#allocation2 + $0x148] sm:$0xf] %vm933_vm3, %v890_v26  ;;  %4591 = vmatmul.msk.f32.gmra.mxu3 %vm891_vm1, %v1622_v21  ;;  %4645 = vmatmul.msk.f32.gmra.mxu1 %vm891_vm1, %v5553_v57  ;;  %v3138_v26 = vld [vmem:[#allocation2 + $0x53] sm:$0xff] }
 0x1d5   : > { %4667 = vmatmul.msk.f32.gmra.mxu2 %vm891_vm1, %v2382_v28  ;;  %v1405_v30 = vpop.f32.mrf.mxu0 }
 0x1d6   : > { %v1549_v33 = vadd.f32 %v1513_v32, %v1405_v30  ;;  %v5625_v30 = vld [vmem:[#allocation2 + $0xd1] sm:$0xff] }
 0x1d7   : > { %v1535_v36 = vld [vmem:[%s5236_s14 + $0xb0] sm:$0xff]  ;;  %v1167_v39 = vpop.f32.mrf.mxu3 }
 0x1d8   : > { %v1474_v5 = vpop.f32.mrf.mxu2  ;;  %v1571_v61 = vadd.f32 %v1535_v36, %v1471_v18  ;;  %1585 = vst.msk [vmem:[%s5236_s14] sm:$0xff] %vm1206_vm2, %v1549_v33  ;;  %4736 = vmatmul.msk.f32.gmra.mxu0 %vm891_vm1, %v3135_v40  ;;  %v1517_v33 = vld [vmem:[%s5236_s14 + $0x20] sm:$0xff] }
 0x1d9   : > { %1230 = vst.msk [vmem:[%s5236_s14 + $0xb8] sm:$0xff] %vm1206_vm2, %v1167_v39  ;;  %v5567_v20 = vpop.f32.mrf.mxu1  ;;  %v3139_v40 = vld [vmem:[#allocation2 + $0x5b] sm:$0xff] }
 0x1da   : > { %1607 = vst.msk [vmem:[%s5236_s14 + $0xb0] sm:$0xff] %vm1206_vm2, %v1571_v61 }
 0x1dc   : > { %4592 = vmatmul.msk.f32.gmra.mxu3 %vm891_vm1, %v5287_v29  ;;  %4646 = vmatmul.msk.f32.gmra.mxu1 %vm891_vm1, %v5571_v43 }
 0x1dd   : > { %4668 = vmatmul.msk.f32.gmra.mxu2 %vm891_vm1, %v2383_v41  ;;  %v1408_v47 = vpop.f32.mrf.mxu0 }
 0x1de   : > { %v1550_v11 = vadd.f32 %v1514_v50, %v1408_v47  ;;  %v2387_v47 = vld [vmem:[#allocation2 + $0x6a] sm:$0xff]  ;;  %v5643_v50 = vld [vmem:[#allocation2 + $0xd9] sm:$0xff] }
 0x1df   : > { %v1170_v51 = vpop.f32.mrf.mxu3 }
 0x1e0   : > { %v1477_v52 = vpop.f32.mrf.mxu2  ;;  %v1536_v0 = vld [vmem:[%s5236_s14 + $0xb8] sm:$0xff]  ;;  %1586 = vst.msk [vmem:[%s5236_s14 + $0x8] sm:$0xff] %vm1206_vm2, %v1550_v11  ;;  %4737 = vmatmul.msk.f32.gmra.mxu0 %vm891_vm1, %v3136_v62 }
 0x1e1   : > { %v1572_v29 = vadd.f32 %v1536_v0, %v1474_v5  ;;  %1231 = vst.msk [vmem:[%s5236_s14 + $0xc0] sm:$0xff] %vm1206_vm2, %v1170_v51  ;;  %v5583_v25 = vpop.f32.mrf.mxu1  ;;  %v1518_v51 = vld [vmem:[%s5236_s14 + $0x28] sm:$0xff] }
 0x1e3   : > { %1608 = vst.msk [vmem:[%s5236_s14 + $0xb8] sm:$0xff] %vm1206_vm2, %v1572_v29  ;;  %v3140_v29 = vld [vmem:[#allocation2 + $0x63] sm:$0xff] }
 0x1e4   : > { %4593 = vmatmul.msk.f32.gmra.mxu3 %vm891_vm1, %v5300_v38  ;;  %4647 = vmatmul.msk.f32.gmra.mxu1 %vm891_vm1, %v5589_v23 }
 0x1e5   : > { %4669 = vmatmul.msk.f32.gmra.mxu2 %vm891_vm1, %v2384_v1  ;;  %v1411_v2 = vpop.f32.mrf.mxu0 }
 0x1e6   : > { %v1551_v6 = vadd.f32 %v1515_v3, %v1411_v2  ;;  %v2388_v3 = vld [vmem:[#allocation2 + $0x72] sm:$0xff] }
 0x1e7   : > { %v1173_v35 = vpop.f32.mrf.mxu3 }
 0x1e8   : > { %v1480_v10 = vpop.f32.mrf.mxu2  ;;  %v1537_v54 = vld [vmem:[%s5236_s14 + $0xc0] sm:$0xff]  ;;  %1587 = vst.msk [vmem:[%s5236_s14 + $0x10] sm:$0xff] %vm1206_vm2, %v1551_v6  ;;  %4738 = vmatmul.msk.f32.gmra.mxu0 %vm891_vm1, %v3137_v34 }
 0x1e9   : > { %v1573_v38 = vadd.f32 %v1537_v54, %v1477_v52  ;;  %1232 = vst.msk [vmem:[%s5236_s14 + $0xc8] sm:$0xff] %vm1206_vm2, %v1173_v35  ;;  %v5601_v13 = vpop.f32.mrf.mxu1  ;;  %v5661_v6 = vld [vmem:[#allocation2 + $0xe1] sm:$0xff] }
 0x1eb   : > { %1609 = vst.msk [vmem:[%s5236_s14 + $0xc0] sm:$0xff] %vm1206_vm2, %v1573_v38 }
 0x1ec   : > { %4594 = vmatmul.msk.f32.gmra.mxu3 %vm891_vm1, %v5313_v48  ;;  %4648 = vmatmul.msk.f32.gmra.mxu1 %vm891_vm1, %v5607_v16 }
 0x1ed   : > { %4670 = vmatmul.msk.f32.gmra.mxu2 %vm891_vm1, %v2385_v14  ;;  %v1414_v18 = vpop.f32.mrf.mxu0  ;;  %v3141_v14 = vld [vmem:[#allocation2 + $0x6b] sm:$0xff] }
 0x1ee   : > { %v1552_v45 = vadd.f32 %v1516_v44, %v1414_v18 }
 0x1ef   : > { %v1176_v22 = vpop.f32.mrf.mxu3 }
 0x1f0   : > { %v1483_v24 = vpop.f32.mrf.mxu2  ;;  %v1538_v21 = vld [vmem:[%s5236_s14 + $0xc8] sm:$0xff]  ;;  %1588 = vst.msk [vmem:[%s5236_s14 + $0x18] sm:$0xff] %vm1206_vm2, %v1552_v45  ;;  %4739 = vmatmul.msk.f32.gmra.mxu0 %vm891_vm1, %v3138_v26  ;;  %v2389_v45 = vld [vmem:[#allocation2 + $0x7a] sm:$0xff] }
 0x1f1   : > { %v1574_v48 = vadd.f32 %v1538_v21, %v1480_v10  ;;  %1233 = vst.msk [vmem:[%s5236_s14 + $0xd0] sm:$0xff] %vm1206_vm2, %v1176_v22  ;;  %v5619_v28 = vpop.f32.mrf.mxu1  ;;  %v1519_v10 = vld [vmem:[%s5236_s14 + $0x30] sm:$0xff]  ;;  %v1520_v26 = vld [vmem:[%s5236_s14 + $0x38] sm:$0xff] }
 0x1f2   : > { %v5679_v22 = vld [vmem:[#allocation2 + $0xe9] sm:$0xff] }
 0x1f3   : > { %1610 = vst.msk [vmem:[%s5236_s14 + $0xc8] sm:$0xff] %vm1206_vm2, %v1574_v48 }
 0x1f4   : > { %4595 = vmatmul.msk.f32.gmra.mxu3 %vm891_vm1, %v5326_v63  ;;  %4649 = vmatmul.msk.f32.gmra.mxu1 %vm891_vm1, %v5625_v30 }
 0x1f5   : > { %4671 = vmatmul.msk.f32.gmra.mxu2 %vm891_vm1, %v2386_v55  ;;  %v1417_v32 = vpop.f32.mrf.mxu0 }
 0x1f6   : > { %v1553_v36 = vadd.f32 %v1517_v33, %v1417_v32  ;;  %v3142_v32 = vld [vmem:[#allocation2 + $0x73] sm:$0xff] }
 0x1f7   : > { %v1179_v39 = vpop.f32.mrf.mxu3 }
 0x1f8   : > { %v1486_v5 = vpop.f32.mrf.mxu2  ;;  %v1539_v61 = vld [vmem:[%s5236_s14 + $0xd0] sm:$0xff]  ;;  %1589 = vst.msk [vmem:[%s5236_s14 + $0x20] sm:$0xff] %vm1206_vm2, %v1553_v36  ;;  %4740 = vmatmul.msk.f32.gmra.mxu0 %vm891_vm1, %v3139_v40 }
 0x1f9   : > { %v1575_v63 = vadd.f32 %v1539_v61, %v1483_v24  ;;  %1234 = vst.msk [vmem:[%s5236_s14 + $0xd8] sm:$0xff] %vm1206_vm2, %v1179_v39  ;;  %v5637_v41 = vpop.f32.mrf.mxu1  ;;  %v2390_v39 = vld [vmem:[#allocation2 + $0x82] sm:$0xff] }
 0x1fa   : > { %v1521_v61 = vld [vmem:[%s5236_s14 + $0x40] sm:$0xff] }
 0x1fb   : > { %1611 = vst.msk [vmem:[%s5236_s14 + $0xd0] sm:$0xff] %vm1206_vm2, %v1575_v63 }
 0x1fc   : > { %4596 = vmatmul.msk.f32.gmra.mxu3 %vm891_vm1, %v5338_v7  ;;  %4650 = vmatmul.msk.f32.gmra.mxu1 %vm891_vm1, %v5643_v50 }
 0x1fd   : > { %4672 = vmatmul.msk.f32.gmra.mxu2 %vm891_vm1, %v2387_v47  ;;  %v1420_v11 = vpop.f32.mrf.mxu0 }
 0x1fe   : > { %v1554_v52 = vadd.f32 %v1518_v51, %v1420_v11  ;;  %v3143_v51 = vld [vmem:[#allocation2 + $0x7b] sm:$0xff] }
 0x1ff   : > { %v1182_v62 = vpop.f32.mrf.mxu3 }
 0x200   : > { %v1489_v0 = vpop.f32.mrf.mxu2  ;;  %v1540_v1 = vld [vmem:[%s5236_s14 + $0xd8] sm:$0xff]  ;;  %1590 = vst.msk [vmem:[%s5236_s14 + $0x28] sm:$0xff] %vm1206_vm2, %v1554_v52  ;;  %4741 = vmatmul.msk.f32.gmra.mxu0 %vm891_vm1, %v3140_v29 }
 0x201   : > { %v1576_v7 = vadd.f32 %v1540_v1, %v1486_v5  ;;  %1235 = vst.msk [vmem:[%s5236_s14 + $0xe0] sm:$0xff] %vm1206_vm2, %v1182_v62  ;;  %v5655_v2 = vpop.f32.mrf.mxu1  ;;  %v5697_v5 = vld [vmem:[#allocation2 + $0xf1] sm:$0xff]  ;;  %v5715_v29 = vld [vmem:[#allocation2 + $0xf9] sm:$0xff] }
 0x203   : > { %1612 = vst.msk [vmem:[%s5236_s14 + $0xd8] sm:$0xff] %vm1206_vm2, %v1576_v7  ;;  %v1522_v7 = vld [vmem:[%s5236_s14 + $0x48] sm:$0xff] }
 0x204   : > { %4597 = vmatmul.msk.f32.gmra.mxu3 %vm891_vm1, %v5350_v17  ;;  %4651 = vmatmul.msk.f32.gmra.mxu1 %vm891_vm1, %v5661_v6 }
 0x205   : > { %4673 = vmatmul.msk.f32.gmra.mxu2 %vm891_vm1, %v2388_v3  ;;  %v1423_v35 = vpop.f32.mrf.mxu0 }
 0x206   : > { %v1555_v34 = vadd.f32 %v1519_v10, %v1423_v35 }
 0x207   : > { %v1185_v54 = vpop.f32.mrf.mxu3 }
 0x208   : > { %v1492_v38 = vpop.f32.mrf.mxu2  ;;  %v1541_v18 = vld [vmem:[%s5236_s14 + $0xe0] sm:$0xff]  ;;  %1591 = vst.msk [vmem:[%s5236_s14 + $0x30] sm:$0xff] %vm1206_vm2, %v1555_v34  ;;  %4742 = vmatmul.msk.f32.gmra.mxu0 %vm891_vm1, %v3141_v14  ;;  %v2392_v14 = vld [vmem:[#allocation2 + $0x92] sm:$0xff] }
 0x209   : > { %v1577_v17 = vadd.f32 %v1541_v18, %v1489_v0  ;;  %1236 = vst.msk [vmem:[%s5236_s14 + $0xe8] sm:$0xff] %vm1206_vm2, %v1185_v54  ;;  %v5673_v44 = vpop.f32.mrf.mxu1  ;;  %v2391_v0 = vld [vmem:[#allocation2 + $0x8a] sm:$0xff]  ;;  %v5733_v18 = vld [vmem:[#allocation2 + $0x101] sm:$0xff] }
 0x20a   : > { %v3144_v34 = vld [vmem:[#allocation2 + $0x83] sm:$0xff] }
 0x20b   : > { %1613 = vst.msk [vmem:[%s5236_s14 + $0xe0] sm:$0xff] %vm1206_vm2, %v1577_v17 }
 0x20c   : > { %4598 = vmatmul.msk.f32.gmra.mxu3 %vm891_vm1, %v5362_v27  ;;  %4652 = vmatmul.msk.f32.gmra.mxu1 %vm891_vm1, %v5679_v22 }
 0x20d   : > { %4674 = vmatmul.msk.f32.gmra.mxu2 %vm891_vm1, %v2389_v45  ;;  %v1426_v24 = vpop.f32.mrf.mxu0  ;;  %v1523_v45 = vld [vmem:[%s5236_s14 + $0x50] sm:$0xff] }
 0x20e   : > { %v1556_v21 = vadd.f32 %v1520_v26, %v1426_v24 }
 0x20f   : > { %v1188_v48 = vpop.f32.mrf.mxu3 }
 0x210   : > { %v1495_v55 = vpop.f32.mrf.mxu2  ;;  %v1542_v33 = vld [vmem:[%s5236_s14 + $0xe8] sm:$0xff]  ;;  %1592 = vst.msk [vmem:[%s5236_s14 + $0x38] sm:$0xff] %vm1206_vm2, %v1556_v21  ;;  %4743 = vmatmul.msk.f32.gmra.mxu0 %vm891_vm1, %v3142_v32 }
 0x211   : > { %v1578_v27 = vadd.f32 %v1542_v33, %v1492_v38  ;;  %1237 = vst.msk [vmem:[%s5236_s14 + $0xf0] sm:$0xff] %vm1206_vm2, %v1188_v48  ;;  %v5691_v36 = vpop.f32.mrf.mxu1  ;;  %v3145_v48 = vld [vmem:[#allocation2 + $0x8b] sm:$0xff]  ;;  %v2393_v33 = vld [vmem:[#allocation2 + $0x9a] sm:$0xff] }
 0x213   : > { %1614 = vst.msk [vmem:[%s5236_s14 + $0xe8] sm:$0xff] %vm1206_vm2, %v1578_v27  ;;  %v5751_v27 = vld [vmem:[#allocation2 + $0x109] sm:$0xff] }
 0x214   : > { %4599 = vmatmul.msk.f32.gmra.mxu3 %vm891_vm1, %v5374_v8  ;;  %4653 = vmatmul.msk.f32.gmra.mxu1 %vm891_vm1, %v5697_v5 }
 0x215   : > { %4675 = vmatmul.msk.f32.gmra.mxu2 %vm891_vm1, %v2390_v39  ;;  %v1429_v40 = vpop.f32.mrf.mxu0 }
 0x216   : > { %v1557_v63 = vadd.f32 %v1521_v61, %v1429_v40  ;;  %v1524_v40 = vld [vmem:[%s5236_s14 + $0x58] sm:$0xff] }
 0x217   : > { %v1191_v47 = vpop.f32.mrf.mxu3 }
 0x218   : > { %v1498_v11 = vpop.f32.mrf.mxu2  ;;  %v1543_v52 = vld [vmem:[%s5236_s14 + $0xf0] sm:$0xff]  ;;  %1593 = vst.msk [vmem:[%s5236_s14 + $0x40] sm:$0xff] %vm1206_vm2, %v1557_v63  ;;  %4744 = vmatmul.msk.f32.gmra.mxu0 %vm891_vm1, %v3143_v51 }
 0x219   : > { %v1579_v8 = vadd.f32 %v1543_v52, %v1495_v55  ;;  %1238 = vst.msk [vmem:[%s5236_s14 + $0xf8] sm:$0xff] %vm1206_vm2, %v1191_v47  ;;  %v5709_v62 = vpop.f32.mrf.mxu1  ;;  %v2394_v52 = vld [vmem:[#allocation2 + $0xa2] sm:$0xff] }
 0x21b   : > { %1615 = vst.msk [vmem:[%s5236_s14 + $0xf0] sm:$0xff] %vm1206_vm2, %v1579_v8 }
 0x21c   : > { %4600 = vmatmul.msk.f32.gmra.mxu3 %vm891_vm1, %v5386_v46  ;;  %4654 = vmatmul.msk.f32.gmra.mxu1 %vm891_vm1, %v5715_v29 }
 0x21d   : > { %4676 = vmatmul.msk.f32.gmra.mxu2 %vm891_vm1, %v2391_v0  ;;  %v1432_v1 = vpop.f32.mrf.mxu0  ;;  %v5771_v0 = vld [vmem:[#allocation2 + $0x111] sm:$0xff] }
 0x21e   : > { %v1558_v3 = vadd.f32 %v1522_v7, %v1432_v1  ;;  %v1525_v7 = vld [vmem:[%s5236_s14 + $0x60] sm:$0xff] }
 0x21f   : > { %v1194_v35 = vpop.f32.mrf.mxu3 }
 0x220   : > { %v1501_v10 = vpop.f32.mrf.mxu2  ;;  %v1544_v54 = vld [vmem:[%s5236_s14 + $0xf8] sm:$0xff]  ;;  %1594 = vst.msk [vmem:[%s5236_s14 + $0x48] sm:$0xff] %vm1206_vm2, %v1558_v3  ;;  %4745 = vmatmul.msk.f32.gmra.mxu0 %vm891_vm1, %v3144_v34 }
 0x221   : > { %v1580_v46 = vadd.f32 %v1544_v54, %v1498_v11  ;;  %1239 = vst.msk [vmem:[%s5236_s14 + $0x100] sm:$0xff] %vm1206_vm2, %v1194_v35  ;;  %v5727_v38 = vpop.f32.mrf.mxu1  ;;  %v3146_v11 = vld [vmem:[#allocation2 + $0x93] sm:$0xff]  ;;  %v3147_v34 = vld [vmem:[#allocation2 + $0x9b] sm:$0xff] }
 0x222   : > { %v5786_v54 = vld [vmem:[#allocation2 + $0x119] sm:$0xff] }
 0x223   : > { %1616 = vst.msk [vmem:[%s5236_s14 + $0xf8] sm:$0xff] %vm1206_vm2, %v1580_v46 }
 0x224   : > { %4601 = vmatmul.msk.f32.gmra.mxu3 %vm891_vm1, %v5398_v53  ;;  %4655 = vmatmul.msk.f32.gmra.mxu1 %vm891_vm1, %v5733_v18 }
 0x225   : > { %4677 = vmatmul.msk.f32.gmra.mxu2 %vm891_vm1, %v2392_v14  ;;  %v1435_v17 = vpop.f32.mrf.mxu0  ;;  %v1526_v14 = vld [vmem:[%s5236_s14 + $0x68] sm:$0xff] }
 0x226   : > { %v1559_v24 = vadd.f32 %v1523_v45, %v1435_v17 }
 0x227   : > { %v1197_v26 = vpop.f32.mrf.mxu3 }
 0x228   : > { %v1504_v21 = vpop.f32.mrf.mxu2  ;;  %v1545_v55 = vld [vmem:[%s5236_s14 + $0x100] sm:$0xff]  ;;  %1595 = vst.msk [vmem:[%s5236_s14 + $0x50] sm:$0xff] %vm1206_vm2, %v1559_v24  ;;  %4746 = vmatmul.msk.f32.gmra.mxu0 %vm891_vm1, %v3145_v48 }
 0x229   : > { %v1581_v53 = vadd.f32 %v1545_v55, %v1501_v10  ;;  %1240 = vst.msk [vmem:[%s5236_s14 + $0x108] sm:$0xff] %vm1206_vm2, %v1197_v26  ;;  %v5745_v32 = vpop.f32.mrf.mxu1  ;;  %v3148_v48 = vld [vmem:[#allocation2 + $0xa3] sm:$0xff]  ;;  %v2396_v55 = vld [vmem:[#allocation2 + $0xb2] sm:$0xff] }
 0x22b   : > { %1617 = vst.msk [vmem:[%s5236_s14 + $0x100] sm:$0xff] %vm1206_vm2, %v1581_v53  ;;  %v5804_v53 = vld [vmem:[#allocation2 + $0x121] sm:$0xff] }
 0x22c   : > { %4602 = vmatmul.msk.f32.gmra.mxu3 %vm891_vm1, %v5410_v42  ;;  %4656 = vmatmul.msk.f32.gmra.mxu1 %vm891_vm1, %v5751_v27 }
 0x22d   : > { %4678 = vmatmul.msk.f32.gmra.mxu2 %vm891_vm1, %v2393_v33  ;;  %v1438_v39 = vpop.f32.mrf.mxu0 }
 0x22e   : > { %v1560_v61 = vadd.f32 %v1524_v40, %v1438_v39 }
 0x22f   : > { %v1200_v63 = vpop.f32.mrf.mxu3 }
 0x230   : > { %v5757_v47 = vpop.f32.mrf.mxu2  ;;  %v1546_v51 = vld [vmem:[%s5236_s14 + $0x108] sm:$0xff]  ;;  %1596 = vst.msk [vmem:[%s5236_s14 + $0x58] sm:$0xff] %vm1206_vm2, %v1560_v61  ;;  %4747 = vmatmul.msk.f32.gmra.mxu0 %vm891_vm1, %v3146_v11 }
 0x231   : > { %v1582_v42 = vadd.f32 %v1546_v51, %v1504_v21  ;;  %1241 = vst.msk [vmem:[%s5236_s14 + $0x110] sm:$0xff] %vm1206_vm2, %v1200_v63  ;;  %v5767_v8 = vpop.f32.mrf.mxu1  ;;  %v3149_v61 = vld [vmem:[#allocation2 + $0xab] sm:$0xff] }
 0x232   : > { %v2033_v51 = vld [vmem:[#allocation2 + $0x129] sm:$0xff] }
 0x233   : > { %1618 = vst.msk [vmem:[%s5236_s14 + $0x108] sm:$0xff] %vm1206_vm2, %v1582_v42 }
 0x234   : > { %4603 = vmatmul.msk.f32.gmra.mxu3 %vm891_vm1, %v5423_v19  ;;  %4657 = vmatmul.msk.f32.gmra.mxu1 %vm891_vm1, %v5771_v0  ;;  %v2395_v19 = vld [vmem:[#allocation2 + $0xaa] sm:$0xff] }
 0x235   : > { %4679 = vmatmul.msk.f32.gmra.mxu2 %vm891_vm1, %v2394_v52  ;;  %v1441_v1 = vpop.f32.mrf.mxu0  ;;  %v1891_v52 = vld [vmem:[%s5236_s14] sm:$0xff] }
 0x236   : > { %v1561_v3 = vadd.f32 %v1525_v7, %v1441_v1  ;;  %v3150_v7 = vld [vmem:[#allocation2 + $0xb3] sm:$0xff] }
 0x237   : > { %v1203_v35 = vpop.f32.mrf.mxu3 }
 0x238   : > { %v5777_v10 = vpop.f32.mrf.mxu2  ;;  %1597 = vst.msk [vmem:[%s5236_s14 + $0x60] sm:$0xff] %vm1206_vm2, %v1561_v3  ;;  %4748 = vmatmul.msk.f32.gmra.mxu0 %vm891_vm1, %v3147_v34  ;;  %v1547_v26 = vld [vmem:[%s5236_s14 + $0x110] sm:$0xff] }
 0x239   : > { %1242 = vst.msk [vmem:[%s5236_s14 + $0x118] sm:$0xff] %vm1206_vm2, %v1203_v35  ;;  %v5792_v17 = vpop.f32.mrf.mxu1  ;;  %v2034_v34 = vld [vmem:[#allocation2 + $0x131] sm:$0xff] }
 0x23c   : > { %4604 = vmatmul.msk.f32.gmra.mxu3 %vm891_vm1, %v5438_v56  ;;  %4658 = vmatmul.msk.f32.gmra.mxu1 %vm891_vm1, %v5786_v54 }
 0x23d   : > { %4680 = vmatmul.msk.f32.gmra.mxu2 %vm891_vm1, %v2395_v19  ;;  %v1444_v46 = vpop.f32.mrf.mxu0 }
 0x23e   : > { %v1562_v45 = vadd.f32 %v1526_v14, %v1444_v46  ;;  %v1892_v46 = vld [vmem:[%s5236_s14 + $0x8] sm:$0xff] }
 0x23f   : > { %v1507_v24 = vpop.f32.mrf.mxu3 }
 0x240   : > { %v5795_v21 = vpop.f32.mrf.mxu2  ;;  %1598 = vst.msk [vmem:[%s5236_s14 + $0x68] sm:$0xff] %vm1206_vm2, %v1562_v45  ;;  %v1583_v56 = vadd.f32 %v1547_v26, %v1507_v24  ;;  %4749 = vmatmul.msk.f32.gmra.mxu0 %vm891_vm1, %v3148_v48  ;;  %v1548_v39 = vld [vmem:[%s5236_s14 + $0x118] sm:$0xff] }
 0x241   : > { %v5812_v63 = vpop.f32.mrf.mxu1  ;;  %v3151_v45 = vld [vmem:[#allocation2 + $0xbb] sm:$0xff] }
 0x242   : > { %1619 = vst.msk [vmem:[%s5236_s14 + $0x110] sm:$0xff] %vm1206_vm2, %v1583_v56 }
 0x244   : > { %4605 = vmatmul.msk.f32.gmra.mxu3 %vm891_vm1, %v5455_v49  ;;  %4659 = vmatmul.msk.f32.gmra.mxu1 %vm891_vm1, %v5804_v53  ;;  %v2397_v49 = vld [vmem:[#allocation2 + $0xba] sm:$0xff] }
 0x245   : > { %4681 = vmatmul.msk.f32.gmra.mxu2 %vm891_vm1, %v2396_v55  ;;  %v3511_v55 = vld [vmem:[#allocation2 + $0x2c] sm:$0xff] }
 0x247   : > { %v1510_v33 = vpop.f32.mrf.mxu3 }
 0x248   : > { %v5810_v40 = vpop.f32.mrf.mxu2  ;;  %v1584_v11 = vadd.f32 %v1548_v39, %v1510_v33  ;;  %4750 = vmatmul.msk.f32.gmra.mxu0 %vm891_vm1, %v3149_v61  ;;  %v3152_v61 = vld [vmem:[#allocation2 + $0xc3] sm:$0xff] }
 0x249   : > { %v5825_v35 = vpop.f32.mrf.mxu1 }
 0x24a   : > { %1620 = vst.msk [vmem:[%s5236_s14 + $0x118] sm:$0xff] %vm1206_vm2, %v1584_v11 }
 0x24c   : > { %4606 = vmatmul.msk.f32.gmra.mxu3 %vm891_vm1, %v5471_v4  ;;  %4660 = vmatmul.msk.f32.gmra.mxu1 %vm891_vm1, %v2033_v51  ;;  %v2398_v4 = vld [vmem:[#allocation2 + $0xc2] sm:$0xff] }
 0x24d   : > { %4682 = vmatmul.msk.f32.gmra.mxu2 %vm891_vm1, %v2397_v49 }
 0x24f   : > { %v1783_v42 = vpop.f32.mrf.mxu3 }
 0x250   : > { %v5822_v1 = vpop.f32.mrf.mxu2  ;;  %v1927_v3 = vadd.f32 %v1891_v52, %v1783_v42  ;;  %4751 = vmatmul.msk.f32.gmra.mxu0 %vm891_vm1, %v3150_v7  ;;  %v3512_v52 = vld [vmem:[#allocation2 + $0x34] sm:$0xff] }
 0x251   : > { %v5843_v56 = vpop.f32.mrf.mxu1 }
 0x252   : > { %1963 = vst.msk [vmem:[%s5236_s14] sm:$0xff] %vm1206_vm2, %v1927_v3 }
 0x254   : > { %4607 = vmatmul.msk.f32.gmra.mxu3 %vm891_vm1, %v5485_v60  ;;  %4661 = vmatmul.msk.f32.gmra.mxu1 %vm891_vm1, %v2034_v34  ;;  %v2399_v60 = vld [vmem:[#allocation2 + $0xca] sm:$0xff] }
 0x255   : > { %4683 = vmatmul.msk.f32.gmra.mxu2 %vm891_vm1, %v2398_v4  ;;  %v1894_v4 = vld [vmem:[%s5236_s14 + $0x18] sm:$0xff] }
 0x257   : > { %v1786_v19 = vpop.f32.mrf.mxu3 }
 0x258   : > { %v5834_v14 = vpop.f32.mrf.mxu2  ;;  %v1928_v24 = vadd.f32 %v1892_v46, %v1786_v19  ;;  %4752 = vmatmul.msk.f32.gmra.mxu0 %vm891_vm1, %v3151_v45  ;;  %v3153_v19 = vld [vmem:[#allocation2 + $0xcb] sm:$0xff] }
 0x259   : > { %v2269_v26 = vld [vmem:[%s5236_s14] sm:$0xff] }
 0x25a   : > { %v2305_v48 = vadd.f32 %v2269_v26, %v5497_v59  ;;  %1964 = vst.msk [vmem:[%s5236_s14 + $0x8] sm:$0xff] %vm1206_vm2, %v1928_v24  ;;  %v1893_v59 = vld [vmem:[%s5236_s14 + $0x10] sm:$0xff]  ;;  %v3513_v26 = vld [vmem:[#allocation2 + $0x3c] sm:$0xff] }
 0x25c   : > { %2341 = vst.msk [vmem:[%s5236_s14] sm:$0xff] %vm1206_vm2, %v2305_v48  ;;  %4608 = vmatmul.msk.f32.gmra.mxu3 %vm891_vm1, %v5504_v37  ;;  %4770 = vmatmul.msk.f32.vlgmr.msra.gmra.mxu1 %vm891_vm1, %v3511_v55  ;;  %v2400_v37 = vld [vmem:[#allocation2 + $0xd2] sm:$0xff] }
 0x25d   : > { %4684 = vmatmul.msk.f32.gmra.mxu2 %vm891_vm1, %v2399_v60  ;;  %v1895_v60 = vld [vmem:[%s5236_s14 + $0x20] sm:$0xff] }
 0x25f   : > { %v1789_v33 = vpop.f32.mrf.mxu3 }
 0x260   : > { %v5850_v39 = vpop.f32.mrf.mxu2  ;;  %v1929_v11 = vadd.f32 %v1893_v59, %v1789_v33  ;;  %4753 = vmatmul.msk.f32.gmra.mxu0 %vm891_vm1, %v3152_v61  ;;  %v3154_v33 = vld [vmem:[#allocation2 + $0xd3] sm:$0xff] }
 0x261   : > { %v2270_v49 = vld [vmem:[%s5236_s14 + $0x8] sm:$0xff] }
 0x262   : > { %v2306_v51 = vadd.f32 %v2270_v49, %v5514_v15  ;;  %1965 = vst.msk [vmem:[%s5236_s14 + $0x10] sm:$0xff] %vm1206_vm2, %v1929_v11  ;;  %v5865_v15 = vpop.f32.mrf.mxu1  ;;  %v5894_v11 = vpop.f32.mrf.mxu0  ;;  %v2402_v49 = vld [vmem:[#allocation2 + $0xe2] sm:$0xff] }
 0x263   : > { %v2647_v42 = vld [vmem:[%s5236_s14] sm:$0xff] }
 0x264   : > { %2342 = vst.msk [vmem:[%s5236_s14 + $0x8] sm:$0xff] %vm1206_vm2, %v2306_v51  ;;  %4609 = vmatmul.msk.f32.gmra.mxu3 %vm891_vm1, %v5518_v31  ;;  %v2683_v7 = vadd.f32 %v2647_v42, %v5757_v47  ;;  %4771 = vmatmul.msk.f32.gmra.mxu1 %vm891_vm1, %v3512_v52  ;;  %v2401_v47 = vld [vmem:[#allocation2 + $0xda] sm:$0xff]  ;;  %v1896_v52 = vld [vmem:[%s5236_s14 + $0x28] sm:$0xff] }
 0x265   : > { %4685 = vmatmul.msk.f32.gmra.mxu2 %vm891_vm1, %v2400_v37  ;;  %v3514_v37 = vld [vmem:[#allocation2 + $0x44] sm:$0xff] }
 0x266   : > { %2719 = vst.msk [vmem:[%s5236_s14] sm:$0xff] %vm1206_vm2, %v2683_v7 }
 0x267   : > { %v1792_v3 = vpop.f32.mrf.mxu3 }
 0x268   : > { %v5870_v34 = vpop.f32.mrf.mxu2  ;;  %v1930_v31 = vadd.f32 %v1894_v4, %v1792_v3  ;;  %4754 = vmatmul.msk.f32.gmra.mxu0 %vm891_vm1, %v3153_v19  ;;  %v3155_v3 = vld [vmem:[#allocation2 + $0xdb] sm:$0xff] }
 0x269   : > { %v2271_v46 = vld [vmem:[%s5236_s14 + $0x10] sm:$0xff] }
 0x26a   : > { %v2307_v45 = vadd.f32 %v2271_v46, %v5529_v9  ;;  %1966 = vst.msk [vmem:[%s5236_s14 + $0x18] sm:$0xff] %vm1206_vm2, %v1930_v31  ;;  %v5890_v59 = vpop.f32.mrf.mxu1  ;;  %v2403_v31 = vld [vmem:[#allocation2 + $0xea] sm:$0xff] }
 0x26b   : > { %v2648_v24 = vld [vmem:[%s5236_s14 + $0x8] sm:$0xff] }
 0x26c   : > { %2343 = vst.msk [vmem:[%s5236_s14 + $0x10] sm:$0xff] %vm1206_vm2, %v2307_v45  ;;  %4610 = vmatmul.msk.f32.gmra.mxu3 %vm891_vm1, %v5536_v12  ;;  %v2684_v48 = vadd.f32 %v2648_v24, %v5777_v10  ;;  %4772 = vmatmul.msk.f32.gmra.mxu1 %vm891_vm1, %v3513_v26  ;;  %v5920_v45 = vpop.f32.mrf.mxu0  ;;  %v1897_v26 = vld [vmem:[%s5236_s14 + $0x30] sm:$0xff] }
 0x26d   : > { %4686 = vmatmul.msk.f32.gmra.mxu2 %vm891_vm1, %v2401_v47  ;;  %v3515_v47 = vld [vmem:[#allocation2 + $0x4c] sm:$0xff] }
 0x26e   : > { %2720 = vst.msk [vmem:[%s5236_s14 + $0x8] sm:$0xff] %vm1206_vm2, %v2684_v48 }
 0x26f   : > { %v1795_v9 = vpop.f32.mrf.mxu3 }
 0x270   : > { %v5888_v55 = vpop.f32.mrf.mxu2  ;;  %v1931_v12 = vadd.f32 %v1895_v60, %v1795_v9  ;;  %4755 = vmatmul.msk.f32.gmra.mxu0 %vm891_vm1, %v3154_v33  ;;  %v3156_v9 = vld [vmem:[#allocation2 + $0xe3] sm:$0xff] }
 0x271   : > { %v2272_v61 = vld [vmem:[%s5236_s14 + $0x18] sm:$0xff] }
 0x272   : > { %v2308_v10 = vadd.f32 %v2272_v61, %v5547_v58  ;;  %1967 = vst.msk [vmem:[%s5236_s14 + $0x20] sm:$0xff] %vm1206_vm2, %v1931_v12  ;;  %v5914_v19 = vpop.f32.mrf.mxu1 }
 0x273   : > { %v2649_v51 = vld [vmem:[%s5236_s14 + $0x10] sm:$0xff] }
 0x274   : > { %2344 = vst.msk [vmem:[%s5236_s14 + $0x18] sm:$0xff] %vm1206_vm2, %v2308_v10  ;;  %4611 = vmatmul.msk.f32.gmra.mxu3 %vm891_vm1, %v5553_v57  ;;  %v2685_v42 = vadd.f32 %v2649_v51, %v5795_v21  ;;  %4773 = vmatmul.msk.f32.gmra.mxu1 %vm891_vm1, %v3514_v37  ;;  %v3516_v10 = vld [vmem:[#allocation2 + $0x54] sm:$0xff] }
 0x275   : > { %4687 = vmatmul.msk.f32.gmra.mxu2 %vm891_vm1, %v2402_v49  ;;  %v5949_v49 = vpop.f32.mrf.mxu0  ;;  %v1898_v37 = vld [vmem:[%s5236_s14 + $0x38] sm:$0xff] }
 0x276   : > { %2721 = vst.msk [vmem:[%s5236_s14 + $0x10] sm:$0xff] %vm1206_vm2, %v2685_v42 }
 0x277   : > { %v1798_v58 = vpop.f32.mrf.mxu3 }
 0x278   : > { %v5910_v7 = vpop.f32.mrf.mxu2  ;;  %v1932_v4 = vadd.f32 %v1896_v52, %v1798_v58  ;;  %4756 = vmatmul.msk.f32.gmra.mxu0 %vm891_vm1, %v3155_v3  ;;  %v3157_v58 = vld [vmem:[#allocation2 + $0xeb] sm:$0xff] }
 0x279   : > { %v2273_v57 = vld [vmem:[%s5236_s14 + $0x20] sm:$0xff] }
 0x27a   : > { %v2309_v21 = vadd.f32 %v2273_v57, %v5567_v20  ;;  %1968 = vst.msk [vmem:[%s5236_s14 + $0x28] sm:$0xff] %vm1206_vm2, %v1932_v4  ;;  %v5940_v61 = vpop.f32.mrf.mxu1  ;;  %v3517_v57 = vld [vmem:[#allocation2 + $0x5c] sm:$0xff] }
 0x27b   : > { %v2650_v46 = vld [vmem:[%s5236_s14 + $0x18] sm:$0xff] }
 0x27c   : > { %2345 = vst.msk [vmem:[%s5236_s14 + $0x20] sm:$0xff] %vm1206_vm2, %v2309_v21  ;;  %4612 = vmatmul.msk.f32.gmra.mxu3 %vm891_vm1, %v5571_v43  ;;  %v2686_v20 = vadd.f32 %v2650_v46, %v5810_v40  ;;  %4774 = vmatmul.msk.f32.gmra.mxu1 %vm891_vm1, %v3515_v47  ;;  %v2404_v40 = vld [vmem:[#allocation2 + $0xf2] sm:$0xff]  ;;  %v1899_v46 = vld [vmem:[%s5236_s14 + $0x40] sm:$0xff] }
 0x27d   : > { %4688 = vmatmul.msk.f32.gmra.mxu2 %vm891_vm1, %v2403_v31 }
 0x27e   : > { %2722 = vst.msk [vmem:[%s5236_s14 + $0x18] sm:$0xff] %vm1206_vm2, %v2686_v20  ;;  %v5976_v20 = vpop.f32.mrf.mxu0 }
 0x27f   : > { %v1801_v24 = vpop.f32.mrf.mxu3 }
 0x280   : > { %v5932_v48 = vpop.f32.mrf.mxu2  ;;  %v1933_v60 = vadd.f32 %v1897_v26, %v1801_v24  ;;  %4757 = vmatmul.msk.f32.gmra.mxu0 %vm891_vm1, %v3156_v9  ;;  %v2406_v9 = vld [vmem:[#allocation2 + $0x102] sm:$0xff] }
 0x281   : > { %v2274_v43 = vld [vmem:[%s5236_s14 + $0x28] sm:$0xff] }
 0x282   : > { %v2310_v33 = vadd.f32 %v2274_v43, %v5583_v25  ;;  %1969 = vst.msk [vmem:[%s5236_s14 + $0x30] sm:$0xff] %vm1206_vm2, %v1933_v60  ;;  %v3518_v43 = vld [vmem:[#allocation2 + $0x64] sm:$0xff] }
 0x283   : > { %v2651_v12 = vld [vmem:[%s5236_s14 + $0x20] sm:$0xff] }
 0x284   : > { %2346 = vst.msk [vmem:[%s5236_s14 + $0x28] sm:$0xff] %vm1206_vm2, %v2310_v33  ;;  %4613 = vmatmul.msk.f32.gmra.mxu3 %vm891_vm1, %v5589_v23  ;;  %v2687_v25 = vadd.f32 %v2651_v12, %v5822_v1  ;;  %4775 = vmatmul.msk.f32.gmra.mxu1 %vm891_vm1, %v3516_v10  ;;  %v2405_v1 = vld [vmem:[#allocation2 + $0xfa] sm:$0xff] }
 0x285   : > { %4689 = vmatmul.msk.f32.gmra.mxu2 %vm891_vm1, %v2404_v40  ;;  %v1900_v40 = vld [vmem:[%s5236_s14 + $0x48] sm:$0xff]  ;;  %v3159_v10 = vld [vmem:[#allocation2 + $0xfb] sm:$0xff] }
 0x286   : > { %2723 = vst.msk [vmem:[%s5236_s14 + $0x20] sm:$0xff] %vm1206_vm2, %v2687_v25 }
 0x287   : > { %v1804_v51 = vpop.f32.mrf.mxu3 }
 0x288   : > { %v5954_v42 = vpop.f32.mrf.mxu2  ;;  %v1934_v23 = vadd.f32 %v1898_v37, %v1804_v51  ;;  %4758 = vmatmul.msk.f32.gmra.mxu0 %vm891_vm1, %v3157_v58  ;;  %v6000_v37 = vpop.f32.mrf.mxu0  ;;  %v2407_v58 = vld [vmem:[#allocation2 + $0x10a] sm:$0xff] }
 0x289   : > { %v2275_v52 = vld [vmem:[%s5236_s14 + $0x30] sm:$0xff] }
 0x28a   : > { %v2311_v3 = vadd.f32 %v2275_v52, %v5601_v13  ;;  %1970 = vst.msk [vmem:[%s5236_s14 + $0x38] sm:$0xff] %vm1206_vm2, %v1934_v23  ;;  %v5969_v13 = vpop.f32.mrf.mxu1  ;;  %v3519_v52 = vld [vmem:[#allocation2 + $0x6c] sm:$0xff] }
 0x28b   : > { %v2652_v4 = vld [vmem:[%s5236_s14 + $0x28] sm:$0xff] }
 0x28c   : > { %2347 = vst.msk [vmem:[%s5236_s14 + $0x30] sm:$0xff] %vm1206_vm2, %v2311_v3  ;;  %4614 = vmatmul.msk.f32.gmra.mxu3 %vm891_vm1, %v5607_v16  ;;  %v2688_v21 = vadd.f32 %v2652_v4, %v5834_v14  ;;  %4776 = vmatmul.msk.f32.gmra.mxu1 %vm891_vm1, %v3517_v57  ;;  %v3158_v16 = vld [vmem:[#allocation2 + $0xf3] sm:$0xff]  ;;  %v3160_v57 = vld [vmem:[#allocation2 + $0x103] sm:$0xff] }
 0x28d   : > { %4690 = vmatmul.msk.f32.gmra.mxu2 %vm891_vm1, %v2405_v1  ;;  %v1901_v1 = vld [vmem:[%s5236_s14 + $0x50] sm:$0xff] }
 0x28e   : > { %2724 = vst.msk [vmem:[%s5236_s14 + $0x28] sm:$0xff] %vm1206_vm2, %v2688_v21 }
 0x28f   : > { %v1807_v31 = vpop.f32.mrf.mxu3 }
 0x290   : > { %v5974_v47 = vpop.f32.mrf.mxu2  ;;  %v1935_v24 = vadd.f32 %v1899_v46, %v1807_v31  ;;  %4759 = vmatmul.msk.f32.gmra.mxu0 %vm891_vm1, %v3158_v16  ;;  %v2408_v46 = vld [vmem:[#allocation2 + $0x112] sm:$0xff] }
 0x291   : > { %v2276_v14 = vld [vmem:[%s5236_s14 + $0x38] sm:$0xff] }
 0x292   : > { %v2312_v26 = vadd.f32 %v2276_v14, %v5619_v28  ;;  %1971 = vst.msk [vmem:[%s5236_s14 + $0x40] sm:$0xff] %vm1206_vm2, %v1935_v24  ;;  %v5996_v25 = vpop.f32.mrf.mxu1  ;;  %v6026_v24 = vpop.f32.mrf.mxu0  ;;  %v3520_v14 = vld [vmem:[#allocation2 + $0x74] sm:$0xff] }
 0x293   : > { %v2653_v60 = vld [vmem:[%s5236_s14 + $0x30] sm:$0xff] }
 0x294   : > { %2348 = vst.msk [vmem:[%s5236_s14 + $0x38] sm:$0xff] %vm1206_vm2, %v2312_v26  ;;  %4615 = vmatmul.msk.f32.gmra.mxu3 %vm891_vm1, %v5625_v30  ;;  %v2689_v33 = vadd.f32 %v2653_v60, %v5850_v39  ;;  %4777 = vmatmul.msk.f32.gmra.mxu1 %vm891_vm1, %v3518_v43  ;;  %v3161_v43 = vld [vmem:[#allocation2 + $0x10b] sm:$0xff] }
 0x295   : > { %4691 = vmatmul.msk.f32.gmra.mxu2 %vm891_vm1, %v2406_v9  ;;  %v1902_v9 = vld [vmem:[%s5236_s14 + $0x58] sm:$0xff] }
 0x296   : > { %2725 = vst.msk [vmem:[%s5236_s14 + $0x30] sm:$0xff] %vm1206_vm2, %v2689_v33 }
 0x297   : > { %v1810_v28 = vpop.f32.mrf.mxu3 }
 0x298   : > { %v5994_v12 = vpop.f32.mrf.mxu2  ;;  %v1936_v30 = vadd.f32 %v1900_v40, %v1810_v28  ;;  %4760 = vmatmul.msk.f32.gmra.mxu0 %vm891_vm1, %v3159_v10 }
 0x299   : > { %v2277_v51 = vld [vmem:[%s5236_s14 + $0x40] sm:$0xff] }
 0x29a   : > { %v2313_v39 = vadd.f32 %v2277_v51, %v5637_v41  ;;  %1972 = vst.msk [vmem:[%s5236_s14 + $0x48] sm:$0xff] %vm1206_vm2, %v1936_v30  ;;  %v6020_v31 = vpop.f32.mrf.mxu1  ;;  %v3521_v30 = vld [vmem:[#allocation2 + $0x7c] sm:$0xff]  ;;  %v6055_v51 = vpop.f32.mrf.mxu0 }
 0x29b   : > { %v2654_v23 = vld [vmem:[%s5236_s14 + $0x38] sm:$0xff] }
 0x29c   : > { %2349 = vst.msk [vmem:[%s5236_s14 + $0x40] sm:$0xff] %vm1206_vm2, %v2313_v39  ;;  %4616 = vmatmul.msk.f32.gmra.mxu3 %vm891_vm1, %v5643_v50  ;;  %v2690_v3 = vadd.f32 %v2654_v23, %v5870_v34  ;;  %4778 = vmatmul.msk.f32.gmra.mxu1 %vm891_vm1, %v3519_v52  ;;  %v3162_v52 = vld [vmem:[#allocation2 + $0x113] sm:$0xff] }
 0x29d   : > { %4692 = vmatmul.msk.f32.gmra.mxu2 %vm891_vm1, %v2407_v58  ;;  %v1903_v58 = vld [vmem:[%s5236_s14 + $0x60] sm:$0xff] }
 0x29e   : > { %2726 = vst.msk [vmem:[%s5236_s14 + $0x38] sm:$0xff] %vm1206_vm2, %v2690_v3 }
 0x29f   : > { %v1813_v41 = vpop.f32.mrf.mxu3 }
 0x2a0   : > { %v6016_v4 = vpop.f32.mrf.mxu2  ;;  %v1937_v21 = vadd.f32 %v1901_v1, %v1813_v41  ;;  %4761 = vmatmul.msk.f32.gmra.mxu0 %vm891_vm1, %v3160_v57  ;;  %v3522_v57 = vld [vmem:[#allocation2 + $0x84] sm:$0xff] }
 0x2a1   : > { %v2278_v50 = vld [vmem:[%s5236_s14 + $0x48] sm:$0xff] }
 0x2a2   : > { %v2314_v34 = vadd.f32 %v2278_v50, %v5655_v2  ;;  %1973 = vst.msk [vmem:[%s5236_s14 + $0x50] sm:$0xff] %vm1206_vm2, %v1937_v21  ;;  %v6046_v10 = vpop.f32.mrf.mxu1 }
 0x2a3   : > { %v2655_v16 = vld [vmem:[%s5236_s14 + $0x40] sm:$0xff] }
 0x2a4   : > { %2350 = vst.msk [vmem:[%s5236_s14 + $0x48] sm:$0xff] %vm1206_vm2, %v2314_v34  ;;  %4617 = vmatmul.msk.f32.gmra.mxu3 %vm891_vm1, %v5661_v6  ;;  %v2691_v2 = vadd.f32 %v2655_v16, %v5888_v55  ;;  %4779 = vmatmul.msk.f32.gmra.mxu1 %vm891_vm1, %v3520_v14  ;;  %v2409_v55 = vld [vmem:[#allocation2 + $0x11a] sm:$0xff]  ;;  %v1904_v34 = vld [vmem:[%s5236_s14 + $0x68] sm:$0xff]  ;;  %v6082_v16 = vpop.f32.mrf.mxu0 }
 0x2a5   : > { %4693 = vmatmul.msk.f32.gmra.mxu2 %vm891_vm1, %v2408_v46 }
 0x2a6   : > { %2727 = vst.msk [vmem:[%s5236_s14 + $0x40] sm:$0xff] %vm1206_vm2, %v2691_v2 }
 0x2a7   : > { %v1816_v26 = vpop.f32.mrf.mxu3 }
 0x2a8   : > { %v6038_v60 = vpop.f32.mrf.mxu2  ;;  %v1938_v33 = vadd.f32 %v1902_v9, %v1816_v26  ;;  %4762 = vmatmul.msk.f32.gmra.mxu0 %vm891_vm1, %v3161_v43  ;;  %v2411_v26 = vld [vmem:[#allocation2 + $0x12a] sm:$0xff] }
 0x2a9   : > { %v2279_v6 = vld [vmem:[%s5236_s14 + $0x50] sm:$0xff] }
 0x2aa   : > { %v2315_v28 = vadd.f32 %v2279_v6, %v5673_v44  ;;  %1974 = vst.msk [vmem:[%s5236_s14 + $0x58] sm:$0xff] %vm1206_vm2, %v1938_v33  ;;  %v3523_v43 = vld [vmem:[#allocation2 + $0x8c] sm:$0xff] }
 0x2ab   : > { %v2656_v40 = vld [vmem:[%s5236_s14 + $0x48] sm:$0xff]  ;;  %v1905_v6 = vld [vmem:[%s5236_s14 + $0x70] sm:$0xff] }
 0x2ac   : > { %2351 = vst.msk [vmem:[%s5236_s14 + $0x50] sm:$0xff] %vm1206_vm2, %v2315_v28  ;;  %4618 = vmatmul.msk.f32.gmra.mxu3 %vm891_vm1, %v5679_v22  ;;  %v2692_v44 = vadd.f32 %v2656_v40, %v5910_v7  ;;  %4780 = vmatmul.msk.f32.gmra.mxu1 %vm891_vm1, %v3521_v30  ;;  %v2410_v7 = vld [vmem:[#allocation2 + $0x122] sm:$0xff] }
 0x2ad   : > { %4694 = vmatmul.msk.f32.gmra.mxu2 %vm891_vm1, %v2409_v55  ;;  %v3164_v55 = vld [vmem:[#allocation2 + $0x123] sm:$0xff] }
 0x2ae   : > { %2728 = vst.msk [vmem:[%s5236_s14 + $0x48] sm:$0xff] %vm1206_vm2, %v2692_v44  ;;  %v6106_v44 = vpop.f32.mrf.mxu0 }
 0x2af   : > { %v1819_v39 = vpop.f32.mrf.mxu3 }
 0x2b0   : > { %v6060_v23 = vpop.f32.mrf.mxu2  ;;  %v1939_v22 = vadd.f32 %v1903_v58, %v1819_v39  ;;  %4763 = vmatmul.msk.f32.gmra.mxu0 %vm891_vm1, %v3162_v52  ;;  %v2412_v39 = vld [vmem:[#allocation2 + $0x132] sm:$0xff] }
 0x2b1   : > { %v2280_v3 = vld [vmem:[%s5236_s14 + $0x58] sm:$0xff] }
 0x2b2   : > { %v2316_v41 = vadd.f32 %v2280_v3, %v5691_v36  ;;  %1975 = vst.msk [vmem:[%s5236_s14 + $0x60] sm:$0xff] %vm1206_vm2, %v1939_v22  ;;  %v6075_v36 = vpop.f32.mrf.mxu1  ;;  %v3524_v52 = vld [vmem:[#allocation2 + $0x94] sm:$0xff] }
 0x2b3   : > { %v2657_v1 = vld [vmem:[%s5236_s14 + $0x50] sm:$0xff]  ;;  %v1906_v3 = vld [vmem:[%s5236_s14 + $0x78] sm:$0xff] }
 0x2b4   : > { %2352 = vst.msk [vmem:[%s5236_s14 + $0x58] sm:$0xff] %vm1206_vm2, %v2316_v41  ;;  %4619 = vmatmul.msk.f32.gmra.mxu3 %vm891_vm1, %v5697_v5  ;;  %v2693_v21 = vadd.f32 %v2657_v1, %v5932_v48  ;;  %4781 = vmatmul.msk.f32.gmra.mxu1 %vm891_vm1, %v3522_v57  ;;  %v3163_v5 = vld [vmem:[#allocation2 + $0x11b] sm:$0xff] }
 0x2b5   : > { %4695 = vmatmul.msk.f32.gmra.mxu2 %vm891_vm1, %v2410_v7  ;;  %v3165_v7 = vld [vmem:[#allocation2 + $0x12b] sm:$0xff] }
 0x2b6   : > { %2729 = vst.msk [vmem:[%s5236_s14 + $0x50] sm:$0xff] %vm1206_vm2, %v2693_v21  ;;  %v3889_v21 = vld [vmem:[#allocation2 + $0x2d] sm:$0xff] }
 0x2b7   : > { %v1822_v50 = vpop.f32.mrf.mxu3 }
 0x2b8   : > { %v6080_v46 = vpop.f32.mrf.mxu2  ;;  %v1940_v14 = vadd.f32 %v1904_v34, %v1822_v50  ;;  %4764 = vmatmul.msk.f32.gmra.mxu0 %vm891_vm1, %v3163_v5  ;;  %v6132_v34 = vpop.f32.mrf.mxu0  ;;  %v3525_v5 = vld [vmem:[#allocation2 + $0x9c] sm:$0xff] }
 0x2b9   : > { %v2281_v48 = vld [vmem:[%s5236_s14 + $0x60] sm:$0xff] }
 0x2ba   : > { %v2317_v2 = vadd.f32 %v2281_v48, %v5709_v62  ;;  %1976 = vst.msk [vmem:[%s5236_s14 + $0x68] sm:$0xff] %vm1206_vm2, %v1940_v14  ;;  %v6102_v40 = vpop.f32.mrf.mxu1  ;;  %v1907_v48 = vld [vmem:[%s5236_s14 + $0x80] sm:$0xff] }
 0x2bb   : > { %v2658_v9 = vld [vmem:[%s5236_s14 + $0x58] sm:$0xff] }
 0x2bc   : > { %2353 = vst.msk [vmem:[%s5236_s14 + $0x60] sm:$0xff] %vm1206_vm2, %v2317_v2  ;;  %4620 = vmatmul.msk.f32.gmra.mxu3 %vm891_vm1, %v5715_v29  ;;  %v2694_v33 = vadd.f32 %v2658_v9, %v5954_v42  ;;  %4782 = vmatmul.msk.f32.gmra.mxu1 %vm891_vm1, %v3523_v43 }
 0x2bd   : > { %4696 = vmatmul.msk.f32.gmra.mxu2 %vm891_vm1, %v2411_v26  ;;  %v3166_v26 = vld [vmem:[#allocation2 + $0x133] sm:$0xff] }
 0x2be   : > { %2730 = vst.msk [vmem:[%s5236_s14 + $0x58] sm:$0xff] %vm1206_vm2, %v2694_v33 }
 0x2bf   : > { %v1825_v62 = vpop.f32.mrf.mxu3 }
 0x2c0   : > { %v6100_v28 = vpop.f32.mrf.mxu2  ;;  %v1941_v29 = vadd.f32 %v1905_v6, %v1825_v62  ;;  %4765 = vmatmul.msk.f32.gmra.mxu0 %vm891_vm1, %v3164_v55  ;;  %v3526_v6 = vld [vmem:[#allocation2 + $0xa4] sm:$0xff]  ;;  %v6161_v55 = vpop.f32.mrf.mxu0 }
 0x2c1   : > { %v2282_v30 = vld [vmem:[%s5236_s14 + $0x68] sm:$0xff] }
 0x2c2   : > { %v2318_v42 = vadd.f32 %v2282_v30, %v5727_v38  ;;  %1977 = vst.msk [vmem:[%s5236_s14 + $0x70] sm:$0xff] %vm1206_vm2, %v1941_v29  ;;  %v6126_v57 = vpop.f32.mrf.mxu1  ;;  %v1908_v30 = vld [vmem:[%s5236_s14 + $0x88] sm:$0xff] }
 0x2c3   : > { %v2659_v58 = vld [vmem:[%s5236_s14 + $0x60] sm:$0xff] }
 0x2c4   : > { %2354 = vst.msk [vmem:[%s5236_s14 + $0x68] sm:$0xff] %vm1206_vm2, %v2318_v42  ;;  %4621 = vmatmul.msk.f32.gmra.mxu3 %vm891_vm1, %v5733_v18  ;;  %v2695_v22 = vadd.f32 %v2659_v58, %v5974_v47  ;;  %4783 = vmatmul.msk.f32.gmra.mxu1 %vm891_vm1, %v3524_v52 }
 0x2c5   : > { %4697 = vmatmul.msk.f32.gmra.mxu2 %vm891_vm1, %v2412_v39  ;;  %v3167_v39 = vld [vmem:[#allocation2 + $0x13b] sm:$0xff] }
 0x2c6   : > { %2731 = vst.msk [vmem:[%s5236_s14 + $0x60] sm:$0xff] %vm1206_vm2, %v2695_v22 }
 0x2c7   : > { %v1828_v38 = vpop.f32.mrf.mxu3 }
 0x2c8   : > { %v6122_v41 = vpop.f32.mrf.mxu2  ;;  %v1942_v1 = vadd.f32 %v1906_v3, %v1828_v38  ;;  %4766 = vmatmul.msk.f32.gmra.mxu0 %vm891_vm1, %v3165_v7  ;;  %v3527_v38 = vld [vmem:[#allocation2 + $0xac] sm:$0xff] }
 0x2c9   : > { %v2283_v18 = vld [vmem:[%s5236_s14 + $0x70] sm:$0xff] }
 0x2ca   : > { %v2319_v47 = vadd.f32 %v2283_v18, %v5745_v32  ;;  %1978 = vst.msk [vmem:[%s5236_s14 + $0x78] sm:$0xff] %vm1206_vm2, %v1942_v1  ;;  %v6152_v62 = vpop.f32.mrf.mxu1  ;;  %v1909_v1 = vld [vmem:[%s5236_s14 + $0x90] sm:$0xff] }
 0x2cb   : > { %v2660_v50 = vld [vmem:[%s5236_s14 + $0x68] sm:$0xff] }
 0x2cc   : > { %2355 = vst.msk [vmem:[%s5236_s14 + $0x70] sm:$0xff] %vm1206_vm2, %v2319_v47  ;;  %4622 = vmatmul.msk.f32.gmra.mxu3 %vm891_vm1, %v5751_v27  ;;  %v2696_v32 = vadd.f32 %v2660_v50, %v5994_v12  ;;  %4784 = vmatmul.msk.f32.gmra.mxu1 %vm891_vm1, %v3525_v5  ;;  %v3890_v12 = vld [vmem:[#allocation2 + $0x35] sm:$0xff]  ;;  %v6188_v47 = vpop.f32.mrf.mxu0  ;;  %v3892_v5 = vld [vmem:[#allocation2 + $0x45] sm:$0xff] }
 0x2cd   : > { %4806 = vmatmul.msk.f32.vlgmr.msra.gmra.mxu2 %vm891_vm1, %v3889_v21 }
 0x2ce   : > { %2732 = vst.msk [vmem:[%s5236_s14 + $0x68] sm:$0xff] %vm1206_vm2, %v2696_v32 }
 0x2cf   : > { %v1831_v14 = vpop.f32.mrf.mxu3 }
 0x2d0   : > { %v6144_v2 = vpop.f32.mrf.mxu2  ;;  %v1943_v9 = vadd.f32 %v1907_v48, %v1831_v14  ;;  %4767 = vmatmul.msk.f32.gmra.mxu0 %vm891_vm1, %v3166_v26  ;;  %v3528_v14 = vld [vmem:[#allocation2 + $0xb4] sm:$0xff] }
 0x2d1   : > { %v2284_v27 = vld [vmem:[%s5236_s14 + $0x78] sm:$0xff] }
 0x2d2   : > { %v2320_v43 = vadd.f32 %v2284_v27, %v5767_v8  ;;  %1979 = vst.msk [vmem:[%s5236_s14 + $0x80] sm:$0xff] %vm1206_vm2, %v1943_v9  ;;  %v1910_v26 = vld [vmem:[%s5236_s14 + $0x98] sm:$0xff] }
 0x2d3   : > { %v2661_v33 = vld [vmem:[%s5236_s14 + $0x70] sm:$0xff] }
 0x2d4   : > { %2356 = vst.msk [vmem:[%s5236_s14 + $0x78] sm:$0xff] %vm1206_vm2, %v2320_v43  ;;  %4623 = vmatmul.msk.f32.gmra.mxu3 %vm891_vm1, %v5771_v0  ;;  %v2697_v8 = vadd.f32 %v2661_v33, %v6016_v4  ;;  %4785 = vmatmul.msk.f32.gmra.mxu1 %vm891_vm1, %v3526_v6  ;;  %v3891_v4 = vld [vmem:[#allocation2 + $0x3d] sm:$0xff]  ;;  %v3893_v33 = vld [vmem:[#allocation2 + $0x4d] sm:$0xff] }
 0x2d5   : > { %4807 = vmatmul.msk.f32.gmra.mxu2 %vm891_vm1, %v3890_v12 }
 0x2d6   : > { %2733 = vst.msk [vmem:[%s5236_s14 + $0x70] sm:$0xff] %vm1206_vm2, %v2697_v8  ;;  %v3529_v8 = vld [vmem:[#allocation2 + $0xbc] sm:$0xff] }
 0x2d7   : > { %v1834_v29 = vpop.f32.mrf.mxu3 }
 0x2d8   : > { %v6166_v42 = vpop.f32.mrf.mxu2  ;;  %v1944_v0 = vadd.f32 %v1908_v30, %v1834_v29  ;;  %4768 = vmatmul.msk.f32.gmra.mxu0 %vm891_vm1, %v3167_v39  ;;  %v1911_v30 = vld [vmem:[%s5236_s14 + $0xa0] sm:$0xff] }
 0x2d9   : > { %v2285_v58 = vld [vmem:[%s5236_s14 + $0x80] sm:$0xff] }
 0x2da   : > { %v2321_v52 = vadd.f32 %v2285_v58, %v5792_v17  ;;  %1980 = vst.msk [vmem:[%s5236_s14 + $0x88] sm:$0xff] %vm1206_vm2, %v1944_v0  ;;  %v6181_v17 = vpop.f32.mrf.mxu1 }
 0x2db   : > { %v2662_v22 = vld [vmem:[%s5236_s14 + $0x78] sm:$0xff] }
 0x2dc   : > { %2357 = vst.msk [vmem:[%s5236_s14 + $0x80] sm:$0xff] %vm1206_vm2, %v2321_v52  ;;  %4624 = vmatmul.msk.f32.gmra.mxu3 %vm891_vm1, %v5786_v54  ;;  %v2698_v3 = vadd.f32 %v2662_v22, %v6038_v60  ;;  %4786 = vmatmul.msk.f32.gmra.mxu1 %vm891_vm1, %v3527_v38  ;;  %v3168_v54 = vld [vmem:[#allocation2 + $0x143] sm:$0xff]  ;;  %v3894_v22 = vld [vmem:[#allocation2 + $0x55] sm:$0xff] }
 0x2dd   : > { %4808 = vmatmul.msk.f32.gmra.mxu2 %vm891_vm1, %v3891_v4 }
 0x2de   : > { %2734 = vst.msk [vmem:[%s5236_s14 + $0x78] sm:$0xff] %vm1206_vm2, %v2698_v3  ;;  %v3530_v3 = vld [vmem:[#allocation2 + $0xc4] sm:$0xff] }
 0x2df   : > { %v1837_v7 = vpop.f32.mrf.mxu3 }
 0x2e0   : > { %v6186_v18 = vpop.f32.mrf.mxu2  ;;  %v1945_v21 = vadd.f32 %v1909_v1, %v1837_v7  ;;  %4769 = vmatmul.msk.f32.gmra.mxu0 %vm891_vm1, %v3168_v54  ;;  %v1912_v1 = vld [vmem:[%s5236_s14 + $0xa8] sm:$0xff] }
 0x2e1   : > { %v2286_v60 = vld [vmem:[%s5236_s14 + $0x88] sm:$0xff] }
 0x2e2   : > { %v2322_v50 = vadd.f32 %v2286_v60, %v5812_v63  ;;  %1981 = vst.msk [vmem:[%s5236_s14 + $0x90] sm:$0xff] %vm1206_vm2, %v1945_v21  ;;  %v6208_v27 = vpop.f32.mrf.mxu1 }
 0x2e3   : > { %v2663_v32 = vld [vmem:[%s5236_s14 + $0x80] sm:$0xff] }
 0x2e4   : > { %2358 = vst.msk [vmem:[%s5236_s14 + $0x88] sm:$0xff] %vm1206_vm2, %v2322_v50  ;;  %4625 = vmatmul.msk.f32.gmra.mxu3 %vm891_vm1, %v5804_v53  ;;  %v2699_v48 = vadd.f32 %v2663_v32, %v6060_v23  ;;  %4787 = vmatmul.msk.f32.gmra.mxu1 %vm891_vm1, %v3528_v14  ;;  %v2755_v23 = vld [vmem:[#allocation2 + $0x1b] sm:$0xff] }
 0x2e5   : > { %4809 = vmatmul.msk.f32.gmra.mxu2 %vm891_vm1, %v3892_v5  ;;  %v2757_v5 = vld [vmem:[#allocation2 + $0x2b] sm:$0xff]  ;;  %v3895_v32 = vld [vmem:[#allocation2 + $0x5d] sm:$0xff] }
 0x2e6   : > { %2735 = vst.msk [vmem:[%s5236_s14 + $0x80] sm:$0xff] %vm1206_vm2, %v2699_v48  ;;  %v3531_v48 = vld [vmem:[#allocation2 + $0xcc] sm:$0xff] }
 0x2e7   : > { %v1840_v63 = vpop.f32.mrf.mxu3 }
 0x2e8   : > { %v6206_v9 = vpop.f32.mrf.mxu2  ;;  %v1946_v53 = vadd.f32 %v1910_v26, %v1840_v63  ;;  %v1913_v26 = vld [vmem:[%s5236_s14 + $0xb0] sm:$0xff] }
 0x2e9   : > { %v2287_v43 = vld [vmem:[%s5236_s14 + $0x90] sm:$0xff] }
 0x2ea   : > { %v2323_v12 = vadd.f32 %v2287_v43, %v5825_v35  ;;  %1982 = vst.msk [vmem:[%s5236_s14 + $0x98] sm:$0xff] %vm1206_vm2, %v1946_v53  ;;  %v6227_v52 = vpop.f32.mrf.mxu1 }
 0x2eb   : > { %v2664_v6 = vld [vmem:[%s5236_s14 + $0x88] sm:$0xff] }
 0x2ec   : > { %2359 = vst.msk [vmem:[%s5236_s14 + $0x90] sm:$0xff] %vm1206_vm2, %v2323_v12  ;;  %4698 = vmatmul.msk.f32.vlgmr.msrb.gmra.mxu3 %vm891_vm1, %v2755_v23  ;;  %v2700_v29 = vadd.f32 %v2664_v6, %v6080_v46  ;;  %4788 = vmatmul.msk.f32.gmra.mxu1 %vm891_vm1, %v3529_v8  ;;  %v2756_v46 = vld [vmem:[#allocation2 + $0x23] sm:$0xff]  ;;  %v3532_v8 = vld [vmem:[#allocation2 + $0xd4] sm:$0xff] }
 0x2ed   : > { %4810 = vmatmul.msk.f32.gmra.mxu2 %vm891_vm1, %v3893_v33  ;;  %v2758_v33 = vld [vmem:[#allocation2 + $0x33] sm:$0xff]  ;;  %v3896_v6 = vld [vmem:[#allocation2 + $0x65] sm:$0xff] }
 0x2ee   : > { %2736 = vst.msk [vmem:[%s5236_s14 + $0x88] sm:$0xff] %vm1206_vm2, %v2700_v29 }
 0x2ef   : > { %v1843_v35 = vpop.f32.mrf.mxu3 }
 0x2f0   : > { %v6224_v39 = vpop.f32.mrf.mxu2  ;;  %v1947_v0 = vadd.f32 %v1911_v30, %v1843_v35  ;;  %v1914_v30 = vld [vmem:[%s5236_s14 + $0xb8] sm:$0xff] }
 0x2f1   : > { %v2288_v58 = vld [vmem:[%s5236_s14 + $0x98] sm:$0xff] }
 0x2f2   : > { %v2324_v4 = vadd.f32 %v2288_v58, %v5843_v56  ;;  %1983 = vst.msk [vmem:[%s5236_s14 + $0xa0] sm:$0xff] %vm1206_vm2, %v1947_v0  ;;  %v6249_v14 = vpop.f32.mrf.mxu1 }
 0x2f3   : > { %v2665_v38 = vld [vmem:[%s5236_s14 + $0x90] sm:$0xff] }
 0x2f4   : > { %2360 = vst.msk [vmem:[%s5236_s14 + $0x98] sm:$0xff] %vm1206_vm2, %v2324_v4  ;;  %4699 = vmatmul.msk.f32.gmra.mxu3 %vm891_vm1, %v2756_v46  ;;  %v2701_v7 = vadd.f32 %v2665_v38, %v6100_v28  ;;  %4789 = vmatmul.msk.f32.gmra.mxu1 %vm891_vm1, %v3530_v3  ;;  %v3533_v3 = vld [vmem:[#allocation2 + $0xdc] sm:$0xff] }
 0x2f5   : > { %4811 = vmatmul.msk.f32.gmra.mxu2 %vm891_vm1, %v3894_v22  ;;  %v3897_v22 = vld [vmem:[#allocation2 + $0x6d] sm:$0xff] }
 0x2f6   : > { %2737 = vst.msk [vmem:[%s5236_s14 + $0x90] sm:$0xff] %vm1206_vm2, %v2701_v7 }
 0x2f7   : > { %v1846_v56 = vpop.f32.mrf.mxu3 }
 0x2f8   : > { %v6242_v54 = vpop.f32.mrf.mxu2  ;;  %v1948_v21 = vadd.f32 %v1912_v1, %v1846_v56  ;;  %v1915_v56 = vld [vmem:[%s5236_s14 + $0xc0] sm:$0xff] }
 0x2f9   : > { %v2289_v60 = vld [vmem:[%s5236_s14 + $0xa0] sm:$0xff] }
 0x2fa   : > { %v2325_v50 = vadd.f32 %v2289_v60, %v5865_v15  ;;  %1984 = vst.msk [vmem:[%s5236_s14 + $0xa8] sm:$0xff] %vm1206_vm2, %v1948_v21 }
 0x2fb   : > { %v2666_v28 = vld [vmem:[%s5236_s14 + $0x98] sm:$0xff] }
 0x2fc   : > { %2361 = vst.msk [vmem:[%s5236_s14 + $0xa0] sm:$0xff] %vm1206_vm2, %v2325_v50  ;;  %4700 = vmatmul.msk.f32.gmra.mxu3 %vm891_vm1, %v2757_v5  ;;  %v2702_v15 = vadd.f32 %v2666_v28, %v6122_v41  ;;  %4790 = vmatmul.msk.f32.gmra.mxu1 %vm891_vm1, %v3531_v48  ;;  %v3534_v48 = vld [vmem:[#allocation2 + $0xe4] sm:$0xff] }
 0x2fd   : > { %4812 = vmatmul.msk.f32.gmra.mxu2 %vm891_vm1, %v3895_v32  ;;  %v3898_v32 = vld [vmem:[#allocation2 + $0x75] sm:$0xff] }
 0x2fe   : > { %2738 = vst.msk [vmem:[%s5236_s14 + $0x98] sm:$0xff] %vm1206_vm2, %v2702_v15 }
 0x2ff   : > { %v1849_v63 = vpop.f32.mrf.mxu3 }
 0x300   : > { %v6260_v53 = vpop.f32.mrf.mxu2  ;;  %v1949_v43 = vadd.f32 %v1913_v26, %v1849_v63  ;;  %v1916_v63 = vld [vmem:[%s5236_s14 + $0xc8] sm:$0xff] }
 0x301   : > { %v2290_v12 = vld [vmem:[%s5236_s14 + $0xa8] sm:$0xff] }
 0x302   : > { %v2326_v23 = vadd.f32 %v2290_v12, %v5890_v59  ;;  %1985 = vst.msk [vmem:[%s5236_s14 + $0xb0] sm:$0xff] %vm1206_vm2, %v1949_v43  ;;  %v6273_v59 = vpop.f32.mrf.mxu1 }
 0x303   : > { %v2667_v41 = vld [vmem:[%s5236_s14 + $0xa0] sm:$0xff] }
 0x304   : > { %2362 = vst.msk [vmem:[%s5236_s14 + $0xa8] sm:$0xff] %vm1206_vm2, %v2326_v23  ;;  %4701 = vmatmul.msk.f32.gmra.mxu3 %vm891_vm1, %v2758_v33  ;;  %v2703_v29 = vadd.f32 %v2667_v41, %v6144_v2  ;;  %4791 = vmatmul.msk.f32.gmra.mxu1 %vm891_vm1, %v3532_v8  ;;  %v2759_v2 = vld [vmem:[#allocation2 + $0x3b] sm:$0xff]  ;;  %v3535_v8 = vld [vmem:[#allocation2 + $0xec] sm:$0xff] }
 0x305   : > { %4813 = vmatmul.msk.f32.gmra.mxu2 %vm891_vm1, %v3896_v6  ;;  %v3899_v6 = vld [vmem:[#allocation2 + $0x7d] sm:$0xff] }
 0x306   : > { %2739 = vst.msk [vmem:[%s5236_s14 + $0xa0] sm:$0xff] %vm1206_vm2, %v2703_v29 }
 0x307   : > { %v1852_v35 = vpop.f32.mrf.mxu3 }
 0x308   : > { %v6278_v0 = vpop.f32.mrf.mxu2  ;;  %v1950_v58 = vadd.f32 %v1914_v30, %v1852_v35  ;;  %v1917_v35 = vld [vmem:[%s5236_s14 + $0xd0] sm:$0xff] }
 0x309   : > { %v2291_v4 = vld [vmem:[%s5236_s14 + $0xb0] sm:$0xff] }
 0x30a   : > { %v2327_v46 = vadd.f32 %v2291_v4, %v5914_v19  ;;  %1986 = vst.msk [vmem:[%s5236_s14 + $0xb8] sm:$0xff] %vm1206_vm2, %v1950_v58  ;;  %v6296_v21 = vpop.f32.mrf.mxu1 }
 0x30b   : > { %v2668_v38 = vld [vmem:[%s5236_s14 + $0xa8] sm:$0xff] }
 0x30c   : > { %2363 = vst.msk [vmem:[%s5236_s14 + $0xb0] sm:$0xff] %vm1206_vm2, %v2327_v46  ;;  %4702 = vmatmul.msk.f32.gmra.mxu3 %vm891_vm1, %v2759_v2  ;;  %v2704_v7 = vadd.f32 %v2668_v38, %v6166_v42  ;;  %4792 = vmatmul.msk.f32.gmra.mxu1 %vm891_vm1, %v3533_v3  ;;  %v2760_v42 = vld [vmem:[#allocation2 + $0x43] sm:$0xff]  ;;  %v2762_v2 = vld [vmem:[#allocation2 + $0x53] sm:$0xff] }
 0x30d   : > { %4814 = vmatmul.msk.f32.gmra.mxu2 %vm891_vm1, %v3897_v22  ;;  %v3900_v22 = vld [vmem:[#allocation2 + $0x85] sm:$0xff]  ;;  %v3536_v3 = vld [vmem:[#allocation2 + $0xf4] sm:$0xff] }
 0x30e   : > { %2740 = vst.msk [vmem:[%s5236_s14 + $0xa8] sm:$0xff] %vm1206_vm2, %v2704_v7 }
 0x30f   : > { %v1855_v19 = vpop.f32.mrf.mxu3 }
 0x310   : > { %v6294_v1 = vpop.f32.mrf.mxu2  ;;  %v1951_v60 = vadd.f32 %v1915_v56, %v1855_v19  ;;  %v1918_v19 = vld [vmem:[%s5236_s14 + $0xd8] sm:$0xff] }
 0x311   : > { %v2292_v50 = vld [vmem:[%s5236_s14 + $0xb8] sm:$0xff] }
 0x312   : > { %v2328_v5 = vadd.f32 %v2292_v50, %v5940_v61  ;;  %1987 = vst.msk [vmem:[%s5236_s14 + $0xc0] sm:$0xff] %vm1206_vm2, %v1951_v60  ;;  %v6315_v23 = vpop.f32.mrf.mxu1 }
 0x313   : > { %v2669_v28 = vld [vmem:[%s5236_s14 + $0xb0] sm:$0xff] }
 0x314   : > { %2364 = vst.msk [vmem:[%s5236_s14 + $0xb8] sm:$0xff] %vm1206_vm2, %v2328_v5  ;;  %4703 = vmatmul.msk.f32.gmra.mxu3 %vm891_vm1, %v2760_v42  ;;  %v2705_v15 = vadd.f32 %v2669_v28, %v6186_v18  ;;  %4793 = vmatmul.msk.f32.gmra.mxu1 %vm891_vm1, %v3534_v48  ;;  %v2761_v18 = vld [vmem:[#allocation2 + $0x4b] sm:$0xff]  ;;  %v2763_v42 = vld [vmem:[#allocation2 + $0x5b] sm:$0xff] }
 0x315   : > { %4815 = vmatmul.msk.f32.gmra.mxu2 %vm891_vm1, %v3898_v32  ;;  %v3901_v32 = vld [vmem:[#allocation2 + $0x8d] sm:$0xff]  ;;  %v3537_v28 = vld [vmem:[#allocation2 + $0xfc] sm:$0xff] }
 0x316   : > { %2741 = vst.msk [vmem:[%s5236_s14 + $0xb0] sm:$0xff] %vm1206_vm2, %v2705_v15 }
 0x317   : > { %v1858_v61 = vpop.f32.mrf.mxu3 }
 0x318   : > { %v6312_v26 = vpop.f32.mrf.mxu2  ;;  %v1952_v43 = vadd.f32 %v1916_v63, %v1858_v61  ;;  %v1919_v61 = vld [vmem:[%s5236_s14 + $0xe0] sm:$0xff] }
 0x319   : > { %v2293_v12 = vld [vmem:[%s5236_s14 + $0xc0] sm:$0xff] }
 0x31a   : > { %v2329_v33 = vadd.f32 %v2293_v12, %v5969_v13  ;;  %1988 = vst.msk [vmem:[%s5236_s14 + $0xc8] sm:$0xff] %vm1206_vm2, %v1952_v43  ;;  %v6337_v38 = vpop.f32.mrf.mxu1 }
 0x31b   : > { %v2670_v41 = vld [vmem:[%s5236_s14 + $0xb8] sm:$0xff] }
 0x31c   : > { %2365 = vst.msk [vmem:[%s5236_s14 + $0xc0] sm:$0xff] %vm1206_vm2, %v2329_v33  ;;  %4704 = vmatmul.msk.f32.gmra.mxu3 %vm891_vm1, %v2761_v18  ;;  %v2706_v29 = vadd.f32 %v2670_v41, %v6206_v9  ;;  %4794 = vmatmul.msk.f32.gmra.mxu1 %vm891_vm1, %v3535_v8  ;;  %v3902_v18 = vld [vmem:[#allocation2 + $0x95] sm:$0xff]  ;;  %v3538_v41 = vld [vmem:[#allocation2 + $0x104] sm:$0xff] }
 0x31d   : > { %4816 = vmatmul.msk.f32.gmra.mxu2 %vm891_vm1, %v3899_v6 }
 0x31e   : > { %2742 = vst.msk [vmem:[%s5236_s14 + $0xb8] sm:$0xff] %vm1206_vm2, %v2706_v29  ;;  %v1920_v29 = vld [vmem:[%s5236_s14 + $0xe8] sm:$0xff] }
 0x31f   : > { %v1861_v13 = vpop.f32.mrf.mxu3 }
 0x320   : > { %v6330_v30 = vpop.f32.mrf.mxu2  ;;  %v1953_v58 = vadd.f32 %v1917_v35, %v1861_v13 }
 0x321   : > { %v2294_v4 = vld [vmem:[%s5236_s14 + $0xc8] sm:$0xff] }
 0x322   : > { %v2330_v46 = vadd.f32 %v2294_v4, %v5996_v25  ;;  %1989 = vst.msk [vmem:[%s5236_s14 + $0xd0] sm:$0xff] %vm1206_vm2, %v1953_v58 }
 0x323   : > { %v2671_v9 = vld [vmem:[%s5236_s14 + $0xc0] sm:$0xff] }
 0x324   : > { %2366 = vst.msk [vmem:[%s5236_s14 + $0xc8] sm:$0xff] %vm1206_vm2, %v2330_v46  ;;  %4705 = vmatmul.msk.f32.gmra.mxu3 %vm891_vm1, %v2762_v2  ;;  %v2707_v25 = vadd.f32 %v2671_v9, %v6224_v39  ;;  %4795 = vmatmul.msk.f32.gmra.mxu1 %vm891_vm1, %v3536_v3  ;;  %v3903_v2 = vld [vmem:[#allocation2 + $0x9d] sm:$0xff]  ;;  %v3539_v9 = vld [vmem:[#allocation2 + $0x10c] sm:$0xff] }
 0x325   : > { %4817 = vmatmul.msk.f32.gmra.mxu2 %vm891_vm1, %v3900_v22 }
 0x326   : > { %2743 = vst.msk [vmem:[%s5236_s14 + $0xc0] sm:$0xff] %vm1206_vm2, %v2707_v25  ;;  %v1921_v25 = vld [vmem:[%s5236_s14 + $0xf0] sm:$0xff] }
 0x327   : > { %v1864_v7 = vpop.f32.mrf.mxu3 }
 0x328   : > { %v6348_v56 = vpop.f32.mrf.mxu2  ;;  %v1954_v60 = vadd.f32 %v1918_v19, %v1864_v7 }
 0x329   : > { %v2295_v50 = vld [vmem:[%s5236_s14 + $0xd0] sm:$0xff] }
 0x32a   : > { %v2331_v5 = vadd.f32 %v2295_v50, %v6020_v31  ;;  %1990 = vst.msk [vmem:[%s5236_s14 + $0xd8] sm:$0xff] %vm1206_vm2, %v1954_v60  ;;  %v6361_v31 = vpop.f32.mrf.mxu1 }
 0x32b   : > { %v2672_v39 = vld [vmem:[%s5236_s14 + $0xc8] sm:$0xff] }
 0x32c   : > { %2367 = vst.msk [vmem:[%s5236_s14 + $0xd0] sm:$0xff] %vm1206_vm2, %v2331_v5  ;;  %4706 = vmatmul.msk.f32.gmra.mxu3 %vm891_vm1, %v2763_v42  ;;  %v2708_v48 = vadd.f32 %v2672_v39, %v6242_v54  ;;  %4796 = vmatmul.msk.f32.gmra.mxu1 %vm891_vm1, %v3537_v28  ;;  %v2764_v54 = vld [vmem:[#allocation2 + $0x63] sm:$0xff]  ;;  %v3540_v39 = vld [vmem:[#allocation2 + $0x114] sm:$0xff] }
 0x32d   : > { %4818 = vmatmul.msk.f32.gmra.mxu2 %vm891_vm1, %v3901_v32  ;;  %v3904_v42 = vld [vmem:[#allocation2 + $0xa5] sm:$0xff] }
 0x32e   : > { %2744 = vst.msk [vmem:[%s5236_s14 + $0xc8] sm:$0xff] %vm1206_vm2, %v2708_v48  ;;  %v1922_v48 = vld [vmem:[%s5236_s14 + $0xf8] sm:$0xff] }
 0x32f   : > { %v1867_v15 = vpop.f32.mrf.mxu3 }
 0x330   : > { %v6366_v63 = vpop.f32.mrf.mxu2  ;;  %v1955_v43 = vadd.f32 %v1919_v61, %v1867_v15 }
 0x331   : > { %v2296_v12 = vld [vmem:[%s5236_s14 + $0xd8] sm:$0xff] }
 0x332   : > { %v2332_v33 = vadd.f32 %v2296_v12, %v6046_v10  ;;  %1991 = vst.msk [vmem:[%s5236_s14 + $0xe0] sm:$0xff] %vm1206_vm2, %v1955_v43  ;;  %v6384_v35 = vpop.f32.mrf.mxu1 }
 0x333   : > { %v2673_v6 = vld [vmem:[%s5236_s14 + $0xd0] sm:$0xff] }
 0x334   : > { %2368 = vst.msk [vmem:[%s5236_s14 + $0xd8] sm:$0xff] %vm1206_vm2, %v2332_v33  ;;  %4707 = vmatmul.msk.f32.gmra.mxu3 %vm891_vm1, %v2764_v54  ;;  %v2709_v8 = vadd.f32 %v2673_v6, %v6260_v53  ;;  %4797 = vmatmul.msk.f32.gmra.mxu1 %vm891_vm1, %v3538_v41  ;;  %v2765_v53 = vld [vmem:[#allocation2 + $0x6b] sm:$0xff]  ;;  %v2767_v33 = vld [vmem:[#allocation2 + $0x7b] sm:$0xff] }
 0x335   : > { %4819 = vmatmul.msk.f32.gmra.mxu2 %vm891_vm1, %v3902_v18  ;;  %v3905_v54 = vld [vmem:[#allocation2 + $0xad] sm:$0xff]  ;;  %v3541_v6 = vld [vmem:[#allocation2 + $0x11c] sm:$0xff] }
 0x336   : > { %2745 = vst.msk [vmem:[%s5236_s14 + $0xd0] sm:$0xff] %vm1206_vm2, %v2709_v8  ;;  %v1923_v8 = vld [vmem:[%s5236_s14 + $0x100] sm:$0xff] }
 0x337   : > { %v1870_v10 = vpop.f32.mrf.mxu3 }
 0x338   : > { %v6382_v13 = vpop.f32.mrf.mxu2  ;;  %v1956_v58 = vadd.f32 %v1920_v29, %v1870_v10 }
 0x339   : > { %v2297_v4 = vld [vmem:[%s5236_s14 + $0xe0] sm:$0xff] }
 0x33a   : > { %v2333_v46 = vadd.f32 %v2297_v4, %v6075_v36  ;;  %1992 = vst.msk [vmem:[%s5236_s14 + $0xe8] sm:$0xff] %vm1206_vm2, %v1956_v58  ;;  %v6403_v50 = vpop.f32.mrf.mxu1 }
 0x33b   : > { %v2674_v22 = vld [vmem:[%s5236_s14 + $0xd8] sm:$0xff] }
 0x33c   : > { %2369 = vst.msk [vmem:[%s5236_s14 + $0xe0] sm:$0xff] %vm1206_vm2, %v2333_v46  ;;  %4708 = vmatmul.msk.f32.gmra.mxu3 %vm891_vm1, %v2765_v53  ;;  %v2710_v3 = vadd.f32 %v2674_v22, %v6278_v0  ;;  %4798 = vmatmul.msk.f32.gmra.mxu1 %vm891_vm1, %v3539_v9  ;;  %v2766_v0 = vld [vmem:[#allocation2 + $0x73] sm:$0xff]  ;;  %v2768_v46 = vld [vmem:[#allocation2 + $0x83] sm:$0xff] }
 0x33d   : > { %4820 = vmatmul.msk.f32.gmra.mxu2 %vm891_vm1, %v3903_v2  ;;  %v3906_v53 = vld [vmem:[#allocation2 + $0xb5] sm:$0xff]  ;;  %v3542_v2 = vld [vmem:[#allocation2 + $0x124] sm:$0xff] }
 0x33e   : > { %2746 = vst.msk [vmem:[%s5236_s14 + $0xd8] sm:$0xff] %vm1206_vm2, %v2710_v3  ;;  %v1924_v3 = vld [vmem:[%s5236_s14 + $0x108] sm:$0xff] }
 0x33f   : > { %v1873_v36 = vpop.f32.mrf.mxu3 }
 0x340   : > { %v6400_v7 = vpop.f32.mrf.mxu2  ;;  %v1957_v19 = vadd.f32 %v1921_v25, %v1873_v36 }
 0x341   : > { %v2298_v60 = vld [vmem:[%s5236_s14 + $0xe8] sm:$0xff] }
 0x342   : > { %v2334_v5 = vadd.f32 %v2298_v60, %v6102_v40  ;;  %1993 = vst.msk [vmem:[%s5236_s14 + $0xf0] sm:$0xff] %vm1206_vm2, %v1957_v19  ;;  %v6425_v18 = vpop.f32.mrf.mxu1 }
 0x343   : > { %v2675_v32 = vld [vmem:[%s5236_s14 + $0xe0] sm:$0xff] }
 0x344   : > { %2370 = vst.msk [vmem:[%s5236_s14 + $0xe8] sm:$0xff] %vm1206_vm2, %v2334_v5  ;;  %4709 = vmatmul.msk.f32.gmra.mxu3 %vm891_vm1, %v2766_v0  ;;  %v2711_v28 = vadd.f32 %v2675_v32, %v6294_v1  ;;  %4799 = vmatmul.msk.f32.gmra.mxu1 %vm891_vm1, %v3540_v39  ;;  %v3907_v5 = vld [vmem:[#allocation2 + $0xbd] sm:$0xff]  ;;  %v1925_v39 = vld [vmem:[%s5236_s14 + $0x110] sm:$0xff] }
 0x345   : > { %4821 = vmatmul.msk.f32.gmra.mxu2 %vm891_vm1, %v3904_v42  ;;  %v3543_v42 = vld [vmem:[#allocation2 + $0x12c] sm:$0xff] }
 0x346   : > { %2747 = vst.msk [vmem:[%s5236_s14 + $0xe0] sm:$0xff] %vm1206_vm2, %v2711_v28 }
 0x347   : > { %v1876_v40 = vpop.f32.mrf.mxu3 }
 0x348   : > { %v6418_v15 = vpop.f32.mrf.mxu2  ;;  %v1958_v61 = vadd.f32 %v1922_v48, %v1876_v40 }
 0x349   : > { %v2299_v43 = vld [vmem:[%s5236_s14 + $0xf0] sm:$0xff] }
 0x34a   : > { %v2335_v12 = vadd.f32 %v2299_v43, %v6126_v57  ;;  %1994 = vst.msk [vmem:[%s5236_s14 + $0xf8] sm:$0xff] %vm1206_vm2, %v1958_v61 }
 0x34b   : > { %v2676_v1 = vld [vmem:[%s5236_s14 + $0xe8] sm:$0xff] }
 0x34c   : > { %2371 = vst.msk [vmem:[%s5236_s14 + $0xf0] sm:$0xff] %vm1206_vm2, %v2335_v12  ;;  %4710 = vmatmul.msk.f32.gmra.mxu3 %vm891_vm1, %v2767_v33  ;;  %v2712_v57 = vadd.f32 %v2676_v1, %v6312_v26  ;;  %4800 = vmatmul.msk.f32.gmra.mxu1 %vm891_vm1, %v3541_v6  ;;  %v3908_v12 = vld [vmem:[#allocation2 + $0xc5] sm:$0xff]  ;;  %v1926_v6 = vld [vmem:[%s5236_s14 + $0x118] sm:$0xff] }
 0x34d   : > { %4822 = vmatmul.msk.f32.gmra.mxu2 %vm891_vm1, %v3905_v54  ;;  %v3544_v54 = vld [vmem:[#allocation2 + $0x134] sm:$0xff] }
 0x34e   : > { %2748 = vst.msk [vmem:[%s5236_s14 + $0xe8] sm:$0xff] %vm1206_vm2, %v2712_v57 }
 0x34f   : > { %v1879_v41 = vpop.f32.mrf.mxu3 }
 0x350   : > { %v6436_v10 = vpop.f32.mrf.mxu2  ;;  %v1959_v29 = vadd.f32 %v1923_v8, %v1879_v41 }
 0x351   : > { %v2300_v58 = vld [vmem:[%s5236_s14 + $0xf8] sm:$0xff] }
 0x352   : > { %v2336_v4 = vadd.f32 %v2300_v58, %v6152_v62  ;;  %1995 = vst.msk [vmem:[%s5236_s14 + $0x100] sm:$0xff] %vm1206_vm2, %v1959_v29  ;;  %v6449_v62 = vpop.f32.mrf.mxu1 }
 0x353   : > { %v2677_v26 = vld [vmem:[%s5236_s14 + $0xf0] sm:$0xff] }
 0x354   : > { %2372 = vst.msk [vmem:[%s5236_s14 + $0xf8] sm:$0xff] %vm1206_vm2, %v2336_v4  ;;  %4711 = vmatmul.msk.f32.gmra.mxu3 %vm891_vm1, %v2768_v46  ;;  %v2713_v22 = vadd.f32 %v2677_v26, %v6330_v30  ;;  %4801 = vmatmul.msk.f32.gmra.mxu1 %vm891_vm1, %v3542_v2  ;;  %v2769_v30 = vld [vmem:[#allocation2 + $0x8b] sm:$0xff]  ;;  %v3025_v2 = vld [vmem:[%s5236_s14] sm:$0xff] }
 0x355   : > { %4823 = vmatmul.msk.f32.gmra.mxu2 %vm891_vm1, %v3906_v53  ;;  %v3909_v4 = vld [vmem:[#allocation2 + $0xcd] sm:$0xff]  ;;  %v3545_v53 = vld [vmem:[#allocation2 + $0x13c] sm:$0xff] }
 0x356   : > { %2749 = vst.msk [vmem:[%s5236_s14 + $0xf0] sm:$0xff] %vm1206_vm2, %v2713_v22 }
 0x357   : > { %v1882_v9 = vpop.f32.mrf.mxu3 }
 0x358   : > { %v6454_v36 = vpop.f32.mrf.mxu2  ;;  %v1960_v25 = vadd.f32 %v1924_v3, %v1882_v9 }
 0x359   : > { %v2301_v19 = vld [vmem:[%s5236_s14 + $0x100] sm:$0xff] }
 0x35a   : > { %v2337_v60 = vadd.f32 %v2301_v19, %v6181_v17  ;;  %1996 = vst.msk [vmem:[%s5236_s14 + $0x108] sm:$0xff] %vm1206_vm2, %v1960_v25  ;;  %v6472_v48 = vpop.f32.mrf.mxu1  ;;  %v2772_v19 = vld [vmem:[#allocation2 + $0xa3] sm:$0xff] }
 0x35b   : > { %v2678_v0 = vld [vmem:[%s5236_s14 + $0xf8] sm:$0xff] }
 0x35c   : > { %2373 = vst.msk [vmem:[%s5236_s14 + $0x100] sm:$0xff] %vm1206_vm2, %v2337_v60  ;;  %4712 = vmatmul.msk.f32.gmra.mxu3 %vm891_vm1, %v2769_v30  ;;  %v2714_v32 = vadd.f32 %v2678_v0, %v6348_v56  ;;  %4802 = vmatmul.msk.f32.gmra.mxu1 %vm891_vm1, %v3543_v42  ;;  %v2770_v56 = vld [vmem:[#allocation2 + $0x93] sm:$0xff]  ;;  %v3546_v30 = vld [vmem:[#allocation2 + $0x144] sm:$0xff] }
 0x35d   : > { %4824 = vmatmul.msk.f32.gmra.mxu2 %vm891_vm1, %v3907_v5  ;;  %v3910_v60 = vld [vmem:[#allocation2 + $0xd5] sm:$0xff]  ;;  %v3026_v42 = vld [vmem:[%s5236_s14 + $0x8] sm:$0xff] }
 0x35e   : > { %2750 = vst.msk [vmem:[%s5236_s14 + $0xf8] sm:$0xff] %vm1206_vm2, %v2714_v32 }
 0x35f   : > { %v1885_v17 = vpop.f32.mrf.mxu3 }
 0x360   : > { %v6470_v28 = vpop.f32.mrf.mxu2  ;;  %v1961_v40 = vadd.f32 %v1925_v39, %v1885_v17 }
 0x361   : > { %v2302_v61 = vld [vmem:[%s5236_s14 + $0x108] sm:$0xff] }
 0x362   : > { %v2338_v43 = vadd.f32 %v2302_v61, %v6208_v27  ;;  %1997 = vst.msk [vmem:[%s5236_s14 + $0x110] sm:$0xff] %vm1206_vm2, %v1961_v40  ;;  %v6494_v58 = vpop.f32.mrf.mxu1  ;;  %v3911_v61 = vld [vmem:[#allocation2 + $0xdd] sm:$0xff] }
 0x363   : > { %v2679_v33 = vld [vmem:[%s5236_s14 + $0x100] sm:$0xff] }
 0x364   : > { %2374 = vst.msk [vmem:[%s5236_s14 + $0x108] sm:$0xff] %vm1206_vm2, %v2338_v43  ;;  %4713 = vmatmul.msk.f32.gmra.mxu3 %vm891_vm1, %v2770_v56  ;;  %v2715_v1 = vadd.f32 %v2679_v33, %v6366_v63  ;;  %4803 = vmatmul.msk.f32.gmra.mxu1 %vm891_vm1, %v3544_v54  ;;  %v2771_v63 = vld [vmem:[#allocation2 + $0x9b] sm:$0xff] }
 0x365   : > { %4825 = vmatmul.msk.f32.gmra.mxu2 %vm891_vm1, %v3908_v12 }
 0x366   : > { %2751 = vst.msk [vmem:[%s5236_s14 + $0x100] sm:$0xff] %vm1206_vm2, %v2715_v1 }
 0x367   : > { %v1888_v27 = vpop.f32.mrf.mxu3 }
 0x368   : > { %v6488_v57 = vpop.f32.mrf.mxu2  ;;  %v1962_v41 = vadd.f32 %v1926_v6, %v1888_v27 }
 0x369   : > { %v2303_v8 = vld [vmem:[%s5236_s14 + $0x110] sm:$0xff] }
 0x36a   : > { %v2339_v29 = vadd.f32 %v2303_v8, %v6227_v52  ;;  %1998 = vst.msk [vmem:[%s5236_s14 + $0x118] sm:$0xff] %vm1206_vm2, %v1962_v41  ;;  %v6518_v0 = vpop.f32.mrf.mxu1  ;;  %v2774_v41 = vld [vmem:[#allocation2 + $0xb3] sm:$0xff] }
 0x36b   : > { %v2680_v46 = vld [vmem:[%s5236_s14 + $0x108] sm:$0xff] }
 0x36c   : > { %2375 = vst.msk [vmem:[%s5236_s14 + $0x110] sm:$0xff] %vm1206_vm2, %v2339_v29  ;;  %4714 = vmatmul.msk.f32.gmra.mxu3 %vm891_vm1, %v2771_v63  ;;  %v2716_v52 = vadd.f32 %v2680_v46, %v6382_v13  ;;  %4804 = vmatmul.msk.f32.gmra.mxu1 %vm891_vm1, %v3545_v53  ;;  %v3028_v29 = vld [vmem:[%s5236_s14 + $0x18] sm:$0xff] }
 0x36d   : > { %4826 = vmatmul.msk.f32.gmra.mxu2 %vm891_vm1, %v3909_v4  ;;  %v2775_v53 = vld [vmem:[#allocation2 + $0xbb] sm:$0xff] }
 0x36e   : > { %2752 = vst.msk [vmem:[%s5236_s14 + $0x108] sm:$0xff] %vm1206_vm2, %v2716_v52  ;;  %v3913_v52 = vld [vmem:[#allocation2 + $0xed] sm:$0xff] }
 0x36f   : > { %v2917_v26 = vpop.f32.mrf.mxu3 }
 0x370   : > { %v6506_v22 = vpop.f32.mrf.mxu2  ;;  %v3061_v9 = vadd.f32 %v3025_v2, %v2917_v26 }
 0x371   : > { %v2304_v3 = vld [vmem:[%s5236_s14 + $0x118] sm:$0xff] }
 0x372   : > { %v2340_v25 = vadd.f32 %v2304_v3, %v6249_v14  ;;  %3097 = vst.msk [vmem:[%s5236_s14] sm:$0xff] %vm1206_vm2, %v3061_v9 }
 0x373   : > { %v2681_v13 = vld [vmem:[%s5236_s14 + $0x110] sm:$0xff] }
 0x374   : > { %2376 = vst.msk [vmem:[%s5236_s14 + $0x118] sm:$0xff] %vm1206_vm2, %v2340_v25  ;;  %4715 = vmatmul.msk.f32.gmra.mxu3 %vm891_vm1, %v2772_v19  ;;  %v2717_v5 = vadd.f32 %v2681_v13, %v6400_v7  ;;  %4805 = vmatmul.msk.f32.gmra.mxu1 %vm891_vm1, %v3546_v30  ;;  %v2773_v7 = vld [vmem:[#allocation2 + $0xab] sm:$0xff]  ;;  %v3029_v25 = vld [vmem:[%s5236_s14 + $0x20] sm:$0xff] }
 0x375   : > { %4827 = vmatmul.msk.f32.gmra.mxu2 %vm891_vm1, %v3910_v60  ;;  %v2776_v30 = vld [vmem:[#allocation2 + $0xc3] sm:$0xff] }
 0x376   : > { %2753 = vst.msk [vmem:[%s5236_s14 + $0x110] sm:$0xff] %vm1206_vm2, %v2717_v5  ;;  %v6581_v5 = vld [vmem:[%s7305_s5] ss:$0 sm:$0xff] }
 0x377   : > { %v2920_v14 = vpop.f32.mrf.mxu3 }
 0x378   : > { %v3062_v32 = vadd.f32 %v3026_v42, %v2920_v14  ;;  %v6525_v39 = vpop.f32.mrf.mxu2 }
 0x379   : > { %v3403_v17 = vld [vmem:[%s5236_s14] sm:$0xff] }
 0x37a   : > { %v3439_v40 = vadd.f32 %v3403_v17, %v5894_v11  ;;  %3098 = vst.msk [vmem:[%s5236_s14 + $0x8] sm:$0xff] %vm1206_vm2, %v3062_v32  ;;  %v3027_v11 = vld [vmem:[%s5236_s14 + $0x10] sm:$0xff] }
 0x37b   : > { %v2682_v43 = vld [vmem:[%s5236_s14 + $0x118] sm:$0xff] }
 0x37c   : > { %3475 = vst.msk [vmem:[%s5236_s14] sm:$0xff] %vm1206_vm2, %v3439_v40  ;;  %4716 = vmatmul.msk.f32.gmra.mxu3 %vm891_vm1, %v2773_v7  ;;  %v2718_v56 = vadd.f32 %v2682_v43, %v6418_v15  ;;  %v3912_v15 = vld [vmem:[#allocation2 + $0xe5] sm:$0xff] }
 0x37d   : > { %4828 = vmatmul.msk.f32.gmra.mxu2 %vm891_vm1, %v3911_v61 }
 0x37e   : > { %2754 = vst.msk [vmem:[%s5236_s14 + $0x118] sm:$0xff] %vm1206_vm2, %v2718_v56 }
 0x37f   : > { %v2923_v12 = vpop.f32.mrf.mxu3 }
 0x380   : > { %v3063_v33 = vadd.f32 %v3027_v11, %v2923_v12  ;;  %v6544_v6 = vpop.f32.mrf.mxu2  ;;  %v2777_v11 = vld [vmem:[#allocation2 + $0xcb] sm:$0xff] }
 0x381   : > { %v3404_v54 = vld [vmem:[%s5236_s14 + $0x8] sm:$0xff] }
 0x382   : > { %v3440_v1 = vadd.f32 %v3404_v54, %v5920_v45  ;;  %3099 = vst.msk [vmem:[%s5236_s14 + $0x10] sm:$0xff] %vm1206_vm2, %v3063_v33  ;;  %v3915_v33 = vld [vmem:[#allocation2 + $0xfd] sm:$0xff] }
 0x383   : > { %v3781_v27 = vld [vmem:[%s5236_s14] sm:$0xff] }
 0x384   : > { %v3817_v8 = vadd.f32 %v3781_v27, %v6273_v59  ;;  %3476 = vst.msk [vmem:[%s5236_s14 + $0x8] sm:$0xff] %vm1206_vm2, %v3440_v1  ;;  %4717 = vmatmul.msk.f32.gmra.mxu3 %vm891_vm1, %v2774_v41 }
 0x385   : > { %4829 = vmatmul.msk.f32.gmra.mxu2 %vm891_vm1, %v3912_v15  ;;  %v3031_v15 = vld [vmem:[%s5236_s14 + $0x30] sm:$0xff] }
 0x386   : > { %3853 = vst.msk [vmem:[%s5236_s14] sm:$0xff] %vm1206_vm2, %v3817_v8 }
 0x387   : > { %v2926_v45 = vpop.f32.mrf.mxu3 }
 0x388   : > { %v3064_v63 = vadd.f32 %v3028_v29, %v2926_v45  ;;  %v6565_v9 = vpop.f32.mrf.mxu2 }
 0x389   : > { %v3405_v4 = vld [vmem:[%s5236_s14 + $0x10] sm:$0xff] }
 0x38a   : > { %v3441_v46 = vadd.f32 %v3405_v4, %v5949_v49  ;;  %3100 = vst.msk [vmem:[%s5236_s14 + $0x18] sm:$0xff] %vm1206_vm2, %v3064_v63  ;;  %v2778_v4 = vld [vmem:[#allocation2 + $0xd3] sm:$0xff] }
 0x38b   : > { %v3782_v59 = vld [vmem:[%s5236_s14 + $0x8] sm:$0xff] }
 0x38c   : > { %v3818_v26 = vadd.f32 %v3782_v59, %v6296_v21  ;;  %3477 = vst.msk [vmem:[%s5236_s14 + $0x10] sm:$0xff] %vm1206_vm2, %v3441_v46  ;;  %4718 = vmatmul.msk.f32.gmra.mxu3 %vm891_vm1, %v2775_v53  ;;  %v3916_v46 = vld [vmem:[#allocation2 + $0x105] sm:$0xff] }
 0x38d   : > { %4830 = vmatmul.msk.f32.gmra.mxu2 %vm891_vm1, %v3913_v52  ;;  %v4159_v2 = vld [vmem:[%s5236_s14] sm:$0xff] }
 0x38e   : > { %v4195_v49 = vadd.f32 %v4159_v2, %v6436_v10  ;;  %3854 = vst.msk [vmem:[%s5236_s14 + $0x8] sm:$0xff] %vm1206_vm2, %v3818_v26  ;;  %v3914_v10 = vld [vmem:[#allocation2 + $0xf5] sm:$0xff] }
 0x38f   : > { %v2929_v3 = vpop.f32.mrf.mxu3 }
 0x390   : > { %4231 = vst.msk [vmem:[%s5236_s14] sm:$0xff] %vm1206_vm2, %v4195_v49  ;;  %v3065_v21 = vadd.f32 %v3029_v25, %v2929_v3  ;;  %v6593_v17 = vpop.f32.mrf.mxu2  ;;  %v3032_v49 = vld [vmem:[%s5236_s14 + $0x38] sm:$0xff] }
 0x391   : > { %v3406_v19 = vld [vmem:[%s5236_s14 + $0x18] sm:$0xff] }
 0x392   : > { %v3442_v60 = vadd.f32 %v3406_v19, %v5976_v20  ;;  %3101 = vst.msk [vmem:[%s5236_s14 + $0x20] sm:$0xff] %vm1206_vm2, %v3065_v21  ;;  %v6644_v21 = vpop.f32.mrf.mxu0 }
 0x393   : > { %v3783_v13 = vld [vmem:[%s5236_s14 + $0x10] sm:$0xff] }
 0x394   : > { %v3819_v14 = vadd.f32 %v3783_v13, %v6315_v23  ;;  %3478 = vst.msk [vmem:[%s5236_s14 + $0x18] sm:$0xff] %vm1206_vm2, %v3442_v60  ;;  %4719 = vmatmul.msk.f32.gmra.mxu3 %vm891_vm1, %v2776_v30  ;;  %v3030_v23 = vld [vmem:[%s5236_s14 + $0x28] sm:$0xff]  ;;  %v2779_v13 = vld [vmem:[#allocation2 + $0xdb] sm:$0xff] }
 0x395   : > { %4831 = vmatmul.msk.f32.gmra.mxu2 %vm891_vm1, %v3914_v10  ;;  %v4160_v20 = vld [vmem:[%s5236_s14 + $0x8] sm:$0xff] }
 0x396   : > { %v4196_v42 = vadd.f32 %v4160_v20, %v6454_v36  ;;  %3855 = vst.msk [vmem:[%s5236_s14 + $0x10] sm:$0xff] %vm1206_vm2, %v3819_v14  ;;  %v3917_v30 = vld [vmem:[#allocation2 + $0x10d] sm:$0xff] }
 0x397   : > { %v4267_v32 = vld [vmem:[%s5236_s14] sm:$0xff]  ;;  %v2932_v40 = vpop.f32.mrf.mxu3 }
 0x398   : > { %v4307_v7 = vadd.f32 %v6581_v5, %v4267_v32  ;;  %4232 = vst.msk [vmem:[%s5236_s14 + $0x8] sm:$0xff] %vm1206_vm2, %v4196_v42  ;;  %v3066_v61 = vadd.f32 %v3030_v23, %v2932_v40  ;;  %v6621_v29 = vpop.f32.mrf.mxu2  ;;  %v3033_v40 = vld [vmem:[%s5236_s14 + $0x40] sm:$0xff] }
 0x399   : > { %v3407_v43 = vld [vmem:[%s5236_s14 + $0x20] sm:$0xff] }
 0x39a   : > { %v4343_v56 = vmax.f32 %v4307_v7, 0.0  ;;  %v3443_v36 = vadd.f32 %v3407_v43, %v6000_v37  ;;  %3102 = vst.msk [vmem:[%s5236_s14 + $0x28] sm:$0xff] %vm1206_vm2, %v3066_v61 }
 0x39b   : > { %v3784_v12 = vld [vmem:[%s5236_s14 + $0x18] sm:$0xff] }
 0x39c   : > { %4379 = vst.msk [vmem:[%s5236_s14] sm:$0xff] %vm1206_vm2, %v4343_v56  ;;  %v3820_v54 = vadd.f32 %v3784_v12, %v6337_v38  ;;  %4720 = vmatmul.msk.f32.gmra.mxu3 %vm891_vm1, %v2777_v11  ;;  %v3918_v56 = vld [vmem:[#allocation2 + $0x115] sm:$0xff]  ;;  %v6674_v12 = vpop.f32.mrf.mxu1 }
 0x39d   : > { %4832 = vmatmul.msk.f32.gmra.mxu2 %vm891_vm1, %v3915_v33  ;;  %v4161_v1 = vld [vmem:[%s5236_s14 + $0x10] sm:$0xff]  ;;  %3479 = vst.msk [vmem:[%s5236_s14 + $0x20] sm:$0xff] %vm1206_vm2, %v3443_v36  ;;  %v6672_v36 = vpop.f32.mrf.mxu0 }
 0x39e   : > { %v4197_v37 = vadd.f32 %v4161_v1, %v6470_v28  ;;  %3856 = vst.msk [vmem:[%s5236_s14 + $0x18] sm:$0xff] %vm1206_vm2, %v3820_v54 }
 0x39f   : > { %v4268_v27 = vld [vmem:[%s5236_s14 + $0x8] sm:$0xff]  ;;  %v2935_v41 = vpop.f32.mrf.mxu3 }
 0x3a0   : > { %v4308_v38 = vadd.f32 %v6581_v5, %v4268_v27  ;;  %4233 = vst.msk [vmem:[%s5236_s14 + $0x10] sm:$0xff] %vm1206_vm2, %v4197_v37  ;;  %v3067_v8 = vadd.f32 %v3031_v15, %v2935_v41  ;;  %v6649_v60 = vpop.f32.mrf.mxu2  ;;  %v3034_v27 = vld [vmem:[%s5236_s14 + $0x48] sm:$0xff] }
 0x3a1   : > { %v3408_v45 = vld [vmem:[%s5236_s14 + $0x28] sm:$0xff] }
 0x3a2   : > { %v4344_v63 = vmax.f32 %v4308_v38, 0.0  ;;  %v3444_v28 = vadd.f32 %v3408_v45, %v6026_v24  ;;  %3103 = vst.msk [vmem:[%s5236_s14 + $0x30] sm:$0xff] %vm1206_vm2, %v3067_v8 }
 0x3a4   : > { %4380 = vst.msk [vmem:[%s5236_s14 + $0x8] sm:$0xff] %vm1206_vm2, %v4344_v63  ;;  %v3785_v59 = vld [vmem:[%s5236_s14 + $0x20] sm:$0xff]  ;;  %4721 = vmatmul.msk.f32.gmra.mxu3 %vm891_vm1, %v2778_v4 }
 0x3a5   : > { %4833 = vmatmul.msk.f32.gmra.mxu2 %vm891_vm1, %v3916_v46  ;;  %v4162_v53 = vld [vmem:[%s5236_s14 + $0x18] sm:$0xff]  ;;  %v3821_v52 = vadd.f32 %v3785_v59, %v6361_v31  ;;  %3480 = vst.msk [vmem:[%s5236_s14 + $0x28] sm:$0xff] %vm1206_vm2, %v3444_v28  ;;  %v6707_v4 = vpop.f32.mrf.mxu0  ;;  %v6709_v46 = vpop.f32.mrf.mxu1 }
 0x3a6   : > { %v4198_v24 = vadd.f32 %v4162_v53, %v6488_v57  ;;  %v3919_v63 = vld [vmem:[#allocation2 + $0x11d] sm:$0xff] }
 0x3a7   : > { %v4269_v26 = vld [vmem:[%s5236_s14 + $0x10] sm:$0xff]  ;;  %3857 = vst.msk [vmem:[%s5236_s14 + $0x20] sm:$0xff] %vm1206_vm2, %v3821_v52  ;;  %v2938_v2 = vpop.f32.mrf.mxu3 }
 0x3a8   : > { %v4309_v3 = vadd.f32 %v6581_v5, %v4269_v26  ;;  %4234 = vst.msk [vmem:[%s5236_s14 + $0x18] sm:$0xff] %vm1206_vm2, %v4198_v24  ;;  %v3068_v25 = vadd.f32 %v3032_v49, %v2938_v2  ;;  %v6684_v33 = vpop.f32.mrf.mxu2  ;;  %v3035_v26 = vld [vmem:[%s5236_s14 + $0x50] sm:$0xff] }
 0x3a9   : > { %v3409_v31 = vld [vmem:[%s5236_s14 + $0x30] sm:$0xff] }
 0x3aa   : > { %v4345_v57 = vmax.f32 %v4309_v3, 0.0  ;;  %v3445_v19 = vadd.f32 %v3409_v31, %v6055_v51  ;;  %3104 = vst.msk [vmem:[%s5236_s14 + $0x38] sm:$0xff] %vm1206_vm2, %v3068_v25 }
 0x3ac   : > { %4381 = vst.msk [vmem:[%s5236_s14 + $0x10] sm:$0xff] %vm1206_vm2, %v4345_v57  ;;  %v3786_v10 = vld [vmem:[%s5236_s14 + $0x28] sm:$0xff]  ;;  %4722 = vmatmul.msk.f32.gmra.mxu3 %vm891_vm1, %v2779_v13  ;;  %v2782_v57 = vld [vmem:[#allocation2 + $0xf3] sm:$0xff] }
 0x3ad   : > { %4834 = vmatmul.msk.f32.gmra.mxu2 %vm891_vm1, %v3917_v30  ;;  %v3822_v14 = vadd.f32 %v3786_v10, %v6384_v35  ;;  %3481 = vst.msk [vmem:[%s5236_s14 + $0x30] sm:$0xff] %vm1206_vm2, %v3445_v19  ;;  %v3920_v19 = vld [vmem:[#allocation2 + $0x125] sm:$0xff] }
 0x3ae   : > { %v4163_v51 = vld [vmem:[%s5236_s14 + $0x20] sm:$0xff] }
 0x3af   : > { %v4270_v20 = vld [vmem:[%s5236_s14 + $0x18] sm:$0xff]  ;;  %v4199_v42 = vadd.f32 %v4163_v51, %v6506_v22  ;;  %3858 = vst.msk [vmem:[%s5236_s14 + $0x28] sm:$0xff] %vm1206_vm2, %v3822_v14  ;;  %v2941_v32 = vpop.f32.mrf.mxu3  ;;  %v2780_v22 = vld [vmem:[#allocation2 + $0xe3] sm:$0xff]  ;;  %v6741_v51 = vpop.f32.mrf.mxu1 }
 0x3b0   : > { %v4310_v23 = vadd.f32 %v6581_v5, %v4270_v20  ;;  %v3069_v7 = vadd.f32 %v3033_v40, %v2941_v32  ;;  %v6715_v52 = vpop.f32.mrf.mxu2  ;;  %v3036_v14 = vld [vmem:[%s5236_s14 + $0x58] sm:$0xff] }
 0x3b1   : > { %4235 = vst.msk [vmem:[%s5236_s14 + $0x20] sm:$0xff] %vm1206_vm2, %v4199_v42  ;;  %v3410_v35 = vld [vmem:[%s5236_s14 + $0x38] sm:$0xff] }
 0x3b2   : > { %v4346_v61 = vmax.f32 %v4310_v23, 0.0  ;;  %v3446_v43 = vadd.f32 %v3410_v35, %v6082_v16  ;;  %3105 = vst.msk [vmem:[%s5236_s14 + $0x40] sm:$0xff] %vm1206_vm2, %v3069_v7 }
 0x3b4   : > { %4382 = vst.msk [vmem:[%s5236_s14 + $0x18] sm:$0xff] %vm1206_vm2, %v4346_v61  ;;  %v3787_v11 = vld [vmem:[%s5236_s14 + $0x30] sm:$0xff]  ;;  %4723 = vmatmul.msk.f32.gmra.mxu3 %vm891_vm1, %v2780_v22  ;;  %v2783_v61 = vld [vmem:[#allocation2 + $0xfb] sm:$0xff] }
 0x3b5   : > { %4835 = vmatmul.msk.f32.gmra.mxu2 %vm891_vm1, %v3918_v56  ;;  %v3823_v16 = vadd.f32 %v3787_v11, %v6403_v50  ;;  %3482 = vst.msk [vmem:[%s5236_s14 + $0x38] sm:$0xff] %vm1206_vm2, %v3446_v43  ;;  %v3921_v43 = vld [vmem:[#allocation2 + $0x12d] sm:$0xff] }
 0x3b6   : > { %v4164_v54 = vld [vmem:[%s5236_s14 + $0x28] sm:$0xff] }
 0x3b7   : > { %v4200_v1 = vadd.f32 %v4164_v54, %v6525_v39  ;;  %3859 = vst.msk [vmem:[%s5236_s14 + $0x30] sm:$0xff] %vm1206_vm2, %v3823_v16  ;;  %v2944_v37 = vpop.f32.mrf.mxu3  ;;  %v2781_v39 = vld [vmem:[#allocation2 + $0xeb] sm:$0xff]  ;;  %v3037_v16 = vld [vmem:[%s5236_s14 + $0x60] sm:$0xff] }
 0x3b8   : > { %v4271_v41 = vld [vmem:[%s5236_s14 + $0x20] sm:$0xff]  ;;  %v3070_v15 = vadd.f32 %v3034_v27, %v2944_v37  ;;  %v6747_v40 = vpop.f32.mrf.mxu2 }
 0x3b9   : > { %v4311_v38 = vadd.f32 %v6581_v5, %v4271_v41  ;;  %4236 = vst.msk [vmem:[%s5236_s14 + $0x28] sm:$0xff] %vm1206_vm2, %v4200_v1  ;;  %v3411_v50 = vld [vmem:[%s5236_s14 + $0x40] sm:$0xff]  ;;  %v6773_v41 = vpop.f32.mrf.mxu1 }
 0x3ba   : > { %v3447_v8 = vadd.f32 %v3411_v50, %v6106_v44  ;;  %3106 = vst.msk [vmem:[%s5236_s14 + $0x48] sm:$0xff] %vm1206_vm2, %v3070_v15 }
 0x3bb   : > { %v4347_v45 = vmax.f32 %v4311_v38, 0.0 }
 0x3bc   : > { %v3788_v28 = vld [vmem:[%s5236_s14 + $0x38] sm:$0xff]  ;;  %3483 = vst.msk [vmem:[%s5236_s14 + $0x40] sm:$0xff] %vm1206_vm2, %v3447_v8  ;;  %4724 = vmatmul.msk.f32.gmra.mxu3 %vm891_vm1, %v2781_v39  ;;  %v2784_v8 = vld [vmem:[#allocation2 + $0x103] sm:$0xff] }
 0x3bd   : > { %4836 = vmatmul.msk.f32.gmra.mxu2 %vm891_vm1, %v3919_v63  ;;  %4383 = vst.msk [vmem:[%s5236_s14 + $0x20] sm:$0xff] %vm1206_vm2, %v4347_v45  ;;  %v3824_v44 = vadd.f32 %v3788_v28, %v6425_v18  ;;  %v3922_v45 = vld [vmem:[#allocation2 + $0x135] sm:$0xff] }
 0x3be   : > { %v4165_v59 = vld [vmem:[%s5236_s14 + $0x30] sm:$0xff] }
 0x3bf   : > { %v4201_v53 = vadd.f32 %v4165_v59, %v6544_v6  ;;  %3860 = vst.msk [vmem:[%s5236_s14 + $0x38] sm:$0xff] %vm1206_vm2, %v3824_v44  ;;  %v2947_v24 = vpop.f32.mrf.mxu3  ;;  %v3038_v59 = vld [vmem:[%s5236_s14 + $0x68] sm:$0xff] }
 0x3c0   : > { %v4272_v2 = vld [vmem:[%s5236_s14 + $0x28] sm:$0xff]  ;;  %v3071_v49 = vadd.f32 %v3035_v26, %v2947_v24  ;;  %v6779_v50 = vpop.f32.mrf.mxu2 }
 0x3c1   : > { %v4312_v18 = vadd.f32 %v6581_v5, %v4272_v2  ;;  %4237 = vst.msk [vmem:[%s5236_s14 + $0x30] sm:$0xff] %vm1206_vm2, %v4201_v53  ;;  %v3412_v3 = vld [vmem:[%s5236_s14 + $0x48] sm:$0xff] }
 0x3c2   : > { %v3448_v6 = vadd.f32 %v3412_v3, %v6132_v34  ;;  %3107 = vst.msk [vmem:[%s5236_s14 + $0x50] sm:$0xff] %vm1206_vm2, %v3071_v49  ;;  %v2785_v49 = vld [vmem:[#allocation2 + $0x10b] sm:$0xff] }
 0x3c3   : > { %v4348_v25 = vmax.f32 %v4312_v18, 0.0  ;;  %v3789_v31 = vld [vmem:[%s5236_s14 + $0x40] sm:$0xff] }
 0x3c4   : > { %v3825_v13 = vadd.f32 %v3789_v31, %v6449_v62  ;;  %3484 = vst.msk [vmem:[%s5236_s14 + $0x48] sm:$0xff] %vm1206_vm2, %v3448_v6  ;;  %4725 = vmatmul.msk.f32.gmra.mxu3 %vm891_vm1, %v2782_v57  ;;  %v6739_v62 = vpop.f32.mrf.mxu0  ;;  %v3923_v18 = vld [vmem:[#allocation2 + $0x13d] sm:$0xff]  ;;  %v6804_v6 = vpop.f32.mrf.mxu1 }
 0x3c5   : > { %4837 = vmatmul.msk.f32.gmra.mxu2 %vm891_vm1, %v3920_v19  ;;  %4384 = vst.msk [vmem:[%s5236_s14 + $0x28] sm:$0xff] %vm1206_vm2, %v4348_v25 }
 0x3c6   : > { %v4166_v34 = vld [vmem:[%s5236_s14 + $0x38] sm:$0xff]  ;;  %3861 = vst.msk [vmem:[%s5236_s14 + $0x40] sm:$0xff] %vm1206_vm2, %v3825_v13 }
 0x3c7   : > { %v4202_v30 = vadd.f32 %v4166_v34, %v6565_v9  ;;  %v2950_v10 = vpop.f32.mrf.mxu3 }
 0x3c8   : > { %v4273_v20 = vld [vmem:[%s5236_s14 + $0x30] sm:$0xff]  ;;  %v3072_v42 = vadd.f32 %v3036_v14, %v2950_v10  ;;  %v6812_v31 = vpop.f32.mrf.mxu2 }
 0x3c9   : > { %v4313_v32 = vadd.f32 %v6581_v5, %v4273_v20  ;;  %4238 = vst.msk [vmem:[%s5236_s14 + $0x38] sm:$0xff] %vm1206_vm2, %v4202_v30  ;;  %v3413_v23 = vld [vmem:[%s5236_s14 + $0x50] sm:$0xff] }
 0x3ca   : > { %v3449_v9 = vadd.f32 %v3413_v23, %v6161_v55  ;;  %3108 = vst.msk [vmem:[%s5236_s14 + $0x58] sm:$0xff] %vm1206_vm2, %v3072_v42  ;;  %v3924_v42 = vld [vmem:[#allocation2 + $0x145] sm:$0xff] }
 0x3cb   : > { %v4349_v7 = vmax.f32 %v4313_v32, 0.0  ;;  %v3790_v35 = vld [vmem:[%s5236_s14 + $0x48] sm:$0xff] }
 0x3cc   : > { %v3826_v22 = vadd.f32 %v3790_v35, %v6472_v48  ;;  %3485 = vst.msk [vmem:[%s5236_s14 + $0x50] sm:$0xff] %vm1206_vm2, %v3449_v9  ;;  %4726 = vmatmul.msk.f32.gmra.mxu3 %vm891_vm1, %v2783_v61  ;;  %v6771_v27 = vpop.f32.mrf.mxu0 }
 0x3cd   : > { %4838 = vmatmul.msk.f32.gmra.mxu2 %vm891_vm1, %v3921_v43  ;;  %4385 = vst.msk [vmem:[%s5236_s14 + $0x30] sm:$0xff] %vm1206_vm2, %v4349_v7  ;;  %v4167_v55 = vld [vmem:[%s5236_s14 + $0x40] sm:$0xff]  ;;  %v6839_v7 = vpop.f32.mrf.mxu1 }
 0x3ce   : > { %v4203_v56 = vadd.f32 %v4167_v55, %v6593_v17  ;;  %3862 = vst.msk [vmem:[%s5236_s14 + $0x48] sm:$0xff] %vm1206_vm2, %v3826_v22 }
 0x3cf   : > { %v2953_v11 = vpop.f32.mrf.mxu3 }
 0x3d0   : > { %v4274_v54 = vld [vmem:[%s5236_s14 + $0x38] sm:$0xff]  ;;  %4239 = vst.msk [vmem:[%s5236_s14 + $0x40] sm:$0xff] %vm1206_vm2, %v4203_v56  ;;  %v3073_v48 = vadd.f32 %v3037_v16, %v2953_v11  ;;  %v6845_v43 = vpop.f32.mrf.mxu2 }
 0x3d1   : > { %v4314_v1 = vadd.f32 %v6581_v5, %v4274_v54  ;;  %v3414_v37 = vld [vmem:[%s5236_s14 + $0x58] sm:$0xff] }
 0x3d2   : > { %v3450_v17 = vadd.f32 %v3414_v37, %v6188_v47  ;;  %3109 = vst.msk [vmem:[%s5236_s14 + $0x60] sm:$0xff] %vm1206_vm2, %v3073_v48  ;;  %v2787_v54 = vld [vmem:[#allocation2 + $0x11b] sm:$0xff] }
 0x3d3   : > { %v4350_v15 = vmax.f32 %v4314_v1, 0.0  ;;  %v3791_v38 = vld [vmem:[%s5236_s14 + $0x50] sm:$0xff] }
 0x3d4   : > { %v3827_v39 = vadd.f32 %v3791_v38, %v6494_v58  ;;  %3486 = vst.msk [vmem:[%s5236_s14 + $0x58] sm:$0xff] %vm1206_vm2, %v3450_v17  ;;  %4727 = vmatmul.msk.f32.gmra.mxu3 %vm891_vm1, %v2784_v8  ;;  %v6802_v3 = vpop.f32.mrf.mxu0  ;;  %v3041_v38 = vld [vmem:[%s5236_s14 + $0x80] sm:$0xff] }
 0x3d5   : > { %4839 = vmatmul.msk.f32.gmra.mxu2 %vm891_vm1, %v3922_v45  ;;  %4386 = vst.msk [vmem:[%s5236_s14 + $0x38] sm:$0xff] %vm1206_vm2, %v4350_v15  ;;  %v4168_v47 = vld [vmem:[%s5236_s14 + $0x48] sm:$0xff]  ;;  %v6870_v45 = vpop.f32.mrf.mxu1 }
 0x3d6   : > { %v4204_v63 = vadd.f32 %v4168_v47, %v6621_v29  ;;  %3863 = vst.msk [vmem:[%s5236_s14 + $0x50] sm:$0xff] %vm1206_vm2, %v3827_v39 }
 0x3d7   : > { %v4275_v28 = vld [vmem:[%s5236_s14 + $0x40] sm:$0xff]  ;;  %v2956_v44 = vpop.f32.mrf.mxu3 }
 0x3d8   : > { %v4315_v58 = vadd.f32 %v6581_v5, %v4275_v28  ;;  %4240 = vst.msk [vmem:[%s5236_s14 + $0x48] sm:$0xff] %vm1206_vm2, %v4204_v63  ;;  %v3074_v53 = vadd.f32 %v3038_v59, %v2956_v44  ;;  %v6875_v47 = vpop.f32.mrf.mxu2  ;;  %v2788_v44 = vld [vmem:[#allocation2 + $0x123] sm:$0xff] }
 0x3d9   : > { %v3415_v24 = vld [vmem:[%s5236_s14 + $0x60] sm:$0xff] }
 0x3da   : > { %v4351_v26 = vmax.f32 %v4315_v58, 0.0  ;;  %v3451_v2 = vadd.f32 %v3415_v24, %v6644_v21  ;;  %3110 = vst.msk [vmem:[%s5236_s14 + $0x68] sm:$0xff] %vm1206_vm2, %v3074_v53 }
 0x3db   : > { %v3792_v29 = vld [vmem:[%s5236_s14 + $0x58] sm:$0xff] }
 0x3dc   : > { %4387 = vst.msk [vmem:[%s5236_s14 + $0x40] sm:$0xff] %vm1206_vm2, %v4351_v26  ;;  %v3828_v25 = vadd.f32 %v3792_v29, %v6518_v0  ;;  %4728 = vmatmul.msk.f32.gmra.mxu3 %vm891_vm1, %v2785_v49  ;;  %v3039_v0 = vld [vmem:[%s5236_s14 + $0x70] sm:$0xff]  ;;  %v3042_v26 = vld [vmem:[%s5236_s14 + $0x88] sm:$0xff] }
 0x3dd   : > { %4840 = vmatmul.msk.f32.gmra.mxu2 %vm891_vm1, %v3923_v18  ;;  %v4169_v21 = vld [vmem:[%s5236_s14 + $0x50] sm:$0xff]  ;;  %3487 = vst.msk [vmem:[%s5236_s14 + $0x60] sm:$0xff] %vm1206_vm2, %v3451_v2 }
 0x3de   : > { %v4205_v57 = vadd.f32 %v4169_v21, %v6649_v60  ;;  %3864 = vst.msk [vmem:[%s5236_s14 + $0x58] sm:$0xff] %vm1206_vm2, %v3828_v25  ;;  %v2786_v60 = vld [vmem:[#allocation2 + $0x113] sm:$0xff] }
 0x3df   : > { %v4276_v19 = vld [vmem:[%s5236_s14 + $0x48] sm:$0xff]  ;;  %v2959_v13 = vpop.f32.mrf.mxu3 }
 0x3e0   : > { %v4316_v34 = vadd.f32 %v6581_v5, %v4276_v19  ;;  %4241 = vst.msk [vmem:[%s5236_s14 + $0x50] sm:$0xff] %vm1206_vm2, %v4205_v57  ;;  %v3075_v30 = vadd.f32 %v3039_v0, %v2959_v13  ;;  %v6905_v57 = vpop.f32.mrf.mxu2  ;;  %v2789_v19 = vld [vmem:[#allocation2 + $0x12b] sm:$0xff] }
 0x3e1   : > { %v3416_v10 = vld [vmem:[%s5236_s14 + $0x68] sm:$0xff] }
 0x3e2   : > { %v4352_v14 = vmax.f32 %v4316_v34, 0.0  ;;  %v3452_v20 = vadd.f32 %v3416_v10, %v6672_v36  ;;  %3111 = vst.msk [vmem:[%s5236_s14 + $0x70] sm:$0xff] %vm1206_vm2, %v3075_v30  ;;  %v6837_v36 = vpop.f32.mrf.mxu0  ;;  %v3043_v10 = vld [vmem:[%s5236_s14 + $0x90] sm:$0xff] }
 0x3e4   : > { %4388 = vst.msk [vmem:[%s5236_s14 + $0x48] sm:$0xff] %vm1206_vm2, %v4352_v14  ;;  %v3793_v32 = vld [vmem:[%s5236_s14 + $0x60] sm:$0xff]  ;;  %4729 = vmatmul.msk.f32.gmra.mxu3 %vm891_vm1, %v2786_v60 }
 0x3e5   : > { %4841 = vmatmul.msk.f32.gmra.mxu2 %vm891_vm1, %v3924_v42  ;;  %v4170_v23 = vld [vmem:[%s5236_s14 + $0x58] sm:$0xff]  ;;  %v3829_v9 = vadd.f32 %v3793_v32, %v6674_v12  ;;  %3488 = vst.msk [vmem:[%s5236_s14 + $0x68] sm:$0xff] %vm1206_vm2, %v3452_v20 }
 0x3e6   : > { %v4206_v35 = vadd.f32 %v4170_v23, %v6684_v33  ;;  %v3040_v12 = vld [vmem:[%s5236_s14 + $0x78] sm:$0xff] }
 0x3e7   : > { %v4277_v61 = vld [vmem:[%s5236_s14 + $0x50] sm:$0xff]  ;;  %3865 = vst.msk [vmem:[%s5236_s14 + $0x60] sm:$0xff] %vm1206_vm2, %v3829_v9  ;;  %v2962_v22 = vpop.f32.mrf.mxu3 }
 0x3e8   : > { %v4317_v55 = vadd.f32 %v6581_v5, %v4277_v61  ;;  %4242 = vst.msk [vmem:[%s5236_s14 + $0x58] sm:$0xff] %vm1206_vm2, %v4206_v35  ;;  %v3076_v56 = vadd.f32 %v3040_v12, %v2962_v22  ;;  %v2790_v23 = vld [vmem:[#allocation2 + $0x133] sm:$0xff] }
 0x3e9   : > { %v3417_v11 = vld [vmem:[%s5236_s14 + $0x70] sm:$0xff] }
 0x3ea   : > { %v4353_v16 = vmax.f32 %v4317_v55, 0.0  ;;  %v3453_v33 = vadd.f32 %v3417_v11, %v6707_v4  ;;  %3112 = vst.msk [vmem:[%s5236_s14 + $0x78] sm:$0xff] %vm1206_vm2, %v3076_v56  ;;  %v6868_v8 = vpop.f32.mrf.mxu0 }
 0x3ec   : > { %4389 = vst.msk [vmem:[%s5236_s14 + $0x50] sm:$0xff] %vm1206_vm2, %v4353_v16  ;;  %v3794_v48 = vld [vmem:[%s5236_s14 + $0x68] sm:$0xff]  ;;  %4730 = vmatmul.msk.f32.gmra.mxu3 %vm891_vm1, %v2787_v54 }
 0x3ed   : > { %v3830_v1 = vadd.f32 %v3794_v48, %v6709_v46  ;;  %3489 = vst.msk [vmem:[%s5236_s14 + $0x70] sm:$0xff] %vm1206_vm2, %v3453_v33 }
 0x3ee   : > { %v4171_v37 = vld [vmem:[%s5236_s14 + $0x60] sm:$0xff] }
 0x3ef   : > { %v4278_v17 = vld [vmem:[%s5236_s14 + $0x58] sm:$0xff]  ;;  %v4207_v4 = vadd.f32 %v4171_v37, %v6715_v52  ;;  %3866 = vst.msk [vmem:[%s5236_s14 + $0x68] sm:$0xff] %vm1206_vm2, %v3830_v1  ;;  %v2965_v15 = vpop.f32.mrf.mxu3 }
 0x3f0   : > { %v4318_v46 = vadd.f32 %v6581_v5, %v4278_v17  ;;  %v3077_v39 = vadd.f32 %v3041_v38, %v2965_v15  ;;  %v3045_v38 = vld [vmem:[%s5236_s14 + $0xa0] sm:$0xff] }
 0x3f1   : > { %4243 = vst.msk [vmem:[%s5236_s14 + $0x60] sm:$0xff] %vm1206_vm2, %v4207_v4  ;;  %v3418_v52 = vld [vmem:[%s5236_s14 + $0x78] sm:$0xff] }
 0x3f2   : > { %v4354_v63 = vmax.f32 %v4318_v46, 0.0  ;;  %v3454_v28 = vadd.f32 %v3418_v52, %v6739_v62  ;;  %3113 = vst.msk [vmem:[%s5236_s14 + $0x80] sm:$0xff] %vm1206_vm2, %v3077_v39  ;;  %v6898_v18 = vpop.f32.mrf.mxu0 }
 0x3f4   : > { %4390 = vst.msk [vmem:[%s5236_s14 + $0x58] sm:$0xff] %vm1206_vm2, %v4354_v63  ;;  %v3795_v59 = vld [vmem:[%s5236_s14 + $0x70] sm:$0xff]  ;;  %4731 = vmatmul.msk.f32.gmra.mxu3 %vm891_vm1, %v2788_v44 }
 0x3f5   : > { %v3831_v58 = vadd.f32 %v3795_v59, %v6741_v51  ;;  %3490 = vst.msk [vmem:[%s5236_s14 + $0x78] sm:$0xff] %vm1206_vm2, %v3454_v28 }
 0x3f6   : > { %v4172_v53 = vld [vmem:[%s5236_s14 + $0x68] sm:$0xff] }
 0x3f7   : > { %v4208_v24 = vadd.f32 %v4172_v53, %v6747_v40  ;;  %3867 = vst.msk [vmem:[%s5236_s14 + $0x70] sm:$0xff] %vm1206_vm2, %v3831_v58  ;;  %v2968_v62 = vpop.f32.mrf.mxu3  ;;  %v6900_v40 = vpop.f32.mrf.mxu1 }
 0x3f8   : > { %v4279_v2 = vld [vmem:[%s5236_s14 + $0x60] sm:$0xff]  ;;  %v3078_v29 = vadd.f32 %v3042_v26, %v2968_v62  ;;  %v3046_v62 = vld [vmem:[%s5236_s14 + $0xa8] sm:$0xff] }
 0x3f9   : > { %v4319_v49 = vadd.f32 %v6581_v5, %v4279_v2  ;;  %4244 = vst.msk [vmem:[%s5236_s14 + $0x68] sm:$0xff] %vm1206_vm2, %v4208_v24  ;;  %v3419_v51 = vld [vmem:[%s5236_s14 + $0x80] sm:$0xff] }
 0x3fa   : > { %v3455_v25 = vadd.f32 %v3419_v51, %v6771_v27  ;;  %3114 = vst.msk [vmem:[%s5236_s14 + $0x88] sm:$0xff] %vm1206_vm2, %v3078_v29  ;;  %v6928_v9 = vpop.f32.mrf.mxu0 }
 0x3fb   : > { %v4355_v21 = vmax.f32 %v4319_v49, 0.0 }
 0x3fc   : > { %v3796_v13 = vld [vmem:[%s5236_s14 + $0x78] sm:$0xff]  ;;  %3491 = vst.msk [vmem:[%s5236_s14 + $0x80] sm:$0xff] %vm1206_vm2, %v3455_v25  ;;  %4732 = vmatmul.msk.f32.gmra.mxu3 %vm891_vm1, %v2789_v19 }
 0x3fd   : > { %4391 = vst.msk [vmem:[%s5236_s14 + $0x60] sm:$0xff] %vm1206_vm2, %v4355_v21  ;;  %v3832_v0 = vadd.f32 %v3796_v13, %v6773_v41 }
 0x3fe   : > { %v4173_v27 = vld [vmem:[%s5236_s14 + $0x70] sm:$0xff] }
 0x3ff   : > { %v4209_v34 = vadd.f32 %v4173_v27, %v6779_v50  ;;  %3868 = vst.msk [vmem:[%s5236_s14 + $0x78] sm:$0xff] %vm1206_vm2, %v3832_v0  ;;  %v2971_v30 = vpop.f32.mrf.mxu3  ;;  %v6930_v35 = vpop.f32.mrf.mxu1 }
 0x400   : > { %v4280_v14 = vld [vmem:[%s5236_s14 + $0x68] sm:$0xff]  ;;  %v3079_v20 = vadd.f32 %v3043_v10, %v2971_v30 }
 0x401   : > { %v4320_v60 = vadd.f32 %v6581_v5, %v4280_v14  ;;  %4245 = vst.msk [vmem:[%s5236_s14 + $0x70] sm:$0xff] %vm1206_vm2, %v4209_v34  ;;  %v3420_v42 = vld [vmem:[%s5236_s14 + $0x88] sm:$0xff]  ;;  %v3047_v34 = vld [vmem:[%s5236_s14 + $0xb0] sm:$0xff] }
 0x402   : > { %v3456_v41 = vadd.f32 %v3420_v42, %v6802_v3  ;;  %3115 = vst.msk [vmem:[%s5236_s14 + $0x90] sm:$0xff] %vm1206_vm2, %v3079_v20  ;;  %v6938_v3 = vpop.f32.mrf.mxu2  ;;  %v6960_v17 = vpop.f32.mrf.mxu0 }
 0x403   : > { %v4356_v50 = vmax.f32 %v4320_v60, 0.0  ;;  %v3797_v32 = vld [vmem:[%s5236_s14 + $0x80] sm:$0xff] }
 0x404   : > { %v3833_v61 = vadd.f32 %v3797_v32, %v6804_v6  ;;  %3492 = vst.msk [vmem:[%s5236_s14 + $0x88] sm:$0xff] %vm1206_vm2, %v3456_v41  ;;  %4733 = vmatmul.msk.f32.gmra.mxu3 %vm891_vm1, %v2790_v23  ;;  %v3044_v6 = vld [vmem:[%s5236_s14 + $0x98] sm:$0xff] }
 0x405   : > { %4392 = vst.msk [vmem:[%s5236_s14 + $0x68] sm:$0xff] %vm1206_vm2, %v4356_v50 }
 0x406   : > { %v4174_v22 = vld [vmem:[%s5236_s14 + $0x78] sm:$0xff]  ;;  %3869 = vst.msk [vmem:[%s5236_s14 + $0x80] sm:$0xff] %vm1206_vm2, %v3833_v61 }
 0x407   : > { %v4210_v12 = vadd.f32 %v4174_v22, %v6812_v31  ;;  %v2974_v55 = vpop.f32.mrf.mxu3  ;;  %v6962_v4 = vpop.f32.mrf.mxu1  ;;  %v3048_v22 = vld [vmem:[%s5236_s14 + $0xb8] sm:$0xff] }
 0x408   : > { %v4281_v56 = vld [vmem:[%s5236_s14 + $0x70] sm:$0xff]  ;;  %v3080_v11 = vadd.f32 %v3044_v6, %v2974_v55 }
 0x409   : > { %v4321_v16 = vadd.f32 %v6581_v5, %v4281_v56  ;;  %4246 = vst.msk [vmem:[%s5236_s14 + $0x78] sm:$0xff] %vm1206_vm2, %v4210_v12  ;;  %v3421_v33 = vld [vmem:[%s5236_s14 + $0x90] sm:$0xff] }
 0x40a   : > { %v3457_v54 = vadd.f32 %v3421_v33, %v6837_v36  ;;  %3116 = vst.msk [vmem:[%s5236_s14 + $0x98] sm:$0xff] %vm1206_vm2, %v3080_v11  ;;  %v6967_v15 = vpop.f32.mrf.mxu2  ;;  %v6990_v26 = vpop.f32.mrf.mxu0 }
 0x40b   : > { %v4357_v48 = vmax.f32 %v4321_v16, 0.0  ;;  %v3798_v1 = vld [vmem:[%s5236_s14 + $0x88] sm:$0xff] }
 0x40c   : > { %v3834_v31 = vadd.f32 %v3798_v1, %v6839_v7  ;;  %3493 = vst.msk [vmem:[%s5236_s14 + $0x90] sm:$0xff] %vm1206_vm2, %v3457_v54 }
 0x40d   : > { %4393 = vst.msk [vmem:[%s5236_s14 + $0x70] sm:$0xff] %vm1206_vm2, %v4357_v48  ;;  %v4175_v37 = vld [vmem:[%s5236_s14 + $0x80] sm:$0xff] }
 0x40e   : > { %v4211_v36 = vadd.f32 %v4175_v37, %v6845_v43  ;;  %3870 = vst.msk [vmem:[%s5236_s14 + $0x88] sm:$0xff] %vm1206_vm2, %v3834_v31 }
 0x40f   : > { %v2977_v7 = vpop.f32.mrf.mxu3 }
 0x410   : > { %v4282_v46 = vld [vmem:[%s5236_s14 + $0x78] sm:$0xff]  ;;  %4247 = vst.msk [vmem:[%s5236_s14 + $0x80] sm:$0xff] %vm1206_vm2, %v4211_v36  ;;  %v3081_v39 = vadd.f32 %v3045_v38, %v2977_v7 }
 0x411   : > { %v4322_v52 = vadd.f32 %v6581_v5, %v4282_v46  ;;  %v3422_v63 = vld [vmem:[%s5236_s14 + $0x98] sm:$0xff] }
 0x412   : > { %v3458_v43 = vadd.f32 %v3422_v63, %v6868_v8  ;;  %3117 = vst.msk [vmem:[%s5236_s14 + $0xa0] sm:$0xff] %vm1206_vm2, %v3081_v39  ;;  %v6997_v29 = vpop.f32.mrf.mxu2  ;;  %v3367_v14 = vpop.f32.mrf.mxu0 }
 0x413   : > { %v4358_v28 = vmax.f32 %v4322_v52, 0.0  ;;  %v3799_v44 = vld [vmem:[%s5236_s14 + $0x90] sm:$0xff] }
 0x414   : > { %v3835_v59 = vadd.f32 %v3799_v44, %v6870_v45  ;;  %3494 = vst.msk [vmem:[%s5236_s14 + $0x98] sm:$0xff] %vm1206_vm2, %v3458_v43  ;;  %v6992_v45 = vpop.f32.mrf.mxu1 }
 0x415   : > { %4394 = vst.msk [vmem:[%s5236_s14 + $0x78] sm:$0xff] %vm1206_vm2, %v4358_v28  ;;  %v4176_v58 = vld [vmem:[%s5236_s14 + $0x88] sm:$0xff] }
 0x416   : > { %v4212_v53 = vadd.f32 %v4176_v58, %v6875_v47  ;;  %3871 = vst.msk [vmem:[%s5236_s14 + $0x90] sm:$0xff] %vm1206_vm2, %v3835_v59  ;;  %v3050_v58 = vld [vmem:[%s5236_s14 + $0xc8] sm:$0xff] }
 0x417   : > { %v4283_v8 = vld [vmem:[%s5236_s14 + $0x80] sm:$0xff]  ;;  %v2980_v24 = vpop.f32.mrf.mxu3 }
 0x418   : > { %v4323_v2 = vadd.f32 %v6581_v5, %v4283_v8  ;;  %4248 = vst.msk [vmem:[%s5236_s14 + $0x88] sm:$0xff] %vm1206_vm2, %v4212_v53  ;;  %v3082_v47 = vadd.f32 %v3046_v62, %v2980_v24 }
 0x419   : > { %v3423_v49 = vld [vmem:[%s5236_s14 + $0xa0] sm:$0xff] }
 0x41a   : > { %v4359_v51 = vmax.f32 %v4323_v2, 0.0  ;;  %v3459_v25 = vadd.f32 %v3423_v49, %v6898_v18  ;;  %3118 = vst.msk [vmem:[%s5236_s14 + $0xa8] sm:$0xff] %vm1206_vm2, %v3082_v47  ;;  %v7024_v42 = vpop.f32.mrf.mxu2 }
 0x41b   : > { %v3800_v21 = vld [vmem:[%s5236_s14 + $0x98] sm:$0xff] }
 0x41c   : > { %4395 = vst.msk [vmem:[%s5236_s14 + $0x80] sm:$0xff] %vm1206_vm2, %v4359_v51  ;;  %v3836_v19 = vadd.f32 %v3800_v21, %v6900_v40  ;;  %v7019_v20 = vpop.f32.mrf.mxu1 }
 0x41d   : > { %v4177_v13 = vld [vmem:[%s5236_s14 + $0x90] sm:$0xff]  ;;  %3495 = vst.msk [vmem:[%s5236_s14 + $0xa0] sm:$0xff] %vm1206_vm2, %v3459_v25 }
 0x41e   : > { %v4213_v0 = vadd.f32 %v4177_v13, %v6905_v57  ;;  %3872 = vst.msk [vmem:[%s5236_s14 + $0x98] sm:$0xff] %vm1206_vm2, %v3836_v19  ;;  %v3051_v25 = vld [vmem:[%s5236_s14 + $0xd0] sm:$0xff] }
 0x41f   : > { %v4284_v27 = vld [vmem:[%s5236_s14 + $0x88] sm:$0xff]  ;;  %v2983_v18 = vpop.f32.mrf.mxu3 }
 0x420   : > { %v4324_v30 = vadd.f32 %v6581_v5, %v4284_v27  ;;  %4249 = vst.msk [vmem:[%s5236_s14 + $0x90] sm:$0xff] %vm1206_vm2, %v4213_v0  ;;  %v3083_v40 = vadd.f32 %v3047_v34, %v2983_v18 }
 0x421   : > { %v3424_v10 = vld [vmem:[%s5236_s14 + $0xa8] sm:$0xff] }
 0x422   : > { %v4360_v57 = vmax.f32 %v4324_v30, 0.0  ;;  %v3460_v60 = vadd.f32 %v3424_v10, %v6928_v9  ;;  %3119 = vst.msk [vmem:[%s5236_s14 + $0xb0] sm:$0xff] %vm1206_vm2, %v3083_v40  ;;  %v4120_v33 = vpop.f32.mrf.mxu2 }
 0x424   : > { %4396 = vst.msk [vmem:[%s5236_s14 + $0x88] sm:$0xff] %vm1206_vm2, %v4360_v57  ;;  %v3801_v41 = vld [vmem:[%s5236_s14 + $0xa0] sm:$0xff]  ;;  %v3745_v11 = vpop.f32.mrf.mxu1 }
 0x425   : > { %v4178_v50 = vld [vmem:[%s5236_s14 + $0x98] sm:$0xff]  ;;  %v3837_v32 = vadd.f32 %v3801_v41, %v6930_v35  ;;  %3496 = vst.msk [vmem:[%s5236_s14 + $0xa8] sm:$0xff] %vm1206_vm2, %v3460_v60 }
 0x426   : > { %v4214_v23 = vadd.f32 %v4178_v50, %v6938_v3  ;;  %v3370_v3 = vpop.f32.mrf.mxu0 }
 0x427   : > { %v4285_v61 = vld [vmem:[%s5236_s14 + $0x90] sm:$0xff]  ;;  %3873 = vst.msk [vmem:[%s5236_s14 + $0xa0] sm:$0xff] %vm1206_vm2, %v3837_v32  ;;  %v2986_v9 = vpop.f32.mrf.mxu3 }
 0x428   : > { %v4325_v12 = vadd.f32 %v6581_v5, %v4285_v61  ;;  %4250 = vst.msk [vmem:[%s5236_s14 + $0x98] sm:$0xff] %vm1206_vm2, %v4214_v23  ;;  %v3084_v35 = vadd.f32 %v3048_v22, %v2986_v9 }
 0x429   : > { %v3425_v55 = vld [vmem:[%s5236_s14 + $0xb0] sm:$0xff] }
 0x42a   : > { %v4361_v6 = vmax.f32 %v4325_v12, 0.0  ;;  %v3461_v56 = vadd.f32 %v3425_v55, %v6960_v17  ;;  %3120 = vst.msk [vmem:[%s5236_s14 + $0xb8] sm:$0xff] %vm1206_vm2, %v3084_v35  ;;  %v3049_v17 = vld [vmem:[%s5236_s14 + $0xc0] sm:$0xff]  ;;  %v4123_v28 = vpop.f32.mrf.mxu2 }
 0x42c   : > { %4397 = vst.msk [vmem:[%s5236_s14 + $0x90] sm:$0xff] %vm1206_vm2, %v4361_v6  ;;  %v3802_v16 = vld [vmem:[%s5236_s14 + $0xa8] sm:$0xff]  ;;  %v3748_v63 = vpop.f32.mrf.mxu1 }
 0x42d   : > { %v3838_v54 = vadd.f32 %v3802_v16, %v6962_v4  ;;  %3497 = vst.msk [vmem:[%s5236_s14 + $0xb0] sm:$0xff] %vm1206_vm2, %v3461_v56  ;;  %v3053_v16 = vld [vmem:[%s5236_s14 + $0xe0] sm:$0xff] }
 0x42e   : > { %v4179_v48 = vld [vmem:[%s5236_s14 + $0xa0] sm:$0xff]  ;;  %v3373_v52 = vpop.f32.mrf.mxu0 }
 0x42f   : > { %v4286_v1 = vld [vmem:[%s5236_s14 + $0x98] sm:$0xff]  ;;  %v4215_v31 = vadd.f32 %v4179_v48, %v6967_v15  ;;  %3874 = vst.msk [vmem:[%s5236_s14 + $0xa8] sm:$0xff] %vm1206_vm2, %v3838_v54  ;;  %v2989_v37 = vpop.f32.mrf.mxu3 }
 0x430   : > { %v4326_v36 = vadd.f32 %v6581_v5, %v4286_v1  ;;  %v3085_v7 = vadd.f32 %v3049_v17, %v2989_v37 }
 0x431   : > { %4251 = vst.msk [vmem:[%s5236_s14 + $0xa0] sm:$0xff] %vm1206_vm2, %v4215_v31  ;;  %v3426_v4 = vld [vmem:[%s5236_s14 + $0xb8] sm:$0xff] }
 0x432   : > { %v4362_v38 = vmax.f32 %v4326_v36, 0.0  ;;  %v3462_v46 = vadd.f32 %v3426_v4, %v6990_v26  ;;  %3121 = vst.msk [vmem:[%s5236_s14 + $0xc0] sm:$0xff] %vm1206_vm2, %v3085_v7  ;;  %v4126_v18 = vpop.f32.mrf.mxu2 }
 0x434   : > { %4398 = vst.msk [vmem:[%s5236_s14 + $0x98] sm:$0xff] %vm1206_vm2, %v4362_v38  ;;  %v3803_v15 = vld [vmem:[%s5236_s14 + $0xb0] sm:$0xff]  ;;  %v3751_v19 = vpop.f32.mrf.mxu1 }
 0x435   : > { %v3839_v39 = vadd.f32 %v3803_v15, %v6992_v45  ;;  %3498 = vst.msk [vmem:[%s5236_s14 + $0xb8] sm:$0xff] %vm1206_vm2, %v3462_v46 }
 0x436   : > { %v4180_v43 = vld [vmem:[%s5236_s14 + $0xa8] sm:$0xff]  ;;  %v3376_v21 = vpop.f32.mrf.mxu0 }
 0x437   : > { %v4216_v44 = vadd.f32 %v4180_v43, %v6997_v29  ;;  %3875 = vst.msk [vmem:[%s5236_s14 + $0xb0] sm:$0xff] %vm1206_vm2, %v3839_v39  ;;  %v2992_v59 = vpop.f32.mrf.mxu3 }
 0x438   : > { %v4287_v53 = vld [vmem:[%s5236_s14 + $0xa0] sm:$0xff]  ;;  %v3086_v8 = vadd.f32 %v3050_v58, %v2992_v59 }
 0x439   : > { %v4327_v24 = vadd.f32 %v6581_v5, %v4287_v53  ;;  %4252 = vst.msk [vmem:[%s5236_s14 + $0xa8] sm:$0xff] %vm1206_vm2, %v4216_v44  ;;  %v3427_v62 = vld [vmem:[%s5236_s14 + $0xc0] sm:$0xff] }
 0x43a   : > { %v3463_v26 = vadd.f32 %v3427_v62, %v3367_v14  ;;  %3122 = vst.msk [vmem:[%s5236_s14 + $0xc8] sm:$0xff] %vm1206_vm2, %v3086_v8  ;;  %v4129_v35 = vpop.f32.mrf.mxu2 }
 0x43b   : > { %v4363_v45 = vmax.f32 %v4327_v24, 0.0 }
 0x43c   : > { %v3804_v2 = vld [vmem:[%s5236_s14 + $0xb8] sm:$0xff]  ;;  %3499 = vst.msk [vmem:[%s5236_s14 + $0xc0] sm:$0xff] %vm1206_vm2, %v3463_v26  ;;  %v3754_v9 = vpop.f32.mrf.mxu1 }
 0x43d   : > { %4399 = vst.msk [vmem:[%s5236_s14 + $0xa0] sm:$0xff] %vm1206_vm2, %v4363_v45  ;;  %v3840_v47 = vadd.f32 %v3804_v2, %v7019_v20 }
 0x43e   : > { %v4181_v29 = vld [vmem:[%s5236_s14 + $0xb0] sm:$0xff]  ;;  %v3379_v61 = vpop.f32.mrf.mxu0 }
 0x43f   : > { %v4217_v49 = vadd.f32 %v4181_v29, %v7024_v42  ;;  %3876 = vst.msk [vmem:[%s5236_s14 + $0xb8] sm:$0xff] %vm1206_vm2, %v3840_v47  ;;  %v2995_v51 = vpop.f32.mrf.mxu3  ;;  %v3052_v42 = vld [vmem:[%s5236_s14 + $0xd8] sm:$0xff] }
 0x440   : > { %v4288_v13 = vld [vmem:[%s5236_s14 + $0xa8] sm:$0xff]  ;;  %v3087_v0 = vadd.f32 %v3051_v25, %v2995_v51 }
 0x441   : > { %v4328_v27 = vadd.f32 %v6581_v5, %v4288_v13  ;;  %4253 = vst.msk [vmem:[%s5236_s14 + $0xb0] sm:$0xff] %vm1206_vm2, %v4217_v49  ;;  %v3428_v34 = vld [vmem:[%s5236_s14 + $0xc8] sm:$0xff]  ;;  %v3055_v49 = vld [vmem:[%s5236_s14 + $0xf0] sm:$0xff] }
 0x442   : > { %v3464_v30 = vadd.f32 %v3428_v34, %v3370_v3  ;;  %3123 = vst.msk [vmem:[%s5236_s14 + $0xd0] sm:$0xff] %vm1206_vm2, %v3087_v0  ;;  %v4132_v38 = vpop.f32.mrf.mxu2 }
 0x443   : > { %v4364_v40 = vmax.f32 %v4328_v27, 0.0  ;;  %v3805_v10 = vld [vmem:[%s5236_s14 + $0xc0] sm:$0xff] }
 0x444   : > { %v3841_v14 = vadd.f32 %v3805_v10, %v3745_v11  ;;  %3500 = vst.msk [vmem:[%s5236_s14 + $0xc8] sm:$0xff] %vm1206_vm2, %v3464_v30  ;;  %v3757_v7 = vpop.f32.mrf.mxu1  ;;  %v3056_v10 = vld [vmem:[%s5236_s14 + $0xf8] sm:$0xff] }
 0x445   : > { %4400 = vst.msk [vmem:[%s5236_s14 + $0xa8] sm:$0xff] %vm1206_vm2, %v4364_v40 }
 0x446   : > { %v4182_v20 = vld [vmem:[%s5236_s14 + $0xb8] sm:$0xff]  ;;  %3877 = vst.msk [vmem:[%s5236_s14 + $0xc0] sm:$0xff] %vm1206_vm2, %v3841_v14  ;;  %v3382_v36 = vpop.f32.mrf.mxu0 }
 0x447   : > { %v4218_v57 = vadd.f32 %v4182_v20, %v4120_v33  ;;  %v2998_v60 = vpop.f32.mrf.mxu3 }
 0x448   : > { %v4289_v41 = vld [vmem:[%s5236_s14 + $0xb0] sm:$0xff]  ;;  %v3088_v50 = vadd.f32 %v3052_v42, %v2998_v60 }
 0x449   : > { %v4329_v32 = vadd.f32 %v6581_v5, %v4289_v41  ;;  %4254 = vst.msk [vmem:[%s5236_s14 + $0xb8] sm:$0xff] %vm1206_vm2, %v4218_v57  ;;  %v3429_v23 = vld [vmem:[%s5236_s14 + $0xd0] sm:$0xff] }
 0x44a   : > { %v3465_v22 = vadd.f32 %v3429_v23, %v3373_v52  ;;  %3124 = vst.msk [vmem:[%s5236_s14 + $0xd8] sm:$0xff] %vm1206_vm2, %v3088_v50  ;;  %v3054_v52 = vld [vmem:[%s5236_s14 + $0xe8] sm:$0xff]  ;;  %v4135_v2 = vpop.f32.mrf.mxu2 }
 0x44b   : > { %v4365_v12 = vmax.f32 %v4329_v32, 0.0  ;;  %v3806_v55 = vld [vmem:[%s5236_s14 + $0xc8] sm:$0xff] }
 0x44c   : > { %v3842_v6 = vadd.f32 %v3806_v55, %v3748_v63  ;;  %3501 = vst.msk [vmem:[%s5236_s14 + $0xd0] sm:$0xff] %vm1206_vm2, %v3465_v22  ;;  %v7145_v63 = vld [vmem:[%s7305_s5] ss:$0 sm:$0xff]  ;;  %v3760_v26 = vpop.f32.mrf.mxu1 }
 0x44d   : > { %4401 = vst.msk [vmem:[%s5236_s14 + $0xb0] sm:$0xff] %vm1206_vm2, %v4365_v12  ;;  %v4183_v56 = vld [vmem:[%s5236_s14 + $0xc0] sm:$0xff] }
 0x44e   : > { %v4219_v3 = vadd.f32 %v4183_v56, %v4123_v28  ;;  %3878 = vst.msk [vmem:[%s5236_s14 + $0xc8] sm:$0xff] %vm1206_vm2, %v3842_v6  ;;  %v3385_v62 = vpop.f32.mrf.mxu0  ;;  %v3057_v55 = vld [vmem:[%s5236_s14 + $0x100] sm:$0xff] }
 0x44f   : > { %v3001_v11 = vpop.f32.mrf.mxu3 }
 0x450   : > { %v4290_v33 = vld [vmem:[%s5236_s14 + $0xb8] sm:$0xff]  ;;  %4255 = vst.msk [vmem:[%s5236_s14 + $0xc0] sm:$0xff] %vm1206_vm2, %v4219_v3  ;;  %v3089_v54 = vadd.f32 %v3053_v16, %v3001_v11 }
 0x451   : > { %v4330_v48 = vadd.f32 %v6581_v5, %v4290_v33  ;;  %v3430_v1 = vld [vmem:[%s5236_s14 + $0xd8] sm:$0xff] }
 0x452   : > { %v3466_v31 = vadd.f32 %v3430_v1, %v3376_v21  ;;  %3125 = vst.msk [vmem:[%s5236_s14 + $0xe0] sm:$0xff] %vm1206_vm2, %v3089_v54  ;;  %v4138_v42 = vpop.f32.mrf.mxu2 }
 0x453   : > { %v4366_v37 = vmax.f32 %v4330_v48, 0.0  ;;  %v3807_v17 = vld [vmem:[%s5236_s14 + $0xd0] sm:$0xff] }
 0x454   : > { %v3843_v4 = vadd.f32 %v3807_v17, %v3751_v19  ;;  %3502 = vst.msk [vmem:[%s5236_s14 + $0xd8] sm:$0xff] %vm1206_vm2, %v3466_v31  ;;  %v3763_v20 = vpop.f32.mrf.mxu1 }
 0x455   : > { %4402 = vst.msk [vmem:[%s5236_s14 + $0xb8] sm:$0xff] %vm1206_vm2, %v4366_v37  ;;  %v4184_v5 = vld [vmem:[%s5236_s14 + $0xc8] sm:$0xff] }
 0x456   : > { %v4220_v46 = vadd.f32 %v4184_v5, %v4126_v18  ;;  %3879 = vst.msk [vmem:[%s5236_s14 + $0xd0] sm:$0xff] %vm1206_vm2, %v3843_v4  ;;  %v3388_v14 = vpop.f32.mrf.mxu0 }
 0x457   : > { %v4291_v15 = vld [vmem:[%s5236_s14 + $0xc0] sm:$0xff]  ;;  %v3004_v39 = vpop.f32.mrf.mxu3 }
 0x458   : > { %v4331_v43 = vadd.f32 %v7145_v63, %v4291_v15  ;;  %4256 = vst.msk [vmem:[%s5236_s14 + $0xc8] sm:$0xff] %vm1206_vm2, %v4220_v46  ;;  %v3090_v28 = vadd.f32 %v3054_v52, %v3004_v39 }
 0x459   : > { %v3431_v44 = vld [vmem:[%s5236_s14 + $0xe0] sm:$0xff] }
 0x45a   : > { %v4367_v59 = vmax.f32 %v4331_v43, 0.0  ;;  %v3467_v58 = vadd.f32 %v3431_v44, %v3379_v61  ;;  %3126 = vst.msk [vmem:[%s5236_s14 + $0xe8] sm:$0xff] %vm1206_vm2, %v3090_v28  ;;  %v4141_v48 = vpop.f32.mrf.mxu2 }
 0x45b   : > { %v3808_v53 = vld [vmem:[%s5236_s14 + $0xd8] sm:$0xff] }
 0x45c   : > { %4403 = vst.msk [vmem:[%s5236_s14 + $0xc0] sm:$0xff] %vm1206_vm2, %v4367_v59  ;;  %v3844_v8 = vadd.f32 %v3808_v53, %v3754_v9  ;;  %v3766_v16 = vpop.f32.mrf.mxu1 }
 0x45d   : > { %v4185_v24 = vld [vmem:[%s5236_s14 + $0xd0] sm:$0xff]  ;;  %3503 = vst.msk [vmem:[%s5236_s14 + $0xe0] sm:$0xff] %vm1206_vm2, %v3467_v58 }
 0x45e   : > { %v4221_v45 = vadd.f32 %v4185_v24, %v4129_v35  ;;  %3880 = vst.msk [vmem:[%s5236_s14 + $0xd8] sm:$0xff] %vm1206_vm2, %v3844_v8  ;;  %v3391_v11 = vpop.f32.mrf.mxu0  ;;  %v3059_v24 = vld [vmem:[%s5236_s14 + $0x110] sm:$0xff] }
 0x45f   : > { %v4292_v47 = vld [vmem:[%s5236_s14 + $0xc8] sm:$0xff]  ;;  %v3007_v29 = vpop.f32.mrf.mxu3 }
 0x460   : > { %v4332_v51 = vadd.f32 %v7145_v63, %v4292_v47  ;;  %4257 = vst.msk [vmem:[%s5236_s14 + $0xd0] sm:$0xff] %vm1206_vm2, %v4221_v45  ;;  %v3091_v25 = vadd.f32 %v3055_v49, %v3007_v29 }
 0x461   : > { %v3432_v21 = vld [vmem:[%s5236_s14 + $0xe8] sm:$0xff] }
 0x462   : > { %v4368_v19 = vmax.f32 %v4332_v51, 0.0  ;;  %v3468_v13 = vadd.f32 %v3432_v21, %v3382_v36  ;;  %3127 = vst.msk [vmem:[%s5236_s14 + $0xf0] sm:$0xff] %vm1206_vm2, %v3091_v25  ;;  %v4144_v44 = vpop.f32.mrf.mxu2 }
 0x464   : > { %4404 = vst.msk [vmem:[%s5236_s14 + $0xc8] sm:$0xff] %vm1206_vm2, %v4368_v19  ;;  %v3809_v0 = vld [vmem:[%s5236_s14 + $0xe0] sm:$0xff]  ;;  %v3769_v43 = vpop.f32.mrf.mxu1 }
 0x465   : > { %v4186_v27 = vld [vmem:[%s5236_s14 + $0xd8] sm:$0xff]  ;;  %v3845_v18 = vadd.f32 %v3809_v0, %v3757_v7  ;;  %3504 = vst.msk [vmem:[%s5236_s14 + $0xe8] sm:$0xff] %vm1206_vm2, %v3468_v13  ;;  %v3058_v7 = vld [vmem:[%s5236_s14 + $0x108] sm:$0xff] }
 0x466   : > { %v4222_v34 = vadd.f32 %v4186_v27, %v4132_v38  ;;  %v3394_v52 = vpop.f32.mrf.mxu0 }
 0x467   : > { %v4293_v30 = vld [vmem:[%s5236_s14 + $0xd0] sm:$0xff]  ;;  %3881 = vst.msk [vmem:[%s5236_s14 + $0xe0] sm:$0xff] %vm1206_vm2, %v3845_v18  ;;  %v3010_v40 = vpop.f32.mrf.mxu3  ;;  %v3060_v18 = vld [vmem:[%s5236_s14 + $0x118] sm:$0xff] }
 0x468   : > { %v4333_v57 = vadd.f32 %v7145_v63, %v4293_v30  ;;  %4258 = vst.msk [vmem:[%s5236_s14 + $0xd8] sm:$0xff] %vm1206_vm2, %v4222_v34  ;;  %v3092_v60 = vadd.f32 %v3056_v10, %v3010_v40 }
 0x469   : > { %v3433_v41 = vld [vmem:[%s5236_s14 + $0xf0] sm:$0xff] }
 0x46a   : > { %v4369_v50 = vmax.f32 %v4333_v57, 0.0  ;;  %v3469_v32 = vadd.f32 %v3433_v41, %v3385_v62  ;;  %3128 = vst.msk [vmem:[%s5236_s14 + $0xf8] sm:$0xff] %vm1206_vm2, %v3092_v60  ;;  %v4147_v13 = vpop.f32.mrf.mxu2 }
 0x46c   : > { %4405 = vst.msk [vmem:[%s5236_s14 + $0xd0] sm:$0xff] %vm1206_vm2, %v4369_v50  ;;  %v3810_v23 = vld [vmem:[%s5236_s14 + $0xe8] sm:$0xff]  ;;  %v3772_v21 = vpop.f32.mrf.mxu1 }
 0x46d   : > { %v3846_v61 = vadd.f32 %v3810_v23, %v3760_v26  ;;  %3505 = vst.msk [vmem:[%s5236_s14 + $0xf0] sm:$0xff] %vm1206_vm2, %v3469_v32 }
 0x46e   : > { %v4187_v9 = vld [vmem:[%s5236_s14 + $0xe0] sm:$0xff]  ;;  %v3397_v25 = vpop.f32.mrf.mxu0 }
 0x46f   : > { %v4294_v22 = vld [vmem:[%s5236_s14 + $0xd8] sm:$0xff]  ;;  %v4223_v12 = vadd.f32 %v4187_v9, %v4135_v2  ;;  %3882 = vst.msk [vmem:[%s5236_s14 + $0xe8] sm:$0xff] %vm1206_vm2, %v3846_v61  ;;  %v3013_v35 = vpop.f32.mrf.mxu3 }
 0x470   : > { %v4334_v6 = vadd.f32 %v7145_v63, %v4294_v22  ;;  %v3093_v56 = vadd.f32 %v3057_v55, %v3013_v35 }
 0x471   : > { %4259 = vst.msk [vmem:[%s5236_s14 + $0xe0] sm:$0xff] %vm1206_vm2, %v4223_v12  ;;  %v3434_v3 = vld [vmem:[%s5236_s14 + $0xf8] sm:$0xff] }
 0x472   : > { %v4370_v33 = vmax.f32 %v4334_v6, 0.0  ;;  %v3470_v54 = vadd.f32 %v3434_v3, %v3388_v14  ;;  %3129 = vst.msk [vmem:[%s5236_s14 + $0x100] sm:$0xff] %vm1206_vm2, %v3093_v56  ;;  %v4150_v61 = vpop.f32.mrf.mxu2 }
 0x474   : > { %4406 = vst.msk [vmem:[%s5236_s14 + $0xd8] sm:$0xff] %vm1206_vm2, %v4370_v33  ;;  %v3811_v1 = vld [vmem:[%s5236_s14 + $0xf0] sm:$0xff]  ;;  %v3775_v23 = vpop.f32.mrf.mxu1 }
 0x475   : > { %v3847_v31 = vadd.f32 %v3811_v1, %v3763_v20  ;;  %3506 = vst.msk [vmem:[%s5236_s14 + $0xf8] sm:$0xff] %vm1206_vm2, %v3470_v54 }
 0x476   : > { %v4188_v37 = vld [vmem:[%s5236_s14 + $0xe8] sm:$0xff]  ;;  %v3400_v50 = vpop.f32.mrf.mxu0 }
 0x477   : > { %v4224_v17 = vadd.f32 %v4188_v37, %v4138_v42  ;;  %3883 = vst.msk [vmem:[%s5236_s14 + $0xf0] sm:$0xff] %vm1206_vm2, %v3847_v31  ;;  %v3016_v36 = vpop.f32.mrf.mxu3 }
 0x478   : > { %v4295_v4 = vld [vmem:[%s5236_s14 + $0xe0] sm:$0xff]  ;;  %v3094_v38 = vadd.f32 %v3058_v7, %v3016_v36 }
 0x479   : > { %v4335_v5 = vadd.f32 %v7145_v63, %v4295_v4  ;;  %4260 = vst.msk [vmem:[%s5236_s14 + $0xe8] sm:$0xff] %vm1206_vm2, %v4224_v17  ;;  %v3435_v46 = vld [vmem:[%s5236_s14 + $0x100] sm:$0xff] }
 0x47a   : > { %v3471_v15 = vadd.f32 %v3435_v46, %v3391_v11  ;;  %3130 = vst.msk [vmem:[%s5236_s14 + $0x108] sm:$0xff] %vm1206_vm2, %v3094_v38 }
 0x47b   : > { %v4371_v39 = vmax.f32 %v4335_v5, 0.0 }
 0x47c   : > { %v3812_v28 = vld [vmem:[%s5236_s14 + $0xf8] sm:$0xff]  ;;  %3507 = vst.msk [vmem:[%s5236_s14 + $0x100] sm:$0xff] %vm1206_vm2, %v3471_v15  ;;  %v3778_v54 = vpop.f32.mrf.mxu1 }
 0x47d   : > { %4407 = vst.msk [vmem:[%s5236_s14 + $0xe0] sm:$0xff] %vm1206_vm2, %v4371_v39  ;;  %v3848_v59 = vadd.f32 %v3812_v28, %v3766_v16 }
 0x47e   : > { %v4189_v58 = vld [vmem:[%s5236_s14 + $0xf0] sm:$0xff] }
 0x47f   : > { %v4225_v53 = vadd.f32 %v4189_v58, %v4141_v48  ;;  %3884 = vst.msk [vmem:[%s5236_s14 + $0xf8] sm:$0xff] %vm1206_vm2, %v3848_v59  ;;  %v3019_v8 = vpop.f32.mrf.mxu3  ;;  %v4153_v48 = vpop.f32.mrf.mxu2 }
 0x480   : > { %v4296_v62 = vld [vmem:[%s5236_s14 + $0xe8] sm:$0xff]  ;;  %v3095_v26 = vadd.f32 %v3059_v24, %v3019_v8 }
 0x481   : > { %v4336_v45 = vadd.f32 %v7145_v63, %v4296_v62  ;;  %4261 = vst.msk [vmem:[%s5236_s14 + $0xf0] sm:$0xff] %vm1206_vm2, %v4225_v53  ;;  %v3436_v2 = vld [vmem:[%s5236_s14 + $0x108] sm:$0xff] }
 0x482   : > { %v3472_v47 = vadd.f32 %v3436_v2, %v3394_v52  ;;  %3131 = vst.msk [vmem:[%s5236_s14 + $0x110] sm:$0xff] %vm1206_vm2, %v3095_v26 }
 0x483   : > { %v4372_v29 = vmax.f32 %v4336_v45, 0.0  ;;  %v3813_v49 = vld [vmem:[%s5236_s14 + $0x100] sm:$0xff] }
 0x484   : > { %v3849_v51 = vadd.f32 %v3813_v49, %v3769_v43  ;;  %3508 = vst.msk [vmem:[%s5236_s14 + $0x108] sm:$0xff] %vm1206_vm2, %v3472_v47 }
 0x485   : > { %4408 = vst.msk [vmem:[%s5236_s14 + $0xe8] sm:$0xff] %vm1206_vm2, %v4372_v29 }
 0x486   : > { %v4190_v19 = vld [vmem:[%s5236_s14 + $0xf8] sm:$0xff]  ;;  %3885 = vst.msk [vmem:[%s5236_s14 + $0x100] sm:$0xff] %vm1206_vm2, %v3849_v51 }
 0x487   : > { %v4226_v0 = vadd.f32 %v4190_v19, %v4144_v44  ;;  %v3022_v27 = vpop.f32.mrf.mxu3  ;;  %v4156_v38 = vpop.f32.mrf.mxu2 }
 0x488   : > { %v4297_v34 = vld [vmem:[%s5236_s14 + $0xf0] sm:$0xff]  ;;  %v3096_v30 = vadd.f32 %v3060_v18, %v3022_v27 }
 0x489   : > { %v4337_v40 = vadd.f32 %v7145_v63, %v4297_v34  ;;  %4262 = vst.msk [vmem:[%s5236_s14 + $0xf8] sm:$0xff] %vm1206_vm2, %v4226_v0  ;;  %v3437_v10 = vld [vmem:[%s5236_s14 + $0x110] sm:$0xff] }
 0x48a   : > { %v3473_v14 = vadd.f32 %v3437_v10, %v3397_v25  ;;  %3132 = vst.msk [vmem:[%s5236_s14 + $0x118] sm:$0xff] %vm1206_vm2, %v3096_v30 }
 0x48b   : > { %v4373_v20 = vmax.f32 %v4337_v40, 0.0  ;;  %v3814_v57 = vld [vmem:[%s5236_s14 + $0x108] sm:$0xff] }
 0x48c   : > { %v3850_v60 = vadd.f32 %v3814_v57, %v3772_v21  ;;  %3509 = vst.msk [vmem:[%s5236_s14 + $0x110] sm:$0xff] %vm1206_vm2, %v3473_v14 }
 0x48d   : > { %4409 = vst.msk [vmem:[%s5236_s14 + $0xf0] sm:$0xff] %vm1206_vm2, %v4373_v20  ;;  %v4191_v42 = vld [vmem:[%s5236_s14 + $0x100] sm:$0xff] }
 0x48e   : > { %v4227_v41 = vadd.f32 %v4191_v42, %v4147_v13  ;;  %3886 = vst.msk [vmem:[%s5236_s14 + $0x108] sm:$0xff] %vm1206_vm2, %v3850_v60 }
 0x490   : > { %v4298_v32 = vld [vmem:[%s5236_s14 + $0xf8] sm:$0xff]  ;;  %4263 = vst.msk [vmem:[%s5236_s14 + $0x100] sm:$0xff] %vm1206_vm2, %v4227_v41 }
 0x491   : > { %v4338_v9 = vadd.f32 %v7145_v63, %v4298_v32  ;;  %v3438_v22 = vld [vmem:[%s5236_s14 + $0x118] sm:$0xff] }
 0x492   : > { %v3474_v12 = vadd.f32 %v3438_v22, %v3400_v50 }
 0x493   : > { %v4374_v35 = vmax.f32 %v4338_v9, 0.0  ;;  %v3815_v55 = vld [vmem:[%s5236_s14 + $0x110] sm:$0xff] }
 0x494   : > { %v3851_v6 = vadd.f32 %v3815_v55, %v3775_v23  ;;  %3510 = vst.msk [vmem:[%s5236_s14 + $0x118] sm:$0xff] %vm1206_vm2, %v3474_v12 }
 0x495   : > { %4410 = vst.msk [vmem:[%s5236_s14 + $0xf8] sm:$0xff] %vm1206_vm2, %v4374_v35  ;;  %v4192_v56 = vld [vmem:[%s5236_s14 + $0x108] sm:$0xff] }
 0x496   : > { %v4228_v3 = vadd.f32 %v4192_v56, %v4150_v61  ;;  %3887 = vst.msk [vmem:[%s5236_s14 + $0x110] sm:$0xff] %vm1206_vm2, %v3851_v6 }
 0x497   : > { %v4299_v11 = vld [vmem:[%s5236_s14 + $0x100] sm:$0xff] }
 0x498   : > { %v4339_v16 = vadd.f32 %v7145_v63, %v4299_v11  ;;  %4264 = vst.msk [vmem:[%s5236_s14 + $0x108] sm:$0xff] %vm1206_vm2, %v4228_v3 }
 0x49a   : > { %v4375_v33 = vmax.f32 %v4339_v16, 0.0 }
 0x49b   : > { %v3816_v1 = vld [vmem:[%s5236_s14 + $0x118] sm:$0xff] }
 0x49c   : > { %4411 = vst.msk [vmem:[%s5236_s14 + $0x100] sm:$0xff] %vm1206_vm2, %v4375_v33  ;;  %v3852_v31 = vadd.f32 %v3816_v1, %v3778_v54 }
 0x49d   : > { %v4193_v37 = vld [vmem:[%s5236_s14 + $0x110] sm:$0xff] }
 0x49e   : > { %v4229_v17 = vadd.f32 %v4193_v37, %v4153_v48  ;;  %3888 = vst.msk [vmem:[%s5236_s14 + $0x118] sm:$0xff] %vm1206_vm2, %v3852_v31 }
 0x49f   : > { %v4300_v36 = vld [vmem:[%s5236_s14 + $0x108] sm:$0xff] }
 0x4a0   : > { %v4340_v7 = vadd.f32 %v7145_v63, %v4300_v36  ;;  %4265 = vst.msk [vmem:[%s5236_s14 + $0x110] sm:$0xff] %vm1206_vm2, %v4229_v17 }
 0x4a2   : > { %v4376_v4 = vmax.f32 %v4340_v7, 0.0 }
 0x4a4   : > { %4412 = vst.msk [vmem:[%s5236_s14 + $0x108] sm:$0xff] %vm1206_vm2, %v4376_v4 }
 0x4a5   : > { %v4194_v5 = vld [vmem:[%s5236_s14 + $0x118] sm:$0xff] }
 0x4a6   : > { %v4230_v46 = vadd.f32 %v4194_v5, %v4156_v38 }
 0x4a7   : > { %v4301_v15 = vld [vmem:[%s5236_s14 + $0x110] sm:$0xff] }
 0x4a8   : > { %v4341_v39 = vadd.f32 %v7145_v63, %v4301_v15  ;;  %4266 = vst.msk [vmem:[%s5236_s14 + $0x118] sm:$0xff] %vm1206_vm2, %v4230_v46 }
 0x4aa   : > { %v4377_v52 = vmax.f32 %v4341_v39, 0.0 }
 0x4ac   : > { %4413 = vst.msk [vmem:[%s5236_s14 + $0x110] sm:$0xff] %vm1206_vm2, %v4377_v52 }
 0x4af   : > { %v4302_v43 = vld [vmem:[%s5236_s14 + $0x118] sm:$0xff] }
 0x4b0   : > { %v4342_v28 = vadd.f32 %v7145_v63, %v4302_v43 }
 0x4b2   : > { %v4378_v44 = vmax.f32 %v4342_v28, 0.0 }
 0x4b4   : > { %4414 = vst.msk [vmem:[%s5236_s14 + $0x118] sm:$0xff] %vm1206_vm2, %v4378_v44 }
 0x4b5 PF: > { %s16_s21 = sadd.s32 1, %s4872_s21  }
 0x4b6   : > { %p13_p4 = scmp.ge.s32.totalorder %s16_s21, 4  }
 0x4b8   :  { %15 = sbr.rel (!%p13_p4) target bundleno = 1 (0x1), region = 74 }

</bundles_post_ra>
